<compile_context>
chip_gen: v7x
topology: tpu7x:2x2x1
jax: 0.10.0
libtpu: 0.0.40
codegen_flags: <defaults>
</compile_context>

<pallas_src>
import functools

import numpy as np
import jax
import jax.numpy as jnp
from jax.experimental import pallas as pl
from jax.experimental.pallas import tpu as pltpu

_TB_MAX = 64  # max images per grid step


# --------------------------- fused Pallas kernel ---------------------------

def _lenet_kernel(xa_ref, xb_ref, rs_ref, b1_ref, ms_ref, b2_ref,
                  wf1_ref, bf1_ref, wf2_ref, bf2_ref, wf3_ref, bf3_ref,
                  out_ref, *, tb):
    f32 = jnp.float32
    n = tb * 7  # packed rows per tile (7 packed conv rows per image)

    # ---- conv1 (5x5, 3->6): two batched MXU dots on the whole tile --------
    y1 = (jnp.dot(xa_ref[...], rs_ref[0:384, :], preferred_element_type=f32) +
          jnp.dot(xb_ref[...], rs_ref[384:768, :], preferred_element_type=f32))   # (n, 672)
    # fused 2x2 max-pool + bias + ReLU; columns pre-ordered so both pool
    # stages are plain slab maxima and the result is already [even-H | odd-H].
    wp = jnp.maximum(y1[:, 0:336], y1[:, 336:672])                                  # W-pool
    z1 = jnp.maximum(jnp.maximum(wp[:, 0:168], wp[:, 168:336]) + b1_ref[...], 0.0)  # (n, 168)

    # ---- conv2 (5x5, 6->16): three batched dots on row-shifted z1 slices ---
    s2 = (jnp.dot(z1[0:n - 2, :], ms_ref[0:168, :],   preferred_element_type=f32) +
          jnp.dot(z1[1:n - 1, :], ms_ref[168:336, :], preferred_element_type=f32) +
          jnp.dot(z1[2:n, :],     ms_ref[336:504, :], preferred_element_type=f32))  # (n-2, 320)
    wp2 = jnp.maximum(s2[:, 0:160], s2[:, 160:320])                                  # W-pool
    z2 = jnp.maximum(jnp.maximum(wp2[:, 0:80], wp2[:, 80:160]) + b2_ref[...], 0.0)   # (n-2, 80)

    # ---- fc1 (400->120): flatten permutation folded into weight rows; the
    # h-sum is done with row-shifted batched dots over all packed rows -------
    z2p = jnp.concatenate([z2, jnp.zeros((6, 80), f32)], axis=0)                     # (n+4, 80)
    h1 = bf1_ref[...]
    for r in range(5):
        h1 = h1 + jnp.dot(z2p[r:r + n, :], wf1_ref[r * 80:(r + 1) * 80, :],
                          preferred_element_type=f32)
    h1 = jnp.maximum(h1, 0.0)                                                        # (n, 120)

    # ---- fc2 (120->84) + fc3 (84->10, padded to 128 lanes), single store ----
    h2 = jnp.maximum(jnp.dot(h1, wf2_ref[...], preferred_element_type=f32)
                     + bf2_ref[...], 0.0)                                            # (n, 84)
    out_ref[...] = (jnp.dot(h2, wf3_ref[...], preferred_element_type=f32)
                    + bf3_ref[...])                                                  # (n, 128)


def lenet_forward(x_nchw, kp):
    """x_nchw: (B, 3, 32, 32) float32, kp: prepared kernel params."""
    B = x_nchw.shape[0]
    if B <= 8:
        tb = B                                            # single step, no padding
    else:
        # multiple-of-8 tile, >=2 grid steps (v7x megacore), capped at _TB_MAX
        tb = min(_TB_MAX, (((B + 1) // 2) + 7) // 8 * 8)
    bp = ((B + tb - 1) // tb) * tb

    # Host-side packing (cheap XLA): NCHW -> (B, 8, 384); packed row p holds
    # image rows 4p..4p+3, lane = (h%4)*96 + w*3 + c.  Two shifted views feed
    # the two conv1 Toeplitz matrices.
    x = jnp.transpose(x_nchw, (0, 2, 3, 1)).reshape(B, 8, 384)
    if bp != B:
        x = jnp.concatenate([x, jnp.zeros((bp - B, 8, 384), x.dtype)], axis=0)
    xa = x[:, 0:7, :].reshape(bp * 7, 384)
    xb = x[:, 1:8, :].reshape(bp * 7, 384)

    n = tb * 7
    const = lambda i: (0, 0)
    out = pl.pallas_call(
        functools.partial(_lenet_kernel, tb=tb),
        out_shape=jax.ShapeDtypeStruct((bp * 7, 128), jnp.float32),
        grid=(bp // tb,),
        in_specs=[
            pl.BlockSpec((n, 384), lambda i: (i, 0)),   # xa (rows 0..6 of each image)
            pl.BlockSpec((n, 384), lambda i: (i, 0)),   # xb (rows 1..7 of each image)
            pl.BlockSpec((768, 672), const),            # conv1 Toeplitz [R0; R1]
            pl.BlockSpec((1, 168), const),              # conv1 bias (tiled)
            pl.BlockSpec((504, 320), const),            # conv2 Toeplitz [M0; M1; M2]
            pl.BlockSpec((1, 80), const),               # conv2 bias (tiled)
            pl.BlockSpec((400, 120), const),            # fc1 weight (perm folded, per-h stacked)
            pl.BlockSpec((1, 120), const),              # fc1 bias
            pl.BlockSpec((120, 84), const),             # fc2 weight
            pl.BlockSpec((1, 84), const),               # fc2 bias
            pl.BlockSpec((84, 128), const),             # fc3 weight (padded to 128 lanes)
            pl.BlockSpec((1, 128), const),              # fc3 bias (padded)
        ],
        out_specs=pl.BlockSpec((n, 128), lambda i: (i, 0)),
        compiler_params=pltpu.CompilerParams(
            dimension_semantics=("parallel",),
            vmem_limit_bytes=32 * 1024 * 1024),
    )(xa, xb, kp["Rs"], kp["b1"], kp["Ms"], kp["b2"],
      kp["wf1"], kp["bf1"], kp["wf2"], kp["bf2"], kp["wf3"], kp["bf3"])
    # valid logits of image g live at packed row g*7, lanes 0..9
    return out.reshape(bp, 7, 128)[:B, 0, :10]


# ------------------- host-side (init-time) weight lowering -----------------

def _toeplitz_conv_matrices(w, w_in):
    """Per-kernel-row Toeplitz matrices for a KxK valid conv along W.

    Input-row layout:  col = w*Cin + ci.
    Output-row layout: col = (ow%2)*(OW//2)*Cout + (ow//2)*Cout + co.
    """
    w = np.asarray(w, np.float32)                 # (Cout, Cin, K, K)
    cout, cin, K, _ = w.shape
    ow_n = w_in - K + 1
    half = (ow_n // 2) * cout
    mats = []
    for ki in range(K):
        m = np.zeros((w_in * cin, ow_n * cout), np.float32)
        for ow in range(ow_n):
            oc = (ow % 2) * half + (ow // 2) * cout
            for kj in range(K):
                wi = ow + kj
                m[wi * cin:(wi + 1) * cin, oc:oc + cout] += w[:, :, ki, kj].T
        mats.append(m)
    return mats


def prepare_params(p):
    """PyTorch-layout weights -> fused-kernel layout (done once, off the hot path)."""
    # conv1: packed 4-image-rows-per-sublane-row formulation -> R0, R1 (384, 672).
    m1 = _toeplitz_conv_matrices(p["w1"], 32)               # 5 x (96, 168)
    R = np.zeros((2, 384, 672), np.float32)
    for s in range(4):              # output row inside packed output row
        for r in range(4):          # input row inside packed input row
            for j in range(2):      # packed-input-row offset
                ki = 4 * j + r - s
                if 0 <= ki < 5:
                    R[j, r * 96:(r + 1) * 96, s * 168:(s + 1) * 168] = m1[ki]
    # Re-order output columns: old col = s*168 + parity*84 + inner,
    # new col = parity*336 + pos(s)*84 + inner with pos = [0,2,1,3], so that
    # W-pool = max(halves of 672) and H-pool = max(halves of 336) -> [z1e|z1o].
    pos1 = [0, 2, 1, 3]
    perm1 = np.zeros(672, np.int64)
    for s in range(4):
        for par in range(2):
            for inner in range(84):
                perm1[par * 336 + pos1[s] * 84 + inner] = s * 168 + par * 84 + inner
    R = R[:, :, perm1]
    Rs = np.concatenate([R[0], R[1]], axis=0)               # (768, 672)

    # conv2: even/odd pooled-row Toeplitz blocks, stacked per kernel-row-pair.
    m2 = _toeplitz_conv_matrices(p["w2"], 14)               # 5 x (84, 160)
    E = np.zeros((3, 84, 320), np.float32)
    O = np.zeros((3, 84, 320), np.float32)
    for s in range(2):
        for ki in range(5):
            t = s + ki
            if t % 2 == 0:
                E[t // 2, :, s * 160:(s + 1) * 160] += m2[ki]
            else:
                O[t // 2, :, s * 160:(s + 1) * 160] += m2[ki]
    # old col = s*160 + parity*80 + inner  ->  new col = parity*160 + s*80 + inner
    perm2 = np.zeros(320, np.int64)
    for s in range(2):
        for par in range(2):
            for inner in range(80):
                perm2[par * 160 + s * 80 + inner] = s * 160 + par * 80 + inner
    Ms = np.concatenate(
        [np.concatenate([E[j], O[j]], axis=0)[:, perm2] for j in range(3)], axis=0)  # (504, 320)

    # fc1: fold PyTorch (C, H, W) flatten order into weight rows; stack per h.
    wf1 = np.asarray(p["wf1"], np.float32).reshape(120, 16, 5, 5)   # (n, c, h, w)
    wf1s = wf1.transpose(2, 3, 1, 0).reshape(400, 120)              # row = h*80 + w*16 + c

    wf3 = np.asarray(p["wf3"], np.float32)                          # (10, 84)
    wf3p = np.zeros((84, 128), np.float32); wf3p[:, :10] = wf3.T
    bf3p = np.zeros((1, 128), np.float32);  bf3p[0, :10] = np.asarray(p["bf3"], np.float32)

    return dict(
        Rs=jnp.asarray(Rs),
        b1=jnp.asarray(np.tile(np.asarray(p["b1"], np.float32), 28))[None, :],  # (1, 168)
        Ms=jnp.asarray(Ms),
        b2=jnp.asarray(np.tile(np.asarray(p["b2"], np.float32), 5))[None, :],   # (1, 80)
        wf1=jnp.asarray(wf1s),
        bf1=jnp.asarray(np.asarray(p["bf1"], np.float32))[None, :],
        wf2=jnp.asarray(np.asarray(p["wf2"], np.float32).T),
        bf2=jnp.asarray(np.asarray(p["bf2"], np.float32))[None, :],
        wf3=jnp.asarray(wf3p),
        bf3=jnp.asarray(bf3p),
    )


# ------------------------ pure-JAX (PyTorch-faithful) reference -------------

def lenet_reference(x_nchw, p):
    def conv(x, w, b):
        y = jax.lax.conv_general_dilated(
            x, w, (1, 1), "VALID", dimension_numbers=("NCHW", "OIHW", "NCHW"))
        return y + b.reshape(1, -1, 1, 1)

    def pool(x):
        return jax.lax.reduce_window(x, -jnp.inf, jax.lax.max,
                                     (1, 1, 2, 2), (1, 1, 2, 2), "VALID")

    x = pool(jnp.maximum(conv(x_nchw, p["w1"], p["b1"]), 0.0))
    x = pool(jnp.maximum(conv(x, p["w2"], p["b2"]), 0.0))
    x = x.reshape(x.shape[0], -1)                      # torch.flatten: (C, H, W) order
    x = jnp.maximum(x @ p["wf1"].T + p["bf1"], 0.0)
    x = jnp.maximum(x @ p["wf2"].T + p["bf2"], 0.0)
    return x @ p["wf3"].T + p["bf3"]


# ------------------------------- params / main ------------------------------

def init_params(key):
    """PyTorch-native shapes, uniform(-1/sqrt(fan_in), 1/sqrt(fan_in))."""
    def unif(k, shape, fan_in):
        bound = 1.0 / float(fan_in) ** 0.5
        return jax.random.uniform(k, shape, jnp.float32, -bound, bound)

    ks = jax.random.split(key, 10)
    return {
        "w1": unif(ks[0], (6, 3, 5, 5), 75),    "b1": unif(ks[1], (6,), 75),
        "w2": unif(ks[2], (16, 6, 5, 5), 150),  "b2": unif(ks[3], (16,), 150),
        "wf1": unif(ks[4], (120, 400), 400),    "bf1": unif(ks[5], (120,), 400),
        "wf2": unif(ks[6], (84, 120), 120),     "bf2": unif(ks[7], (84,), 120),
        "wf3": unif(ks[8], (10, 84), 84),       "bf3": unif(ks[9], (10,), 84),
    }


if __name__ == "__main__":
    key = jax.random.PRNGKey(0)
    kx, kp_key = jax.random.split(key)
    x = jax.random.normal(kx, (2, 3, 32, 32), jnp.float32)   # NCHW like PyTorch
    params = init_params(kp_key)
    kparams = prepare_params(params)

    fwd = jax.jit(lenet_forward)
    out = jax.block_until_ready(fwd(x, kparams))

    ref = lenet_reference(x, params)
    assert out.shape == (2, 10), out.shape
    err = float(jnp.max(jnp.abs(out - ref)))
    assert err < 2e-4, f"max abs err {err}"
    print("KERNEL_OK")
</pallas_src>

<mosaic_0001>
module attributes {stable_mosaic.version = 11 : i64} {
  func.func @_lenet_kernel(%arg0: i32, %arg1: memref<14x384xf32, #tpu.memory_space<vmem>>, %arg2: memref<14x384xf32, #tpu.memory_space<vmem>>, %arg3: memref<768x672xf32, #tpu.memory_space<vmem>>, %arg4: memref<1x168xf32, #tpu.memory_space<vmem>>, %arg5: memref<504x320xf32, #tpu.memory_space<vmem>>, %arg6: memref<1x80xf32, #tpu.memory_space<vmem>>, %arg7: memref<400x120xf32, #tpu.memory_space<vmem>>, %arg8: memref<1x120xf32, #tpu.memory_space<vmem>>, %arg9: memref<120x84xf32, #tpu.memory_space<vmem>>, %arg10: memref<1x84xf32, #tpu.memory_space<vmem>>, %arg11: memref<84x128xf32, #tpu.memory_space<vmem>>, %arg12: memref<1x128xf32, #tpu.memory_space<vmem>>, %arg13: memref<14x128xf32, #tpu.memory_space<vmem>>) attributes {dimension_semantics = [#tpu.dimension_semantics<parallel>], iteration_bounds = array<i64: 1>, scalar_prefetch = 0 : i64, scratch_operands = 0 : i64, tpu.core_type = #tpu.core_type<tc>, window_params = [{transform_indices = @transform_0, window_bounds = array<i64: 14, 384>}, {transform_indices = @transform_1, window_bounds = array<i64: 14, 384>}, {pipeline_mode = #tpu.pipeline_mode<synchronous>, transform_indices = @transform_2, window_bounds = array<i64: 768, 672>}, {pipeline_mode = #tpu.pipeline_mode<synchronous>, transform_indices = @transform_3, window_bounds = array<i64: 1, 168>}, {pipeline_mode = #tpu.pipeline_mode<synchronous>, transform_indices = @transform_4, window_bounds = array<i64: 504, 320>}, {pipeline_mode = #tpu.pipeline_mode<synchronous>, transform_indices = @transform_5, window_bounds = array<i64: 1, 80>}, {pipeline_mode = #tpu.pipeline_mode<synchronous>, transform_indices = @transform_6, window_bounds = array<i64: 400, 120>}, {pipeline_mode = #tpu.pipeline_mode<synchronous>, transform_indices = @transform_7, window_bounds = array<i64: 1, 120>}, {pipeline_mode = #tpu.pipeline_mode<synchronous>, transform_indices = @transform_8, window_bounds = array<i64: 120, 84>}, {pipeline_mode = #tpu.pipeline_mode<synchronous>, transform_indices = @transform_9, window_bounds = array<i64: 1, 84>}, {pipeline_mode = #tpu.pipeline_mode<synchronous>, transform_indices = @transform_10, window_bounds = array<i64: 84, 128>}, {pipeline_mode = #tpu.pipeline_mode<synchronous>, transform_indices = @transform_11, window_bounds = array<i64: 1, 128>}, {transform_indices = @transform_12, window_bounds = array<i64: 14, 128>}]} {
    %c0 = arith.constant 0 : index
    %c0_0 = arith.constant 0 : index
    %0 = vector.load %arg1[%c0, %c0_0] : memref<14x384xf32, #tpu.memory_space<vmem>>, vector<14x384xf32>
    %c0_1 = arith.constant 0 : index
    %c0_2 = arith.constant 0 : index
    %1 = vector.load %arg3[%c0_1, %c0_2] : memref<768x672xf32, #tpu.memory_space<vmem>>, vector<384x672xf32>
    %cst = arith.constant dense<0.000000e+00> : vector<14x672xf32>
    %2 = tpu.matmul %0, %1, %cst {dimension_numbers = #tpu.dot_dimension_numbers<[1], [0], [0], [1], [0, 0, 1, 1], [], []>} : vector<14x384xf32>, vector<384x672xf32>, vector<14x672xf32> -> vector<14x672xf32>
    %c0_3 = arith.constant 0 : index
    %c0_4 = arith.constant 0 : index
    %3 = vector.load %arg2[%c0_3, %c0_4] : memref<14x384xf32, #tpu.memory_space<vmem>>, vector<14x384xf32>
    %c384 = arith.constant 384 : index
    %c0_5 = arith.constant 0 : index
    %4 = vector.load %arg3[%c384, %c0_5] : memref<768x672xf32, #tpu.memory_space<vmem>>, vector<384x672xf32>
    %cst_6 = arith.constant dense<0.000000e+00> : vector<14x672xf32>
    %5 = tpu.matmul %3, %4, %cst_6 {dimension_numbers = #tpu.dot_dimension_numbers<[1], [0], [0], [1], [0, 0, 1, 1], [], []>} : vector<14x384xf32>, vector<384x672xf32>, vector<14x672xf32> -> vector<14x672xf32>
    %6 = arith.addf %2, %5 : vector<14x672xf32>
    %7 = vector.extract_strided_slice %6 {offsets = [0, 0], sizes = [14, 336], strides = [1, 1]} : vector<14x672xf32> to vector<14x336xf32>
    %8 = vector.extract_strided_slice %6 {offsets = [0, 336], sizes = [14, 336], strides = [1, 1]} : vector<14x672xf32> to vector<14x336xf32>
    %9 = arith.maximumf %7, %8 : vector<14x336xf32>
    %10 = vector.extract_strided_slice %9 {offsets = [0, 0], sizes = [14, 168], strides = [1, 1]} : vector<14x336xf32> to vector<14x168xf32>
    %11 = vector.extract_strided_slice %9 {offsets = [0, 168], sizes = [14, 168], strides = [1, 1]} : vector<14x336xf32> to vector<14x168xf32>
    %12 = arith.maximumf %10, %11 : vector<14x168xf32>
    %c0_7 = arith.constant 0 : index
    %c0_8 = arith.constant 0 : index
    %13 = vector.load %arg4[%c0_7, %c0_8] : memref<1x168xf32, #tpu.memory_space<vmem>>, vector<1x168xf32>
    %14 = vector.broadcast %13 : vector<1x168xf32> to vector<14x168xf32>
    %15 = arith.addf %12, %14 : vector<14x168xf32>
    %cst_9 = arith.constant 0.000000e+00 : f32
    %16 = vector.broadcast %cst_9 : f32 to vector<14x168xf32>
    %17 = arith.maximumf %15, %16 : vector<14x168xf32>
    %18 = vector.extract_strided_slice %17 {offsets = [0, 0], sizes = [12, 168], strides = [1, 1]} : vector<14x168xf32> to vector<12x168xf32>
    %c0_10 = arith.constant 0 : index
    %c0_11 = arith.constant 0 : index
    %19 = vector.load %arg5[%c0_10, %c0_11] : memref<504x320xf32, #tpu.memory_space<vmem>>, vector<168x320xf32>
    %cst_12 = arith.constant dense<0.000000e+00> : vector<12x320xf32>
    %20 = tpu.matmul %18, %19, %cst_12 {dimension_numbers = #tpu.dot_dimension_numbers<[1], [0], [0], [1], [0, 0, 1, 1], [], []>} : vector<12x168xf32>, vector<168x320xf32>, vector<12x320xf32> -> vector<12x320xf32>
    %21 = vector.extract_strided_slice %17 {offsets = [1, 0], sizes = [12, 168], strides = [1, 1]} : vector<14x168xf32> to vector<12x168xf32>
    %c168 = arith.constant 168 : index
    %c0_13 = arith.constant 0 : index
    %22 = vector.load %arg5[%c168, %c0_13] : memref<504x320xf32, #tpu.memory_space<vmem>>, vector<168x320xf32>
    %cst_14 = arith.constant dense<0.000000e+00> : vector<12x320xf32>
    %23 = tpu.matmul %21, %22, %cst_14 {dimension_numbers = #tpu.dot_dimension_numbers<[1], [0], [0], [1], [0, 0, 1, 1], [], []>} : vector<12x168xf32>, vector<168x320xf32>, vector<12x320xf32> -> vector<12x320xf32>
    %24 = arith.addf %20, %23 : vector<12x320xf32>
    %25 = vector.extract_strided_slice %17 {offsets = [2, 0], sizes = [12, 168], strides = [1, 1]} : vector<14x168xf32> to vector<12x168xf32>
    %c336 = arith.constant 336 : index
    %c0_15 = arith.constant 0 : index
    %26 = vector.load %arg5[%c336, %c0_15] : memref<504x320xf32, #tpu.memory_space<vmem>>, vector<168x320xf32>
    %cst_16 = arith.constant dense<0.000000e+00> : vector<12x320xf32>
    %27 = tpu.matmul %25, %26, %cst_16 {dimension_numbers = #tpu.dot_dimension_numbers<[1], [0], [0], [1], [0, 0, 1, 1], [], []>} : vector<12x168xf32>, vector<168x320xf32>, vector<12x320xf32> -> vector<12x320xf32>
    %28 = arith.addf %24, %27 : vector<12x320xf32>
    %29 = vector.extract_strided_slice %28 {offsets = [0, 0], sizes = [12, 160], strides = [1, 1]} : vector<12x320xf32> to vector<12x160xf32>
    %30 = vector.extract_strided_slice %28 {offsets = [0, 160], sizes = [12, 160], strides = [1, 1]} : vector<12x320xf32> to vector<12x160xf32>
    %31 = arith.maximumf %29, %30 : vector<12x160xf32>
    %32 = vector.extract_strided_slice %31 {offsets = [0, 0], sizes = [12, 80], strides = [1, 1]} : vector<12x160xf32> to vector<12x80xf32>
    %33 = vector.extract_strided_slice %31 {offsets = [0, 80], sizes = [12, 80], strides = [1, 1]} : vector<12x160xf32> to vector<12x80xf32>
    %34 = arith.maximumf %32, %33 : vector<12x80xf32>
    %c0_17 = arith.constant 0 : index
    %c0_18 = arith.constant 0 : index
    %35 = vector.load %arg6[%c0_17, %c0_18] : memref<1x80xf32, #tpu.memory_space<vmem>>, vector<1x80xf32>
    %36 = vector.broadcast %35 : vector<1x80xf32> to vector<12x80xf32>
    %37 = arith.addf %34, %36 : vector<12x80xf32>
    %cst_19 = arith.constant 0.000000e+00 : f32
    %38 = vector.broadcast %cst_19 : f32 to vector<12x80xf32>
    %39 = arith.maximumf %37, %38 : vector<12x80xf32>
    %cst_20 = arith.constant 0.000000e+00 : f32
    %40 = vector.broadcast %cst_20 : f32 to vector<6x80xf32>
    %41 = tpu.concatenate %39, %40 in 0 : vector<12x80xf32>, vector<6x80xf32> -> vector<18x80xf32>
    %c0_21 = arith.constant 0 : index
    %c0_22 = arith.constant 0 : index
    %42 = vector.load %arg8[%c0_21, %c0_22] : memref<1x120xf32, #tpu.memory_space<vmem>>, vector<1x120xf32>
    %43 = vector.extract_strided_slice %41 {offsets = [0, 0], sizes = [14, 80], strides = [1, 1]} : vector<18x80xf32> to vector<14x80xf32>
    %c0_23 = arith.constant 0 : index
    %c0_24 = arith.constant 0 : index
    %44 = vector.load %arg7[%c0_23, %c0_24] : memref<400x120xf32, #tpu.memory_space<vmem>>, vector<80x120xf32>
    %cst_25 = arith.constant dense<0.000000e+00> : vector<14x120xf32>
    %45 = tpu.matmul %43, %44, %cst_25 {dimension_numbers = #tpu.dot_dimension_numbers<[1], [0], [0], [1], [0, 0, 1, 1], [], []>} : vector<14x80xf32>, vector<80x120xf32>, vector<14x120xf32> -> vector<14x120xf32>
    %46 = vector.broadcast %42 : vector<1x120xf32> to vector<14x120xf32>
    %47 = arith.addf %46, %45 : vector<14x120xf32>
    %48 = vector.extract_strided_slice %41 {offsets = [1, 0], sizes = [14, 80], strides = [1, 1]} : vector<18x80xf32> to vector<14x80xf32>
    %c80 = arith.constant 80 : index
    %c0_26 = arith.constant 0 : index
    %49 = vector.load %arg7[%c80, %c0_26] : memref<400x120xf32, #tpu.memory_space<vmem>>, vector<80x120xf32>
    %cst_27 = arith.constant dense<0.000000e+00> : vector<14x120xf32>
    %50 = tpu.matmul %48, %49, %cst_27 {dimension_numbers = #tpu.dot_dimension_numbers<[1], [0], [0], [1], [0, 0, 1, 1], [], []>} : vector<14x80xf32>, vector<80x120xf32>, vector<14x120xf32> -> vector<14x120xf32>
    %51 = arith.addf %47, %50 : vector<14x120xf32>
    %52 = vector.extract_strided_slice %41 {offsets = [2, 0], sizes = [14, 80], strides = [1, 1]} : vector<18x80xf32> to vector<14x80xf32>
    %c160 = arith.constant 160 : index
    %c0_28 = arith.constant 0 : index
    %53 = vector.load %arg7[%c160, %c0_28] : memref<400x120xf32, #tpu.memory_space<vmem>>, vector<80x120xf32>
    %cst_29 = arith.constant dense<0.000000e+00> : vector<14x120xf32>
    %54 = tpu.matmul %52, %53, %cst_29 {dimension_numbers = #tpu.dot_dimension_numbers<[1], [0], [0], [1], [0, 0, 1, 1], [], []>} : vector<14x80xf32>, vector<80x120xf32>, vector<14x120xf32> -> vector<14x120xf32>
    %55 = arith.addf %51, %54 : vector<14x120xf32>
    %56 = vector.extract_strided_slice %41 {offsets = [3, 0], sizes = [14, 80], strides = [1, 1]} : vector<18x80xf32> to vector<14x80xf32>
    %c240 = arith.constant 240 : index
    %c0_30 = arith.constant 0 : index
    %57 = vector.load %arg7[%c240, %c0_30] : memref<400x120xf32, #tpu.memory_space<vmem>>, vector<80x120xf32>
    %cst_31 = arith.constant dense<0.000000e+00> : vector<14x120xf32>
    %58 = tpu.matmul %56, %57, %cst_31 {dimension_numbers = #tpu.dot_dimension_numbers<[1], [0], [0], [1], [0, 0, 1, 1], [], []>} : vector<14x80xf32>, vector<80x120xf32>, vector<14x120xf32> -> vector<14x120xf32>
    %59 = arith.addf %55, %58 : vector<14x120xf32>
    %60 = vector.extract_strided_slice %41 {offsets = [4, 0], sizes = [14, 80], strides = [1, 1]} : vector<18x80xf32> to vector<14x80xf32>
    %c320 = arith.constant 320 : index
    %c0_32 = arith.constant 0 : index
    %61 = vector.load %arg7[%c320, %c0_32] : memref<400x120xf32, #tpu.memory_space<vmem>>, vector<80x120xf32>
    %cst_33 = arith.constant dense<0.000000e+00> : vector<14x120xf32>
    %62 = tpu.matmul %60, %61, %cst_33 {dimension_numbers = #tpu.dot_dimension_numbers<[1], [0], [0], [1], [0, 0, 1, 1], [], []>} : vector<14x80xf32>, vector<80x120xf32>, vector<14x120xf32> -> vector<14x120xf32>
    %63 = arith.addf %59, %62 : vector<14x120xf32>
    %cst_34 = arith.constant 0.000000e+00 : f32
    %64 = vector.broadcast %cst_34 : f32 to vector<14x120xf32>
    %65 = arith.maximumf %63, %64 : vector<14x120xf32>
    %c0_35 = arith.constant 0 : index
    %c0_36 = arith.constant 0 : index
    %66 = vector.load %arg9[%c0_35, %c0_36] : memref<120x84xf32, #tpu.memory_space<vmem>>, vector<120x84xf32>
    %cst_37 = arith.constant dense<0.000000e+00> : vector<14x84xf32>
    %67 = tpu.matmul %65, %66, %cst_37 {dimension_numbers = #tpu.dot_dimension_numbers<[1], [0], [0], [1], [0, 0, 1, 1], [], []>} : vector<14x120xf32>, vector<120x84xf32>, vector<14x84xf32> -> vector<14x84xf32>
    %c0_38 = arith.constant 0 : index
    %c0_39 = arith.constant 0 : index
    %68 = vector.load %arg10[%c0_38, %c0_39] : memref<1x84xf32, #tpu.memory_space<vmem>>, vector<1x84xf32>
    %69 = vector.broadcast %68 : vector<1x84xf32> to vector<14x84xf32>
    %70 = arith.addf %67, %69 : vector<14x84xf32>
    %cst_40 = arith.constant 0.000000e+00 : f32
    %71 = vector.broadcast %cst_40 : f32 to vector<14x84xf32>
    %72 = arith.maximumf %70, %71 : vector<14x84xf32>
    %c0_41 = arith.constant 0 : index
    %c0_42 = arith.constant 0 : index
    %73 = vector.load %arg11[%c0_41, %c0_42] : memref<84x128xf32, #tpu.memory_space<vmem>>, vector<84x128xf32>
    %cst_43 = arith.constant dense<0.000000e+00> : vector<14x128xf32>
    %74 = tpu.matmul %72, %73, %cst_43 {dimension_numbers = #tpu.dot_dimension_numbers<[1], [0], [0], [1], [0, 0, 1, 1], [], []>} : vector<14x84xf32>, vector<84x128xf32>, vector<14x128xf32> -> vector<14x128xf32>
    %c0_44 = arith.constant 0 : index
    %c0_45 = arith.constant 0 : index
    %75 = vector.load %arg12[%c0_44, %c0_45] : memref<1x128xf32, #tpu.memory_space<vmem>>, vector<1x128xf32>
    %76 = vector.broadcast %75 : vector<1x128xf32> to vector<14x128xf32>
    %77 = arith.addf %74, %76 : vector<14x128xf32>
    %c0_46 = arith.constant 0 : index
    %c0_47 = arith.constant 0 : index
    %78 = vector.load %arg13[%c0_46, %c0_47] : memref<14x128xf32, #tpu.memory_space<vmem>>, vector<14x128xf32>
    tpu.vector_store %arg13[%c0_46, %c0_47], %77 {strides = array<i32>} : memref<14x128xf32, #tpu.memory_space<vmem>>, vector<14x128xf32>,
    return
  }
  func.func @transform_0(%arg0: i32) -> (i32, i32) {
    %c0_i32 = arith.constant 0 : i32
    %c0_i32_0 = arith.constant 0 : i32
    return %arg0, %c0_i32 : i32, i32
  }
  func.func @transform_1(%arg0: i32) -> (i32, i32) {
    %c0_i32 = arith.constant 0 : i32
    %c0_i32_0 = arith.constant 0 : i32
    return %arg0, %c0_i32 : i32, i32
  }
  func.func @transform_2(%arg0: i32) -> (i32, i32) {
    %c0_i32 = arith.constant 0 : i32
    %c0_i32_0 = arith.constant 0 : i32
    %c0_i32_1 = arith.constant 0 : i32
    return %c0_i32, %c0_i32_0 : i32, i32
  }
  func.func @transform_3(%arg0: i32) -> (i32, i32) {
    %c0_i32 = arith.constant 0 : i32
    %c0_i32_0 = arith.constant 0 : i32
    %c0_i32_1 = arith.constant 0 : i32
    return %c0_i32, %c0_i32_0 : i32, i32
  }
  func.func @transform_4(%arg0: i32) -> (i32, i32) {
    %c0_i32 = arith.constant 0 : i32
    %c0_i32_0 = arith.constant 0 : i32
    %c0_i32_1 = arith.constant 0 : i32
    return %c0_i32, %c0_i32_0 : i32, i32
  }
  func.func @transform_5(%arg0: i32) -> (i32, i32) {
    %c0_i32 = arith.constant 0 : i32
    %c0_i32_0 = arith.constant 0 : i32
    %c0_i32_1 = arith.constant 0 : i32
    return %c0_i32, %c0_i32_0 : i32, i32
  }
  func.func @transform_6(%arg0: i32) -> (i32, i32) {
    %c0_i32 = arith.constant 0 : i32
    %c0_i32_0 = arith.constant 0 : i32
    %c0_i32_1 = arith.constant 0 : i32
    return %c0_i32, %c0_i32_0 : i32, i32
  }
  func.func @transform_7(%arg0: i32) -> (i32, i32) {
    %c0_i32 = arith.constant 0 : i32
    %c0_i32_0 = arith.constant 0 : i32
    %c0_i32_1 = arith.constant 0 : i32
    return %c0_i32, %c0_i32_0 : i32, i32
  }
  func.func @transform_8(%arg0: i32) -> (i32, i32) {
    %c0_i32 = arith.constant 0 : i32
    %c0_i32_0 = arith.constant 0 : i32
    %c0_i32_1 = arith.constant 0 : i32
    return %c0_i32, %c0_i32_0 : i32, i32
  }
  func.func @transform_9(%arg0: i32) -> (i32, i32) {
    %c0_i32 = arith.constant 0 : i32
    %c0_i32_0 = arith.constant 0 : i32
    %c0_i32_1 = arith.constant 0 : i32
    return %c0_i32, %c0_i32_0 : i32, i32
  }
  func.func @transform_10(%arg0: i32) -> (i32, i32) {
    %c0_i32 = arith.constant 0 : i32
    %c0_i32_0 = arith.constant 0 : i32
    %c0_i32_1 = arith.constant 0 : i32
    return %c0_i32, %c0_i32_0 : i32, i32
  }
  func.func @transform_11(%arg0: i32) -> (i32, i32) {
    %c0_i32 = arith.constant 0 : i32
    %c0_i32_0 = arith.constant 0 : i32
    %c0_i32_1 = arith.constant 0 : i32
    return %c0_i32, %c0_i32_0 : i32, i32
  }
  func.func @transform_12(%arg0: i32) -> (i32, i32) {
    %c0_i32 = arith.constant 0 : i32
    %c0_i32_0 = arith.constant 0 : i32
    return %arg0, %c0_i32 : i32, i32
  }
}

</mosaic_0001>

<bundles_post_ra>
// kernel: lenet_forward.1
= control target key start
LH: loop header
LB: loop body
LE: loop exit
PB: predicated region body
PF: predicated region fallthrough
CT: control target
= control target key end

     0   :  { %s4376_s16 = smov 48   ;;  %vm1577_vm0 = vcmask 392192   ;;  %vm1608_vm1 = vcmask 719872   ;;  %vm1769_vm2 = vcmask 1046528   ;;  %vm1778_vm3 = vcmask 326656   ;;  %s7279_s2 = inlined_call_operand.vmem [shape: f32[768,672], index: 2, kind: input, shape index: {}]   ;;  %s7280_s1 = inlined_call_operand.vmem [shape: f32[14,384], index: 1, kind: input, shape index: {}]   ;;  %s7281_s0 = inlined_call_operand.vmem [shape: f32[14,384], index: 0, kind: input, shape index: {}]   ;;  %s7282_s4 = inlined_call_operand.vmem [shape: f32[504,320], index: 4, kind: input, shape index: {}]   ;;  %s7283_s3 = inlined_call_operand.vmem [shape: f32[1,168], index: 3, kind: input, shape index: {}]   ;;  %s7284_s6 = inlined_call_operand.vmem [shape: f32[400,120], index: 6, kind: input, shape index: {}]   ;;  %s7285_s8 = inlined_call_operand.vmem [shape: f32[120,84], index: 8, kind: input, shape index: {}]   ;;  %s7286_s5 = inlined_call_operand.vmem [shape: f32[1,80], index: 5, kind: input, shape index: {}]   ;;  %s7287_s10 = inlined_call_operand.vmem [shape: f32[84,128], index: 10, kind: input, shape index: {}]   ;;  %s7288_s7 = inlined_call_operand.vmem [shape: f32[1,120], index: 7, kind: input, shape index: {}]   ;;  %s7289_s9 = inlined_call_operand.vmem [shape: f32[1,84], index: 9, kind: input, shape index: {}]   ;;  %s7290_s11 = inlined_call_operand.vmem [shape: f32[1,128], index: 11, kind: input, shape index: {}]   ;;  %s7291_s12 = inlined_call_operand.vmem [shape: f32[14,128], index: 12, kind: output, shape index: {}]  }
   0x1   :  { %v342_v0 = vld [vmem:[%s7279_s2 + $0x908] sm:$0xff]  ;;  %v348_v1 = vld [vmem:[%s7279_s2 + $0x938] sm:$0xff]  ;;  %v341_v2 = vld [vmem:[%s7279_s2 + $0x900] sm:$0xff]  ;;  %vm2154_vm4 = vcmask 1045504   ;;  %vm2337_vm5 = vcmask 785408   ;;  %vm2390_vm6 = vcmask 654336  }
   0x2   :  { %v3373_v3 = vpack.c.bf16 %v348_v1, %v342_v0  ;;  %v347_v4 = vld [vmem:[%s7279_s2 + $0x930] sm:$0xff]  ;;  %v354_v5 = vld [vmem:[%s7279_s2 + $0x968] sm:$0xff]  ;;  %v360_v6 = vld [vmem:[%s7279_s2 + $0x998] sm:$0xff]  ;;  %vm2377_vm7 = vcmask 1043456   ;;  %vm2679_vm8 = vcmask 1044480   ;;  %vm2886_vm9 = vcmask 982016  }
   0x3   :  { %v3375_v7 = vpack.c.bf16 %v347_v4, %v341_v2  ;;  %v3377_v8 = vpack.c.bf16 %v360_v6, %v354_v5  ;;  %v353_v9 = vld [vmem:[%s7279_s2 + $0x960] sm:$0xff]  ;;  %v359_v10 = vld [vmem:[%s7279_s2 + $0x990] sm:$0xff]  ;;  %v366_v11 = vld [vmem:[%s7279_s2 + $0x9c8] sm:$0xff]  ;;  %vm2988_vm10 = vcmask 687104  }
   0x4   :  { %3374 = vmatprep.subr.bf16.mxu0 %v3373_v3  ;;  %v372_v12 = vld [vmem:[%s7279_s2 + $0x9f8] sm:$0xff]  ;;  %v3379_v13 = vpack.c.bf16 %v359_v10, %v353_v9  ;;  %v365_v15 = vld [vmem:[%s7279_s2 + $0x9c0] sm:$0xff]  ;;  %v371_v16 = vld [vmem:[%s7279_s2 + $0x9f0] sm:$0xff] }
   0x5   :  { %3376 = vmatpush1.bf16.msra.mxu0 %v3375_v7  ;;  %v3381_v14 = vpack.c.bf16 %v372_v12, %v366_v11  ;;  %v378_v17 = vld [vmem:[%s7279_s2 + $0xa28] sm:$0xff]  ;;  %v384_v18 = vld [vmem:[%s7279_s2 + $0xa58] sm:$0xff]  ;;  %v3383_v19 = vpack.c.bf16 %v371_v16, %v365_v15  ;;  %v377_v21 = vld [vmem:[%s7279_s2 + $0xa20] sm:$0xff] }
   0x6   :  { %3378 = vmatprep.subr.bf16.mxu0 %v3377_v8  ;;  %v3385_v20 = vpack.c.bf16 %v384_v18, %v378_v17  ;;  %v383_v22 = vld [vmem:[%s7279_s2 + $0xa50] sm:$0xff]  ;;  %v390_v23 = vld [vmem:[%s7279_s2 + $0xa88] sm:$0xff]  ;;  %v396_v24 = vld [vmem:[%s7279_s2 + $0xab8] sm:$0xff] }
   0x7   :  { %v3387_v25 = vpack.c.bf16 %v383_v22, %v377_v21  ;;  %v3389_v26 = vpack.c.bf16 %v396_v24, %v390_v23  ;;  %v389_v27 = vld [vmem:[%s7279_s2 + $0xa80] sm:$0xff]  ;;  %v395_v28 = vld [vmem:[%s7279_s2 + $0xab0] sm:$0xff]  ;;  %v402_v29 = vld [vmem:[%s7279_s2 + $0xae8] sm:$0xff] }
   0x8   :  { %v408_v30 = vld [vmem:[%s7279_s2 + $0xb18] sm:$0xff]  ;;  %v3391_v31 = vpack.c.bf16 %v395_v28, %v389_v27  ;;  %v401_v33 = vld [vmem:[%s7279_s2 + $0xae0] sm:$0xff]  ;;  %v407_v34 = vld [vmem:[%s7279_s2 + $0xb10] sm:$0xff] }
   0x9   :  { %3380 = vmatpush1.bf16.msra.mxu0 %v3379_v13  ;;  %v3393_v32 = vpack.c.bf16 %v408_v30, %v402_v29  ;;  %v414_v35 = vld [vmem:[%s7279_s2 + $0xb48] sm:$0xff]  ;;  %v420_v36 = vld [vmem:[%s7279_s2 + $0xb78] sm:$0xff]  ;;  %v3395_v39 = vpack.c.bf16 %v407_v34, %v401_v33  ;;  %v413_v40 = vld [vmem:[%s7279_s2 + $0xb40] sm:$0xff] }
   0xa   :  { %3382 = vmatprep.subr.bf16.mxu0 %v3381_v14  ;;  %v344_v37 = vld [vmem:[%s7279_s2 + $0x918] sm:$0xff]  ;;  %v350_v38 = vld [vmem:[%s7279_s2 + $0x948] sm:$0xff]  ;;  %v343_v42 = vld [vmem:[%s7279_s2 + $0x910] sm:$0xff]  ;;  %v3397_v43 = vpack.c.bf16 %v420_v36, %v414_v35 }
   0xb   :  { %v3469_v41 = vpack.c.bf16 %v350_v38, %v344_v37  ;;  %v419_v44 = vld [vmem:[%s7279_s2 + $0xb70] sm:$0xff]  ;;  %v426_v45 = vld [vmem:[%s7279_s2 + $0xba8] sm:$0xff]  ;;  %v349_v46 = vld [vmem:[%s7279_s2 + $0x940] sm:$0xff] }
   0xc   :  { %v432_v47 = vld [vmem:[%s7279_s2 + $0xbd8] sm:$0xff]  ;;  %v3471_v48 = vpack.c.bf16 %v349_v46, %v343_v42  ;;  %v362_v50 = vld [vmem:[%s7279_s2 + $0x9a8] sm:$0xff]  ;;  %v355_v52 = vld [vmem:[%s7279_s2 + $0x970] sm:$0xff]  ;;  %v3399_v54 = vpack.c.bf16 %v419_v44, %v413_v40 }
   0xd   :  { %3384 = vmatpush1.bf16.msra.mxu0 %v3383_v19  ;;  %3470 = vmatprep.subr.bf16.mxu1 %v3469_v41  ;;  %v356_v49 = vld [vmem:[%s7279_s2 + $0x978] sm:$0xff]  ;;  %v361_v53 = vld [vmem:[%s7279_s2 + $0x9a0] sm:$0xff]  ;;  %v4565_v57 = vld [vmem:[%s7280_s1 + $0x8] sm:$0xff]  ;;  %v3401_v58 = vpack.c.bf16 %v432_v47, %v426_v45 }
   0xe   :  { %3386 = vmatprep.subr.bf16.mxu0 %v3385_v20  ;;  %v3473_v51 = vpack.c.bf16 %v362_v50, %v356_v49  ;;  %v425_v55 = vld [vmem:[%s7279_s2 + $0xba0] sm:$0xff]  ;;  %3472 = vmatpush1.bf16.msra.mxu1 %v3471_v48  ;;  %v3475_v56 = vpack.c.bf16 %v361_v53, %v355_v52  ;;  %v431_v59 = vld [vmem:[%s7279_s2 + $0xbd0] sm:$0xff]  ;;  %v368_v60 = vld [vmem:[%s7279_s2 + $0x9d8] sm:$0xff] }
   0xf   :  { %v374_v61 = vld [vmem:[%s7279_s2 + $0xa08] sm:$0xff]  ;;  %v444_v63 = vld [vmem:[%s7279_s2 + $0xc38] sm:$0xff]  ;;  %693 = vmatprep.mubr.f32.mxu0 %v4565_v57  ;;  %v367_v1 = vld [vmem:[%s7279_s2 + $0x9d0] sm:$0xff]  ;;  %847 = vmatprep.mubr.f32.mxu1 %v4565_v57  ;;  %v3403_v3 = vpack.c.bf16 %v431_v59, %v425_v55 }
  0x10   :  { %3474 = vmatprep.subr.bf16.mxu1 %v3473_v51  ;;  %v438_v62 = vld [vmem:[%s7279_s2 + $0xc08] sm:$0xff]  ;;  %v3477_v0 = vpack.c.bf16 %v374_v61, %v368_v60  ;;  %v373_v2 = vld [vmem:[%s7279_s2 + $0xa00] sm:$0xff]  ;;  %v380_v6 = vld [vmem:[%s7279_s2 + $0xa38] sm:$0xff] }
  0x11   :  { %3388 = vmatpush1.bf16.msra.mxu0 %v3387_v25  ;;  %v437_v4 = vld [vmem:[%s7279_s2 + $0xc00] sm:$0xff]  ;;  %v3479_v5 = vpack.c.bf16 %v373_v2, %v367_v1  ;;  %v386_v7 = vld [vmem:[%s7279_s2 + $0xa68] sm:$0xff]  ;;  %v3405_v8 = vpack.c.bf16 %v444_v63, %v438_v62  ;;  %v443_v9 = vld [vmem:[%s7279_s2 + $0xc30] sm:$0xff] }
  0x12   :  { %3390 = vmatprep.subr.bf16.mxu0 %v3389_v26  ;;  %3476 = vmatpush1.bf16.msra.mxu1 %v3475_v56  ;;  %v3481_v10 = vpack.c.bf16 %v386_v7, %v380_v6  ;;  %v379_v11 = vld [vmem:[%s7279_s2 + $0xa30] sm:$0xff]  ;;  %v385_v12 = vld [vmem:[%s7279_s2 + $0xa60] sm:$0xff]  ;;  %v450_v13 = vld [vmem:[%s7279_s2 + $0xc68] sm:$0xff]  ;;  %v3407_v17 = vpack.c.bf16 %v443_v9, %v437_v4 }
  0x13   :  { %3478 = vmatprep.subr.bf16.mxu1 %v3477_v0  ;;  %v456_v14 = vld [vmem:[%s7279_s2 + $0xc98] sm:$0xff]  ;;  %v398_v16 = vld [vmem:[%s7279_s2 + $0xac8] sm:$0xff]  ;;  %v449_v18 = vld [vmem:[%s7279_s2 + $0xc60] sm:$0xff]  ;;  %v3483_v20 = vpack.c.bf16 %v385_v12, %v379_v11 }
  0x14   :  { %v392_v15 = vld [vmem:[%s7279_s2 + $0xa98] sm:$0xff]  ;;  %v455_v19 = vld [vmem:[%s7279_s2 + $0xc90] sm:$0xff]  ;;  %v3409_v21 = vpack.c.bf16 %v456_v14, %v450_v13  ;;  %v462_v22 = vld [vmem:[%s7279_s2 + $0xcc8] sm:$0xff] }
  0x15   :  { %3392 = vmatpush1.bf16.msra.mxu0 %v3391_v31  ;;  %v3485_v23 = vpack.c.bf16 %v398_v16, %v392_v15  ;;  %v391_v24 = vld [vmem:[%s7279_s2 + $0xa90] sm:$0xff]  ;;  %v397_v25 = vld [vmem:[%s7279_s2 + $0xac0] sm:$0xff]  ;;  %v468_v26 = vld [vmem:[%s7279_s2 + $0xcf8] sm:$0xff]  ;;  %v3411_v29 = vpack.c.bf16 %v455_v19, %v449_v18 }
  0x16   :  { %3394 = vmatprep.subr.bf16.mxu0 %v3393_v32  ;;  %3480 = vmatpush1.bf16.msra.mxu1 %v3479_v5  ;;  %v404_v27 = vld [vmem:[%s7279_s2 + $0xaf8] sm:$0xff]  ;;  %v410_v28 = vld [vmem:[%s7279_s2 + $0xb28] sm:$0xff]  ;;  %v461_v30 = vld [vmem:[%s7279_s2 + $0xcc0] sm:$0xff]  ;;  %v3487_v32 = vpack.c.bf16 %v397_v25, %v391_v24  ;;  %v3413_v33 = vpack.c.bf16 %v468_v26, %v462_v22 }
  0x17   :  { %3482 = vmatprep.subr.bf16.mxu1 %v3481_v10  ;;  %v467_v31 = vld [vmem:[%s7279_s2 + $0xcf0] sm:$0xff]  ;;  %v474_v34 = vld [vmem:[%s7279_s2 + $0xd28] sm:$0xff]  ;;  %v3489_v35 = vpack.c.bf16 %v410_v28, %v404_v27  ;;  %v409_v37 = vld [vmem:[%s7279_s2 + $0xb20] sm:$0xff] }
  0x18   :  { %v403_v36 = vld [vmem:[%s7279_s2 + $0xaf0] sm:$0xff]  ;;  %v480_v38 = vld [vmem:[%s7279_s2 + $0xd58] sm:$0xff]  ;;  %v422_v40 = vld [vmem:[%s7279_s2 + $0xb88] sm:$0xff]  ;;  %v3415_v41 = vpack.c.bf16 %v467_v31, %v461_v30 }
  0x19   :  { %3396 = vmatpush1.bf16.msra.mxu0 %v3395_v39  ;;  %v416_v39 = vld [vmem:[%s7279_s2 + $0xb58] sm:$0xff]  ;;  %v473_v42 = vld [vmem:[%s7279_s2 + $0xd20] sm:$0xff]  ;;  %v3491_v44 = vpack.c.bf16 %v409_v37, %v403_v36  ;;  %v3417_v45 = vpack.c.bf16 %v480_v38, %v474_v34  ;;  %v486_v46 = vld [vmem:[%s7279_s2 + $0xd88] sm:$0xff] }
  0x1a   :  { %3398 = vmatprep.subr.bf16.mxu0 %v3397_v43  ;;  %3484 = vmatpush1.bf16.msra.mxu1 %v3483_v20  ;;  %v479_v43 = vld [vmem:[%s7279_s2 + $0xd50] sm:$0xff]  ;;  %v3493_v47 = vpack.c.bf16 %v422_v40, %v416_v39  ;;  %v421_v49 = vld [vmem:[%s7279_s2 + $0xb80] sm:$0xff]  ;;  %v492_v50 = vld [vmem:[%s7279_s2 + $0xdb8] sm:$0xff] }
  0x1b   :  { %3486 = vmatprep.subr.bf16.mxu1 %v3485_v23  ;;  %v415_v48 = vld [vmem:[%s7279_s2 + $0xb50] sm:$0xff]  ;;  %v428_v51 = vld [vmem:[%s7279_s2 + $0xbb8] sm:$0xff]  ;;  %v434_v52 = vld [vmem:[%s7279_s2 + $0xbe8] sm:$0xff]  ;;  %v3419_v53 = vpack.c.bf16 %v479_v43, %v473_v42 }
  0x1c   :  { %v491_v55 = vld [vmem:[%s7279_s2 + $0xdb0] sm:$0xff]  ;;  %v3495_v56 = vpack.c.bf16 %v421_v49, %v415_v48  ;;  %v498_v59 = vld [vmem:[%s7279_s2 + $0xde8] sm:$0xff]  ;;  %v3497_v60 = vpack.c.bf16 %v434_v52, %v428_v51  ;;  %v433_v62 = vld [vmem:[%s7279_s2 + $0xbe0] sm:$0xff] }
  0x1d   :  { %3400 = vmatpush1.bf16.msra.mxu0 %v3399_v54  ;;  %v485_v54 = vld [vmem:[%s7279_s2 + $0xd80] sm:$0xff]  ;;  %v427_v61 = vld [vmem:[%s7279_s2 + $0xbb0] sm:$0xff]  ;;  %v504_v63 = vld [vmem:[%s7279_s2 + $0xe18] sm:$0xff] }
  0x1e   :  { %3402 = vmatprep.subr.bf16.mxu0 %v3401_v58  ;;  %3488 = vmatpush1.bf16.msra.mxu1 %v3487_v32  ;;  %v3421_v58 = vpack.c.bf16 %v492_v50, %v486_v46  ;;  %v440_v0 = vld [vmem:[%s7279_s2 + $0xc18] sm:$0xff]  ;;  %v446_v1 = vld [vmem:[%s7279_s2 + $0xc48] sm:$0xff]  ;;  %v3423_v2 = vpack.c.bf16 %v491_v55, %v485_v54  ;;  %v503_v4 = vld [vmem:[%s7279_s2 + $0xe10] sm:$0xff]  ;;  %v3499_v5 = vpack.c.bf16 %v433_v62, %v427_v61 }
  0x1f   :  { %3490 = vmatprep.subr.bf16.mxu1 %v3489_v35  ;;  %v3425_v6 = vpack.c.bf16 %v504_v63, %v498_v59  ;;  %v510_v7 = vld [vmem:[%s7279_s2 + $0xe48] sm:$0xff]  ;;  %v439_v9 = vld [vmem:[%s7279_s2 + $0xc10] sm:$0xff]  ;;  %v445_v10 = vld [vmem:[%s7279_s2 + $0xc40] sm:$0xff] }
  0x20   :  { %v516_v11 = vld [vmem:[%s7279_s2 + $0xe78] sm:$0xff]  ;;  %v458_v13 = vld [vmem:[%s7279_s2 + $0xca8] sm:$0xff]  ;;  %v509_v15 = vld [vmem:[%s7279_s2 + $0xe40] sm:$0xff] }
  0x21   :  { %3404 = vmatpush1.bf16.msra.mxu0 %v3403_v3  ;;  %v497_v3 = vld [vmem:[%s7279_s2 + $0xde0] sm:$0xff]  ;;  %v452_v12 = vld [vmem:[%s7279_s2 + $0xc78] sm:$0xff]  ;;  %v515_v16 = vld [vmem:[%s7279_s2 + $0xe70] sm:$0xff]  ;;  %v3429_v18 = vpack.c.bf16 %v516_v11, %v510_v7 }
  0x22   :  { %3406 = vmatprep.subr.bf16.mxu0 %v3405_v8  ;;  %3492 = vmatpush1.bf16.msra.mxu1 %v3491_v44  ;;  %v3501_v8 = vpack.c.bf16 %v446_v1, %v440_v0  ;;  %v3427_v14 = vpack.c.bf16 %v503_v4, %v497_v3  ;;  %v522_v19 = vld [vmem:[%s7279_s2 + $0xea8] sm:$0xff]  ;;  %v3505_v20 = vpack.c.bf16 %v458_v13, %v452_v12  ;;  %v457_v22 = vld [vmem:[%s7279_s2 + $0xca0] sm:$0xff]  ;;  %v528_v23 = vld [vmem:[%s7279_s2 + $0xed8] sm:$0xff] }
  0x23   :  { %3494 = vmatprep.subr.bf16.mxu1 %v3493_v47  ;;  %v464_v24 = vld [vmem:[%s7279_s2 + $0xcd8] sm:$0xff]  ;;  %v470_v25 = vld [vmem:[%s7279_s2 + $0xd08] sm:$0xff]  ;;  %v3431_v26 = vpack.c.bf16 %v515_v16, %v509_v15  ;;  %v521_v27 = vld [vmem:[%s7279_s2 + $0xea0] sm:$0xff]  ;;  %v3433_v30 = vpack.c.bf16 %v528_v23, %v522_v19  ;;  %v4375_v15 = vmov 0.0  }
  0x24   :  { %v527_v28 = vld [vmem:[%s7279_s2 + $0xed0] sm:$0xff]  ;;  %v534_v31 = vld [vmem:[%s7279_s2 + $0xf08] sm:$0xff]  ;;  %v3509_v32 = vpack.c.bf16 %v470_v25, %v464_v24  ;;  %v469_v34 = vld [vmem:[%s7279_s2 + $0xd00] sm:$0xff] }
  0x25   :  { %3408 = vmatpush1.bf16.msra.mxu0 %v3407_v17  ;;  %v3503_v17 = vpack.c.bf16 %v445_v10, %v439_v9  ;;  %v540_v35 = vld [vmem:[%s7279_s2 + $0xf38] sm:$0xff]  ;;  %v482_v37 = vld [vmem:[%s7279_s2 + $0xd68] sm:$0xff]  ;;  %v3435_v38 = vpack.c.bf16 %v527_v28, %v521_v27  ;;  %v539_v42 = vld [vmem:[%s7279_s2 + $0xf30] sm:$0xff] }
  0x26   :  { %3410 = vmatprep.subr.bf16.mxu0 %v3409_v21  ;;  %3496 = vmatpush1.bf16.msra.mxu1 %v3495_v56  ;;  %v451_v21 = vld [vmem:[%s7279_s2 + $0xc70] sm:$0xff]  ;;  %v476_v36 = vld [vmem:[%s7279_s2 + $0xd38] sm:$0xff]  ;;  %v3437_v40 = vpack.c.bf16 %v540_v35, %v534_v31  ;;  %v546_v43 = vld [vmem:[%s7279_s2 + $0xf68] sm:$0xff] }
  0x27   :  { %3498 = vmatprep.subr.bf16.mxu1 %v3497_v60  ;;  %v3513_v44 = vpack.c.bf16 %v482_v37, %v476_v36  ;;  %v475_v46 = vld [vmem:[%s7279_s2 + $0xd30] sm:$0xff]  ;;  %v481_v47 = vld [vmem:[%s7279_s2 + $0xd60] sm:$0xff]  ;;  %v488_v48 = vld [vmem:[%s7279_s2 + $0xd98] sm:$0xff] }
  0x28   :  { %v494_v49 = vld [vmem:[%s7279_s2 + $0xdc8] sm:$0xff]  ;;  %v4815_v50 = vld [vmem:[%s7280_s1] sm:$0xff]  ;;  %v551_v54 = vld [vmem:[%s7279_s2 + $0xf90] sm:$0xff] }
  0x29   :  { %3412 = vmatpush1.bf16.msra.mxu0 %v3411_v29  ;;  %v3507_v29 = vpack.c.bf16 %v457_v22, %v451_v21  ;;  %v545_v52 = vld [vmem:[%s7279_s2 + $0xf60] sm:$0xff]  ;;  %v558_v55 = vld [vmem:[%s7279_s2 + $0xfc8] sm:$0xff]  ;;  %v564_v59 = vld [vmem:[%s7279_s2 + $0xff8] sm:$0xff]  ;;  %v3517_v60 = vpack.c.bf16 %v494_v49, %v488_v48 }
  0x2a   :  { %3414 = vmatprep.subr.bf16.mxu0 %v3413_v33  ;;  %3500 = vmatpush1.bf16.msra.mxu1 %v3499_v5  ;;  %v463_v33 = vld [vmem:[%s7279_s2 + $0xcd0] sm:$0xff]  ;;  %v4829_v56 = vld [vmem:[%s7280_s1 + $0x20] sm:$0x3f]  ;;  %v500_v63 = vld [vmem:[%s7279_s2 + $0xdf8] sm:$0xff]  ;;  %v3443_v1 = vpack.c.bf16 %v551_v54, %v545_v52  ;;  %v3445_v3 = vpack.c.bf16 %v564_v59, %v558_v55 }
  0x2b   :  { %3502 = vmatprep.subr.bf16.mxu1 %v3501_v8  ;;  %v3511_v39 = vpack.c.bf16 %v469_v34, %v463_v33  ;;  %v487_v61 = vld [vmem:[%s7279_s2 + $0xd90] sm:$0xff]  ;;  %v493_v62 = vld [vmem:[%s7279_s2 + $0xdc0] sm:$0xff]  ;;  %v506_v0 = vld [vmem:[%s7279_s2 + $0xe28] sm:$0xff] }
  0x2c   :  { %v557_v4 = vld [vmem:[%s7279_s2 + $0xfc0] sm:$0xff]  ;;  %v563_v5 = vld [vmem:[%s7279_s2 + $0xff0] sm:$0xff]  ;;  %v3519_v7 = vpack.c.bf16 %v493_v62, %v487_v61  ;;  %v576_v8 = vld [vmem:[%s7279_s2 + $0x1058] sm:$0xff]  ;;  %v3521_v9 = vpack.c.bf16 %v506_v0, %v500_v63 }
  0x2d   :  { %3416 = vmatpush1.bf16.msra.mxu0 %v3415_v41  ;;  %v533_v41 = vld [vmem:[%s7279_s2 + $0xf00] sm:$0xff]  ;;  %v499_v10 = vld [vmem:[%s7279_s2 + $0xdf0] sm:$0xff]  ;;  %v512_v12 = vld [vmem:[%s7279_s2 + $0xe58] sm:$0xff] }
  0x2e   :  { %3418 = vmatprep.subr.bf16.mxu0 %v3417_v45  ;;  %3504 = vmatpush1.bf16.msra.mxu1 %v3503_v17  ;;  %v552_v45 = vld [vmem:[%s7279_s2 + $0xf98] sm:$0xff]  ;;  %v3439_v51 = vpack.c.bf16 %v539_v42, %v533_v41  ;;  %v505_v11 = vld [vmem:[%s7279_s2 + $0xe20] sm:$0xff]  ;;  %v518_v13 = vld [vmem:[%s7279_s2 + $0xe88] sm:$0xff] }
  0x2f   :  { %3506 = vmatprep.subr.bf16.mxu1 %v3505_v20  ;;  %v569_v17 = vld [vmem:[%s7279_s2 + $0x1020] sm:$0xff]  ;;  %v582_v19 = vld [vmem:[%s7279_s2 + $0x1088] sm:$0xff]  ;;  %v3523_v20 = vpack.c.bf16 %v505_v11, %v499_v10  ;;  %v588_v21 = vld [vmem:[%s7279_s2 + $0x10b8] sm:$0xff]  ;;  %v3525_v22 = vpack.c.bf16 %v518_v13, %v512_v12 }
  0x30   :  { %v511_v23 = vld [vmem:[%s7279_s2 + $0xe50] sm:$0xff]  ;;  %v517_v24 = vld [vmem:[%s7279_s2 + $0xe80] sm:$0xff]  ;;  %v524_v25 = vld [vmem:[%s7279_s2 + $0xeb8] sm:$0xff]  ;;  %v3453_v28 = vpack.c.bf16 %v588_v21, %v582_v19 }
  0x31   :  { %3420 = vmatpush1.bf16.msra.mxu0 %v3419_v53  ;;  %v3441_v53 = vpack.c.bf16 %v552_v45, %v546_v43  ;;  %v594_v31 = vld [vmem:[%s7279_s2 + $0x10e8] sm:$0xff]  ;;  %v600_v33 = vld [vmem:[%s7279_s2 + $0x1118] sm:$0xff]  ;;  %v523_v35 = vld [vmem:[%s7279_s2 + $0xeb0] sm:$0xff] }
  0x32   :  { %3422 = vmatprep.subr.bf16.mxu0 %v3421_v58  ;;  %3508 = vmatpush1.bf16.msra.mxu1 %v3507_v29  ;;  %v3515_v58 = vpack.c.bf16 %v481_v47, %v475_v46  ;;  %v581_v29 = vld [vmem:[%s7279_s2 + $0x1080] sm:$0xff]  ;;  %v536_v37 = vld [vmem:[%s7279_s2 + $0xf18] sm:$0xff]  ;;  %v599_v42 = vld [vmem:[%s7279_s2 + $0x1110] sm:$0xff] }
  0x33   :  { %3510 = vmatprep.subr.bf16.mxu1 %v3509_v32  ;;  %v3527_v32 = vpack.c.bf16 %v517_v24, %v511_v23  ;;  %v529_v36 = vld [vmem:[%s7279_s2 + $0xee0] sm:$0xff]  ;;  %v606_v43 = vld [vmem:[%s7279_s2 + $0x1148] sm:$0xff]  ;;  %v612_v45 = vld [vmem:[%s7279_s2 + $0x1178] sm:$0xff] }
  0x34   :  { %v593_v41 = vld [vmem:[%s7279_s2 + $0x10e0] sm:$0xff]  ;;  %v535_v47 = vld [vmem:[%s7279_s2 + $0xf10] sm:$0xff]  ;;  %v548_v49 = vld [vmem:[%s7279_s2 + $0xf78] sm:$0xff] }
  0x35   :  { %3424 = vmatpush1.bf16.msra.mxu0 %v3423_v2  ;;  %v4851_v2 = vld [vmem:[%s7280_s1 + $0x18] sm:$0x3f]  ;;  %v541_v48 = vld [vmem:[%s7279_s2 + $0xf40] sm:$0xff]  ;;  %v3459_v52 = vpack.c.bf16 %v599_v42, %v593_v41  ;;  %v611_v55 = vld [vmem:[%s7279_s2 + $0x1170] sm:$0xff] }
  0x36   :  { %3426 = vmatprep.subr.bf16.mxu0 %v3425_v6  ;;  %3512 = vmatpush1.bf16.msra.mxu1 %v3511_v39  ;;  %v570_v6 = vld [vmem:[%s7279_s2 + $0x1028] sm:$0xff]  ;;  %v605_v54 = vld [vmem:[%s7279_s2 + $0x1140] sm:$0xff]  ;;  %v3535_v59 = vpack.c.bf16 %v541_v48, %v535_v47  ;;  %v547_v62 = vld [vmem:[%s7279_s2 + $0xf70] sm:$0xff] }
  0x37   :  { %3514 = vmatprep.subr.bf16.mxu1 %v3513_v44  ;;  %v3449_v16 = vpack.c.bf16 %v576_v8, %v570_v6  ;;  %v3531_v44 = vpack.c.bf16 %v529_v36, %v523_v35  ;;  %v553_v63 = vld [vmem:[%s7279_s2 + $0xfa0] sm:$0xff]  ;;  %v560_v0 = vld [vmem:[%s7279_s2 + $0xfd8] sm:$0xff]  ;;  %v623_v6 = vld [vmem:[%s7279_s2 + $0x11d0] sm:$0xff] }
  0x38   :  { %v3539_v8 = vpack.c.bf16 %v553_v63, %v547_v62  ;;  %v559_v11 = vld [vmem:[%s7279_s2 + $0xfd0] sm:$0xff]  ;;  %v565_v12 = vld [vmem:[%s7279_s2 + $0x1000] sm:$0xff]  ;;  %v572_v13 = vld [vmem:[%s7279_s2 + $0x1038] sm:$0xff] }
  0x39   :  { %3428 = vmatpush1.bf16.msra.mxu0 %v3427_v14  ;;  %v3447_v14 = vpack.c.bf16 %v563_v5, %v557_v4  ;;  %v617_v5 = vld [vmem:[%s7279_s2 + $0x11a0] sm:$0xff]  ;;  %v351_v19 = vld [vmem:[%s7279_s2 + $0x950] sm:$0xff]  ;;  %v3543_v21 = vpack.c.bf16 %v565_v12, %v559_v11  ;;  %v376_v35 = vld [vmem:[%s7279_s2 + $0xa18] sm:$0xff] }
  0x3a   :  { %3430 = vmatprep.subr.bf16.mxu0 %v3429_v18  ;;  %3516 = vmatpush1.bf16.msra.mxu1 %v3515_v58  ;;  %v575_v18 = vld [vmem:[%s7279_s2 + $0x1050] sm:$0xff]  ;;  %v618_v58 = vld [vmem:[%s7279_s2 + $0x11a8] sm:$0xff]  ;;  %v388_v48 = vld [vmem:[%s7279_s2 + $0xa78] sm:$0xff] }
  0x3b   :  { %3518 = vmatprep.subr.bf16.mxu1 %v3517_v60  ;;  %v3451_v27 = vpack.c.bf16 %v575_v18, %v569_v17  ;;  %v624_v60 = vld [vmem:[%s7279_s2 + $0x11d8] sm:$0xff]  ;;  %v345_v18 = vld [vmem:[%s7279_s2 + $0x920] sm:$0xff]  ;;  %v571_v24 = vld [vmem:[%s7279_s2 + $0x1030] sm:$0xff] }
  0x3c   :  { %v3465_v4 = vpack.c.bf16 %v624_v60, %v618_v58  ;;  %v5061_v42 = vld [vmem:[%s7280_s1 + $0x28] sm:$0x3f]  ;;  %v387_v60 = vld [vmem:[%s7279_s2 + $0xa70] sm:$0xff]  ;;  %v412_v11 = vld [vmem:[%s7279_s2 + $0xb38] sm:$0xff] }
  0x3d   :  { %3432 = vmatpush1.bf16.msra.mxu0 %v3431_v26  ;;  %v530_v26 = vld [vmem:[%s7279_s2 + $0xee8] sm:$0xff] }
  0x3e   :  { %3434 = vmatprep.subr.bf16.mxu0 %v3433_v30  ;;  %3520 = vmatpush1.bf16.msra.mxu1 %v3519_v7  ;;  %v587_v30 = vld [vmem:[%s7279_s2 + $0x10b0] sm:$0xff]  ;;  %v3529_v34 = vpack.c.bf16 %v530_v26, %v524_v25  ;;  %v346_v7 = vld [vmem:[%s7279_s2 + $0x928] sm:$0xff]  ;;  %v577_v25 = vld [vmem:[%s7279_s2 + $0x1060] sm:$0xff] }
  0x3f   :  { %3522 = vmatprep.subr.bf16.mxu1 %v3521_v9  ;;  %v3455_v39 = vpack.c.bf16 %v587_v30, %v581_v29  ;;  %v352_v9 = vld [vmem:[%s7279_s2 + $0x958] sm:$0xff]  ;;  %v3567_v29 = vpack.c.bf16 %v351_v19, %v345_v18 }
  0x40   :  { %v3565_v17 = vpack.c.bf16 %v352_v9, %v346_v7  ;;  %v584_v26 = vld [vmem:[%s7279_s2 + $0x1098] sm:$0xff]  ;;  %v393_v7 = vld [vmem:[%s7279_s2 + $0xaa0] sm:$0xff]  ;;  %v406_v9 = vld [vmem:[%s7279_s2 + $0xb08] sm:$0xff] }
  0x41   :  { %3436 = vmatpush1.bf16.msra.mxu0 %v3435_v38  ;;  %v542_v38 = vld [vmem:[%s7279_s2 + $0xf48] sm:$0xff]  ;;  %v3585_v19 = vpack.c.bf16 %v412_v11, %v406_v9  ;;  %v459_v11 = vld [vmem:[%s7279_s2 + $0xcb0] sm:$0xff] }
  0x42   :  { %3438 = vmatprep.subr.bf16.mxu0 %v3437_v40  ;;  %3524 = vmatpush1.bf16.msra.mxu1 %v3523_v20  ;;  %v3457_v40 = vpack.c.bf16 %v600_v33, %v594_v31  ;;  %v3533_v46 = vpack.c.bf16 %v542_v38, %v536_v37  ;;  %v358_v20 = vld [vmem:[%s7279_s2 + $0x988] sm:$0xff]  ;;  %v357_v31 = vld [vmem:[%s7279_s2 + $0x980] sm:$0xff]  ;;  %v583_v37 = vld [vmem:[%s7279_s2 + $0x1090] sm:$0xff] }
  0x43   :  { %3526 = vmatprep.subr.bf16.mxu1 %v3525_v22  ;;  %v364_v22 = vld [vmem:[%s7279_s2 + $0x9b8] sm:$0xff]  ;;  %v370_v33 = vld [vmem:[%s7279_s2 + $0x9e8] sm:$0xff]  ;;  %v589_v38 = vld [vmem:[%s7279_s2 + $0x10c0] sm:$0xff] }
  0x44   :  { %694 = vmatmul.mubr.f32.vlgmr.msra.gmra.mrb[0].mxu0 %v4815_v50  ;;  %v3569_v30 = vpack.c.bf16 %v364_v22, %v358_v20  ;;  %v3551_v47 = vpack.c.bf16 %v589_v38, %v583_v37  ;;  %v405_v20 = vld [vmem:[%s7279_s2 + $0xb00] sm:$0xff]  ;;  %v418_v22 = vld [vmem:[%s7279_s2 + $0xb68] sm:$0xff]  ;;  %v436_v37 = vld [vmem:[%s7279_s2 + $0xbf8] sm:$0xff] }
  0x45   :  { %3440 = vmatpush1.bf16.msra.mxu0 %v3439_v51  ;;  %699 = vmatprep.mubr.f32.mxu0 %v4829_v56  ;;  %v554_v51 = vld [vmem:[%s7279_s2 + $0xfa8] sm:$0xff] }
  0x46   :  { %3442 = vmatprep.subr.bf16.mxu0 %v3441_v53  ;;  %3528 = vmatpush1.bf16.msra.mxu1 %v3527_v32  ;;  %v3461_v53 = vpack.c.bf16 %v612_v45, %v606_v43  ;;  %v3537_v61 = vpack.c.bf16 %v554_v51, %v548_v49  ;;  %v363_v32 = vld [vmem:[%s7279_s2 + $0x9b0] sm:$0xff]  ;;  %v3573_v43 = vpack.c.bf16 %v376_v35, %v370_v33  ;;  %v417_v33 = vld [vmem:[%s7279_s2 + $0xb60] sm:$0xff]  ;;  %v430_v35 = vld [vmem:[%s7279_s2 + $0xbc8] sm:$0xff] }
  0x47   :  { %3530 = vmatprep.subr.bf16.mxu1 %v3529_v34  ;;  %v3547_v34 = vpack.c.bf16 %v577_v25, %v571_v24  ;;  %v3571_v41 = vpack.c.bf16 %v363_v32, %v357_v31  ;;  %v375_v45 = vld [vmem:[%s7279_s2 + $0xa10] sm:$0xff]  ;;  %v424_v24 = vld [vmem:[%s7279_s2 + $0xb98] sm:$0xff] }
  0x48   :  { %700 = vmatmul.mubr.f32.gmra.mrb[2].mxu0 %v4851_v2  ;;  %v595_v51 = vld [vmem:[%s7279_s2 + $0x10f0] sm:$0xff]  ;;  %v3589_v32 = vpack.c.bf16 %v424_v24, %v418_v22 }
  0x49   :  { %3444 = vmatpush1.bf16.msra.mxu0 %v3443_v1  ;;  %770 = vmatprep.mubr.f32.mxu0 %v4375_v15  ;;  %v566_v1 = vld [vmem:[%s7279_s2 + $0x1008] sm:$0xff]  ;;  %v471_v24 = vld [vmem:[%s7279_s2 + $0xd10] sm:$0xff] }
  0x4a   :  { %3446 = vmatprep.subr.bf16.mxu0 %v3445_v3  ;;  %3532 = vmatpush1.bf16.msra.mxu1 %v3531_v44  ;;  %v3463_v3 = vpack.c.bf16 %v611_v55, %v605_v54  ;;  %v3541_v10 = vpack.c.bf16 %v566_v1, %v560_v0  ;;  %v369_v44 = vld [vmem:[%s7279_s2 + $0x9e0] sm:$0xff]  ;;  %v614_v54 = vld [vmem:[%s7279_s2 + $0x1188] sm:$0xff]  ;;  %v607_v0 = vld [vmem:[%s7279_s2 + $0x1150] sm:$0xff] }
  0x4b   :  { %3534 = vmatprep.subr.bf16.mxu1 %v3533_v46  ;;  %v382_v46 = vld [vmem:[%s7279_s2 + $0xa48] sm:$0xff]  ;;  %v3575_v55 = vpack.c.bf16 %v375_v45, %v369_v44  ;;  %v613_v1 = vld [vmem:[%s7279_s2 + $0x1180] sm:$0xff]  ;;  %v3593_v45 = vpack.c.bf16 %v436_v37, %v430_v35  ;;  %v483_v37 = vld [vmem:[%s7279_s2 + $0xd70] sm:$0xff] }
  0x4c   :  { %v3577_v58 = vpack.c.bf16 %v388_v48, %v382_v46  ;;  %v429_v46 = vld [vmem:[%s7279_s2 + $0xbc0] sm:$0xff]  ;;  %v442_v48 = vld [vmem:[%s7279_s2 + $0xc28] sm:$0xff] }
  0x4d   :  { %3448 = vmatpush1.bf16.msra.mxu0 %v3447_v14  ;;  %848 = vmatmul.mubr.f32.vlgmr.msra.gmra.mrb[0].mxu1 %v4815_v50  ;;  %v578_v14 = vld [vmem:[%s7279_s2 + $0x1068] sm:$0xff] }
  0x4e   :  { %3450 = vmatprep.subr.bf16.mxu0 %v3449_v16  ;;  %3536 = vmatpush1.bf16.msra.mxu1 %v3535_v59  ;;  %v3467_v16 = vpack.c.bf16 %v623_v6, %v617_v5  ;;  %v3545_v23 = vpack.c.bf16 %v578_v14, %v572_v13  ;;  %v381_v59 = vld [vmem:[%s7279_s2 + $0xa40] sm:$0xff]  ;;  %v619_v13 = vld [vmem:[%s7279_s2 + $0x11b0] sm:$0xff] }
  0x4f   :  { %3538 = vmatprep.subr.bf16.mxu1 %v3537_v61  ;;  %853 = vmatprep.mubr.f32.mxu1 %v4829_v56  ;;  %v394_v61 = vld [vmem:[%s7279_s2 + $0xaa8] sm:$0xff]  ;;  %v3579_v5 = vpack.c.bf16 %v387_v60, %v381_v59  ;;  %v625_v14 = vld [vmem:[%s7279_s2 + $0x11e0] sm:$0xff] }
  0x51   :  { %3452 = vmatpush1.bf16.msra.mxu0 %v3451_v27  ;;  %854 = vmatmul.mubr.f32.gmra.mrb[2].mxu1 %v4851_v2  ;;  %v590_v27 = vld [vmem:[%s7279_s2 + $0x10c8] sm:$0xff] }
  0x52   :  { %3454 = vmatprep.subr.bf16.mxu0 %v3453_v28  ;;  %3540 = vmatpush1.bf16.msra.mxu1 %v3539_v8  ;;  %v5030_v28 = vld [vmem:[%s7280_s1 + $0x10] sm:$0xff]  ;;  %v3549_v36 = vpack.c.bf16 %v590_v27, %v584_v26  ;;  %v55_v27 = vld [vmem:[%s7279_s2 + $0x40] sm:$0xff] }
  0x53   :  { %3542 = vmatprep.subr.bf16.mxu1 %v3541_v10  ;;  %924 = vmatprep.mubr.f32.mxu1 %v4375_v15  ;;  %v399_v8 = vld [vmem:[%s7279_s2 + $0xad0] sm:$0xff]  ;;  %v3559_v10 = vpack.c.bf16 %v613_v1, %v607_v0  ;;  %v460_v0 = vld [vmem:[%s7279_s2 + $0xcb8] sm:$0xff] }
  0x54   :  { %v3583_v18 = vpack.c.bf16 %v399_v8, %v393_v7  ;;  %v49_v26 = vld [vmem:[%s7279_s2 + $0x10] sm:$0xff]  ;;  %v5239_v8 = vld [vmem:[%s7281_s0 + $0x8] sm:$0xff] }
  0x55   :  { %3456 = vmatpush1.bf16.msra.mxu0 %v3455_v39  ;;  %v596_v39 = vld [vmem:[%s7279_s2 + $0x10f8] sm:$0xff] }
  0x56   :  { %3458 = vmatprep.subr.bf16.mxu0 %v3457_v40  ;;  %3544 = vmatpush1.bf16.msra.mxu1 %v3543_v21  ;;  %v602_v40 = vld [vmem:[%s7279_s2 + $0x1128] sm:$0xff]  ;;  %v411_v21 = vld [vmem:[%s7279_s2 + $0xb30] sm:$0xff] }
  0x57   :  { %3546 = vmatprep.subr.bf16.mxu1 %v3545_v23  ;;  %v3553_v49 = vpack.c.bf16 %v602_v40, %v596_v39  ;;  %v3563_v23 = vpack.c.bf16 %v625_v14, %v619_v13  ;;  %v3587_v31 = vpack.c.bf16 %v411_v21, %v405_v20  ;;  %v61_v39 = vld [vmem:[%s7279_s2 + $0x70] sm:$0xff]  ;;  %v67_v40 = vld [vmem:[%s7279_s2 + $0xa0] sm:$0xff]  ;;  %v472_v14 = vld [vmem:[%s7279_s2 + $0xd18] sm:$0xff] }
  0x58   :  { %v116_v20 = vld [vmem:[%s7279_s2 + $0x228] sm:$0xff] }
  0x59   :  { %3460 = vmatpush1.bf16.msra.mxu0 %v3459_v52  ;;  %v601_v52 = vld [vmem:[%s7279_s2 + $0x1120] sm:$0xff] }
  0x5a   :  { %3462 = vmatprep.subr.bf16.mxu0 %v3461_v53  ;;  %3548 = vmatpush1.bf16.msra.mxu1 %v3547_v34  ;;  %v608_v53 = vld [vmem:[%s7279_s2 + $0x1158] sm:$0xff]  ;;  %v3555_v62 = vpack.c.bf16 %v601_v52, %v595_v51  ;;  %v423_v34 = vld [vmem:[%s7279_s2 + $0xb90] sm:$0xff] }
  0x5b   :  { %3550 = vmatprep.subr.bf16.mxu1 %v3549_v36  ;;  %v3557_v63 = vpack.c.bf16 %v614_v54, %v608_v53  ;;  %v3759_v36 = vpack.c.bf16 %v55_v27, %v49_v26  ;;  %v3591_v44 = vpack.c.bf16 %v423_v34, %v417_v33  ;;  %v448_v51 = vld [vmem:[%s7279_s2 + $0xc58] sm:$0xff]  ;;  %v73_v53 = vld [vmem:[%s7279_s2 + $0xd0] sm:$0xff]  ;;  %v79_v54 = vld [vmem:[%s7279_s2 + $0x100] sm:$0xff] }
  0x5c   :  { %v3597_v60 = vpack.c.bf16 %v448_v51, %v442_v48  ;;  %v484_v27 = vld [vmem:[%s7279_s2 + $0xd78] sm:$0xff]  ;;  %v128_v33 = vld [vmem:[%s7279_s2 + $0x288] sm:$0xff]  ;;  %v495_v51 = vld [vmem:[%s7279_s2 + $0xdd0] sm:$0xff] }
  0x5d   :  { %3464 = vmatpush1.bf16.msra.mxu0 %v3463_v3  ;;  %v620_v3 = vld [vmem:[%s7279_s2 + $0x11b8] sm:$0xff] }
  0x5e   :  { %3466 = vmatprep.subr.bf16.mxu0 %v3465_v4  ;;  %3552 = vmatpush1.bf16.msra.mxu1 %v3551_v47  ;;  %v626_v4 = vld [vmem:[%s7279_s2 + $0x11e8] sm:$0xff]  ;;  %v435_v47 = vld [vmem:[%s7279_s2 + $0xbf0] sm:$0xff] }
  0x5f   :  { %3554 = vmatprep.subr.bf16.mxu1 %v3553_v49  ;;  %v3561_v12 = vpack.c.bf16 %v626_v4, %v620_v3  ;;  %v3763_v49 = vpack.c.bf16 %v67_v40, %v61_v39  ;;  %v3595_v59 = vpack.c.bf16 %v435_v47, %v429_v46  ;;  %v85_v3 = vld [vmem:[%s7279_s2 + $0x130] sm:$0xff]  ;;  %v91_v4 = vld [vmem:[%s7279_s2 + $0x160] sm:$0xff]  ;;  %v496_v40 = vld [vmem:[%s7279_s2 + $0xdd8] sm:$0xff] }
  0x60   :  { %v3771_v13 = vpack.c.bf16 %v91_v4, %v85_v3  ;;  %v140_v46 = vld [vmem:[%s7279_s2 + $0x2e8] sm:$0xff]  ;;  %v520_v4 = vld [vmem:[%s7279_s2 + $0xe98] sm:$0xff] }
  0x61   :  { %3468 = vmatpush1.bf16.msra.mxu0 %v3467_v16  ;;  %v50_v16 = vld [vmem:[%s7279_s2 + $0x18] sm:$0xff] }
  0x62   :  { %3566 = vmatprep.subr.bf16.mxu0 %v3565_v17  ;;  %3556 = vmatpush1.bf16.msra.mxu1 %v3555_v62  ;;  %v56_v17 = vld [vmem:[%s7279_s2 + $0x48] sm:$0xff]  ;;  %v447_v62 = vld [vmem:[%s7279_s2 + $0xc50] sm:$0xff] }
  0x63   :  { %3558 = vmatprep.subr.bf16.mxu1 %v3557_v63  ;;  %v3757_v25 = vpack.c.bf16 %v56_v17, %v50_v16  ;;  %v3767_v63 = vpack.c.bf16 %v79_v54, %v73_v53  ;;  %v97_v17 = vld [vmem:[%s7279_s2 + $0x190] sm:$0xff]  ;;  %v508_v54 = vld [vmem:[%s7279_s2 + $0xe38] sm:$0xff] }
  0x64   :  { %771 = vmatmul.mubr.f32.vlgmr.msra.gmra.mrb[0].mxu0 %v5030_v28 }
  0x65   :  { %3568 = vmatpush1.bf16.msra.mxu0 %v3567_v29  ;;  %776 = vmatprep.mubr.f32.mxu0 %v4375_v15  ;;  %v62_v29 = vld [vmem:[%s7279_s2 + $0x78] sm:$0xff] }
  0x66   :  { %3570 = vmatprep.subr.bf16.mxu0 %v3569_v30  ;;  %3560 = vmatpush1.bf16.msra.mxu1 %v3559_v10  ;;  %v68_v30 = vld [vmem:[%s7279_s2 + $0xa8] sm:$0xff]  ;;  %v453_v10 = vld [vmem:[%s7279_s2 + $0xc80] sm:$0xff] }
  0x67   :  { %3562 = vmatprep.subr.bf16.mxu1 %v3561_v12  ;;  %v3761_v38 = vpack.c.bf16 %v68_v30, %v62_v29  ;;  %v466_v12 = vld [vmem:[%s7279_s2 + $0xce8] sm:$0xff]  ;;  %v3603_v21 = vpack.c.bf16 %v459_v11, %v453_v10  ;;  %v109_v30 = vld [vmem:[%s7279_s2 + $0x1f0] sm:$0xff] }
  0x68   :  { %777 = vmatmul.mubr.f32.gmra.mrb[2].mxu0 %v5061_v42  ;;  %v3605_v22 = vpack.c.bf16 %v472_v14, %v466_v12  ;;  %v164_v10 = vld [vmem:[%s7279_s2 + $0x3a8] sm:$0xff]  ;;  %v519_v14 = vld [vmem:[%s7279_s2 + $0xe90] sm:$0xff] }
  0x69   :  { %3572 = vmatpush1.bf16.msra.mxu0 %v3571_v41  ;;  %1001 = vmatprep.mubr.f32.mxu0 %v4565_v57  ;;  %v400_v57 = vld [vmem:[%s7279_s2 + $0xad8] sm:$0xff] }
  0x6a   :  { %3574 = vmatprep.subr.bf16.mxu0 %v3573_v43  ;;  %v3581_v6 = vpack.c.bf16 %v400_v57, %v394_v61  ;;  %3564 = vmatpush1.bf16.msra.mxu1 %v3563_v23  ;;  %v74_v41 = vld [vmem:[%s7279_s2 + $0xd8] sm:$0xff]  ;;  %v80_v43 = vld [vmem:[%s7279_s2 + $0x108] sm:$0xff]  ;;  %v441_v61 = vld [vmem:[%s7279_s2 + $0xc20] sm:$0xff] }
  0x6b   :  { %3758 = vmatprep.subr.bf16.mxu1 %v3757_v25  ;;  %v3765_v52 = vpack.c.bf16 %v80_v43, %v74_v41  ;;  %v454_v57 = vld [vmem:[%s7279_s2 + $0xc88] sm:$0xff]  ;;  %v3599_v7 = vpack.c.bf16 %v447_v62, %v441_v61  ;;  %v465_v23 = vld [vmem:[%s7279_s2 + $0xce0] sm:$0xff]  ;;  %v121_v43 = vld [vmem:[%s7279_s2 + $0x250] sm:$0xff] }
  0x6c   :  { %v3601_v9 = vpack.c.bf16 %v460_v0, %v454_v57  ;;  %v478_v25 = vld [vmem:[%s7279_s2 + $0xd48] sm:$0xff]  ;;  %v3607_v34 = vpack.c.bf16 %v471_v24, %v465_v23  ;;  %v507_v0 = vld [vmem:[%s7279_s2 + $0xe30] sm:$0xff] }
  0x6d   :  { %3576 = vmatpush1.bf16.msra.mxu0 %v3575_v55  ;;  %925 = vmatmul.mubr.f32.vlgmr.msra.gmra.mrb[0].mxu1 %v5030_v28  ;;  %v86_v55 = vld [vmem:[%s7279_s2 + $0x138] sm:$0xff]  ;;  %v3609_v35 = vpack.c.bf16 %v484_v27, %v478_v25  ;;  %v152_v61 = vld [vmem:[%s7279_s2 + $0x348] sm:$0xff]  ;;  %v531_v27 = vld [vmem:[%s7279_s2 + $0xef0] sm:$0xff] }
  0x6e   :  { %3578 = vmatprep.subr.bf16.mxu0 %v3577_v58  ;;  %3760 = vmatpush1.bf16.msra.mxu1 %v3759_v36  ;;  %v92_v58 = vld [vmem:[%s7279_s2 + $0x168] sm:$0xff]  ;;  %v477_v36 = vld [vmem:[%s7279_s2 + $0xd40] sm:$0xff] }
  0x6f   :  { %3762 = vmatprep.subr.bf16.mxu1 %v3761_v38  ;;  %930 = vmatprep.mubr.f32.mxu1 %v4375_v15  ;;  %v3769_v1 = vpack.c.bf16 %v92_v58, %v86_v55  ;;  %v490_v38 = vld [vmem:[%s7279_s2 + $0xda8] sm:$0xff]  ;;  %v3611_v47 = vpack.c.bf16 %v483_v37, %v477_v36  ;;  %v133_v58 = vld [vmem:[%s7279_s2 + $0x2b0] sm:$0xff] }
  0x70   :  { %v3613_v48 = vpack.c.bf16 %v496_v40, %v490_v38  ;;  %v176_v23 = vld [vmem:[%s7279_s2 + $0x408] sm:$0xff]  ;;  %v543_v40 = vld [vmem:[%s7279_s2 + $0xf50] sm:$0xff] }
  0x71   :  { %3580 = vmatpush1.bf16.msra.mxu0 %v3579_v5  ;;  %931 = vmatmul.mubr.f32.gmra.mrb[2].mxu1 %v5061_v42  ;;  %v98_v5 = vld [vmem:[%s7279_s2 + $0x198] sm:$0xff]  ;;  %v188_v36 = vld [vmem:[%s7279_s2 + $0x468] sm:$0xff] }
  0x72   :  { %3582 = vmatprep.subr.bf16.mxu0 %v3581_v6  ;;  %3764 = vmatpush1.bf16.msra.mxu1 %v3763_v49  ;;  %v104_v6 = vld [vmem:[%s7279_s2 + $0x1c8] sm:$0xff]  ;;  %v489_v49 = vld [vmem:[%s7279_s2 + $0xda0] sm:$0xff] }
  0x73   :  { %3766 = vmatprep.subr.bf16.mxu1 %v3765_v52  ;;  %v3773_v16 = vpack.c.bf16 %v104_v6, %v98_v5  ;;  %1309 = vmatprep.mubr.f32.mxu1 %v5239_v8  ;;  %v502_v52 = vld [vmem:[%s7279_s2 + $0xe08] sm:$0xff]  ;;  %v3615_v62 = vpack.c.bf16 %v495_v51, %v489_v49  ;;  %v145_v6 = vld [vmem:[%s7279_s2 + $0x310] sm:$0xff] }
  0x74   :  { %v3617_v57 = vpack.c.bf16 %v508_v54, %v502_v52  ;;  %v200_v49 = vld [vmem:[%s7279_s2 + $0x4c8] sm:$0xff]  ;;  %v555_v54 = vld [vmem:[%s7279_s2 + $0xfb0] sm:$0xff] }
  0x75   :  { %3584 = vmatpush1.bf16.msra.mxu0 %v3583_v18  ;;  %v103_v18 = vld [vmem:[%s7279_s2 + $0x1c0] sm:$0xff] }
  0x76   :  { %3586 = vmatprep.subr.bf16.mxu0 %v3585_v19  ;;  %3768 = vmatpush1.bf16.msra.mxu1 %v3767_v63  ;;  %v110_v19 = vld [vmem:[%s7279_s2 + $0x1f8] sm:$0xff]  ;;  %v3775_v26 = vpack.c.bf16 %v103_v18, %v97_v17  ;;  %v501_v63 = vld [vmem:[%s7279_s2 + $0xe00] sm:$0xff] }
  0x77   :  { %3770 = vmatprep.subr.bf16.mxu1 %v3769_v1  ;;  %v3777_v29 = vpack.c.bf16 %v116_v20, %v110_v19  ;;  %v514_v1 = vld [vmem:[%s7279_s2 + $0xe68] sm:$0xff]  ;;  %v3619_v11 = vpack.c.bf16 %v507_v0, %v501_v63  ;;  %v532_v18 = vld [vmem:[%s7279_s2 + $0xef8] sm:$0xff]  ;;  %v157_v20 = vld [vmem:[%s7279_s2 + $0x370] sm:$0xff] }
  0x78   :  { %v3621_v12 = vpack.c.bf16 %v520_v4, %v514_v1  ;;  %v212_v63 = vld [vmem:[%s7279_s2 + $0x528] sm:$0xff] }
  0x79   :  { %3588 = vmatpush1.bf16.msra.mxu0 %v3587_v31  ;;  %v115_v31 = vld [vmem:[%s7279_s2 + $0x220] sm:$0xff]  ;;  %v574_v4 = vld [vmem:[%s7279_s2 + $0x1048] sm:$0xff] }
  0x7a   :  { %3590 = vmatprep.subr.bf16.mxu0 %v3589_v32  ;;  %3772 = vmatpush1.bf16.msra.mxu1 %v3771_v13  ;;  %v122_v32 = vld [vmem:[%s7279_s2 + $0x258] sm:$0xff]  ;;  %v3779_v39 = vpack.c.bf16 %v115_v31, %v109_v30  ;;  %v513_v13 = vld [vmem:[%s7279_s2 + $0xe60] sm:$0xff] }
  0x7b   :  { %3774 = vmatprep.subr.bf16.mxu1 %v3773_v16  ;;  %v3781_v41 = vpack.c.bf16 %v128_v33, %v122_v32  ;;  %v526_v16 = vld [vmem:[%s7279_s2 + $0xec8] sm:$0xff]  ;;  %v3623_v24 = vpack.c.bf16 %v519_v14, %v513_v13  ;;  %v544_v31 = vld [vmem:[%s7279_s2 + $0xf58] sm:$0xff]  ;;  %v169_v33 = vld [vmem:[%s7279_s2 + $0x3d0] sm:$0xff] }
  0x7c   :  { %v3625_v25 = vpack.c.bf16 %v532_v18, %v526_v16  ;;  %v573_v14 = vld [vmem:[%s7279_s2 + $0x1040] sm:$0xff]  ;;  %v586_v16 = vld [vmem:[%s7279_s2 + $0x10a8] sm:$0xff]  ;;  %v592_v18 = vld [vmem:[%s7279_s2 + $0x10d8] sm:$0xff] }
  0x7d   :  { %3592 = vmatpush1.bf16.msra.mxu0 %v3591_v44  ;;  %v127_v44 = vld [vmem:[%s7279_s2 + $0x280] sm:$0xff] }
  0x7e   :  { %3594 = vmatprep.subr.bf16.mxu0 %v3593_v45  ;;  %3776 = vmatpush1.bf16.msra.mxu1 %v3775_v26  ;;  %v134_v45 = vld [vmem:[%s7279_s2 + $0x2b8] sm:$0xff]  ;;  %v3783_v53 = vpack.c.bf16 %v127_v44, %v121_v43  ;;  %v525_v26 = vld [vmem:[%s7279_s2 + $0xec0] sm:$0xff] }
  0x7f   :  { %3778 = vmatprep.subr.bf16.mxu1 %v3777_v29  ;;  %v3785_v55 = vpack.c.bf16 %v140_v46, %v134_v45  ;;  %v538_v29 = vld [vmem:[%s7279_s2 + $0xf28] sm:$0xff]  ;;  %v3627_v37 = vpack.c.bf16 %v531_v27, %v525_v26  ;;  %v556_v44 = vld [vmem:[%s7279_s2 + $0xfb8] sm:$0xff]  ;;  %v181_v46 = vld [vmem:[%s7279_s2 + $0x430] sm:$0xff] }
  0x80   :  { %v3629_v38 = vpack.c.bf16 %v544_v31, %v538_v29  ;;  %v585_v26 = vld [vmem:[%s7279_s2 + $0x10a0] sm:$0xff]  ;;  %v591_v27 = vld [vmem:[%s7279_s2 + $0x10d0] sm:$0xff]  ;;  %v598_v29 = vld [vmem:[%s7279_s2 + $0x1108] sm:$0xff] }
  0x81   :  { %3596 = vmatpush1.bf16.msra.mxu0 %v3595_v59  ;;  %v139_v59 = vld [vmem:[%s7279_s2 + $0x2e0] sm:$0xff]  ;;  %v604_v31 = vld [vmem:[%s7279_s2 + $0x1138] sm:$0xff] }
  0x82   :  { %3598 = vmatprep.subr.bf16.mxu0 %v3597_v60  ;;  %3780 = vmatpush1.bf16.msra.mxu1 %v3779_v39  ;;  %v146_v60 = vld [vmem:[%s7279_s2 + $0x318] sm:$0xff]  ;;  %v3787_v3 = vpack.c.bf16 %v139_v59, %v133_v58  ;;  %v537_v39 = vld [vmem:[%s7279_s2 + $0xf20] sm:$0xff] }
  0x83   :  { %3782 = vmatprep.subr.bf16.mxu1 %v3781_v41  ;;  %v3789_v5 = vpack.c.bf16 %v152_v61, %v146_v60  ;;  %v550_v41 = vld [vmem:[%s7279_s2 + $0xf88] sm:$0xff]  ;;  %v3631_v51 = vpack.c.bf16 %v543_v40, %v537_v39  ;;  %v568_v59 = vld [vmem:[%s7279_s2 + $0x1018] sm:$0xff]  ;;  %v193_v61 = vld [vmem:[%s7279_s2 + $0x490] sm:$0xff] }
  0x84   :  { %v3633_v52 = vpack.c.bf16 %v556_v44, %v550_v41  ;;  %v597_v39 = vld [vmem:[%s7279_s2 + $0x1100] sm:$0xff]  ;;  %v603_v40 = vld [vmem:[%s7279_s2 + $0x1130] sm:$0xff]  ;;  %v610_v41 = vld [vmem:[%s7279_s2 + $0x1168] sm:$0xff] }
  0x85   :  { %3600 = vmatpush1.bf16.msra.mxu0 %v3599_v7  ;;  %v151_v7 = vld [vmem:[%s7279_s2 + $0x340] sm:$0xff]  ;;  %v616_v44 = vld [vmem:[%s7279_s2 + $0x1198] sm:$0xff] }
  0x86   :  { %3602 = vmatprep.subr.bf16.mxu0 %v3601_v9  ;;  %3784 = vmatpush1.bf16.msra.mxu1 %v3783_v53  ;;  %v158_v9 = vld [vmem:[%s7279_s2 + $0x378] sm:$0xff]  ;;  %v3791_v17 = vpack.c.bf16 %v151_v7, %v145_v6  ;;  %v549_v53 = vld [vmem:[%s7279_s2 + $0xf80] sm:$0xff]  ;;  %v205_v7 = vld [vmem:[%s7279_s2 + $0x4f0] sm:$0xff] }
  0x87   :  { %3786 = vmatprep.subr.bf16.mxu1 %v3785_v55  ;;  %v3793_v19 = vpack.c.bf16 %v164_v10, %v158_v9  ;;  %v562_v55 = vld [vmem:[%s7279_s2 + $0xfe8] sm:$0xff]  ;;  %v3635_v0 = vpack.c.bf16 %v555_v54, %v549_v53  ;;  %v211_v9 = vld [vmem:[%s7279_s2 + $0x520] sm:$0xff]  ;;  %v218_v10 = vld [vmem:[%s7279_s2 + $0x558] sm:$0xff]  ;;  %v3653_v53 = vpack.c.bf16 %v616_v44, %v610_v41 }
  0x88   :  { %v3637_v1 = vpack.c.bf16 %v568_v59, %v562_v55  ;;  %v615_v54 = vld [vmem:[%s7279_s2 + $0x1190] sm:$0xff]  ;;  %v622_v55 = vld [vmem:[%s7279_s2 + $0x11c8] sm:$0xff] }
  0x89   :  { %3604 = vmatpush1.bf16.msra.mxu0 %v3603_v21  ;;  %v163_v21 = vld [vmem:[%s7279_s2 + $0x3a0] sm:$0xff]  ;;  %v84_v44 = vld [vmem:[%s7279_s2 + $0x128] sm:$0xff] }
  0x8a   :  { %3606 = vmatprep.subr.bf16.mxu0 %v3605_v22  ;;  %3788 = vmatpush1.bf16.msra.mxu1 %v3787_v3  ;;  %v170_v22 = vld [vmem:[%s7279_s2 + $0x3d8] sm:$0xff]  ;;  %v3795_v30 = vpack.c.bf16 %v163_v21, %v157_v20  ;;  %v561_v3 = vld [vmem:[%s7279_s2 + $0xfe0] sm:$0xff]  ;;  %v217_v20 = vld [vmem:[%s7279_s2 + $0x550] sm:$0xff] }
  0x8b   :  { %3790 = vmatprep.subr.bf16.mxu1 %v3789_v5  ;;  %v3797_v32 = vpack.c.bf16 %v176_v23, %v170_v22  ;;  %v223_v21 = vld [vmem:[%s7279_s2 + $0x580] sm:$0xff]  ;;  %v230_v22 = vld [vmem:[%s7279_s2 + $0x5b8] sm:$0xff]  ;;  %v236_v23 = vld [vmem:[%s7279_s2 + $0x5e8] sm:$0xff] }
  0x8d   :  { %3608 = vmatpush1.bf16.msra.mxu0 %v3607_v34  ;;  %v175_v34 = vld [vmem:[%s7279_s2 + $0x400] sm:$0xff] }
  0x8e   :  { %3610 = vmatprep.subr.bf16.mxu0 %v3609_v35  ;;  %3792 = vmatpush1.bf16.msra.mxu1 %v3791_v17  ;;  %v182_v35 = vld [vmem:[%s7279_s2 + $0x438] sm:$0xff]  ;;  %v3799_v43 = vpack.c.bf16 %v175_v34, %v169_v33  ;;  %v3811_v17 = vpack.c.bf16 %v211_v9, %v205_v7  ;;  %v229_v33 = vld [vmem:[%s7279_s2 + $0x5b0] sm:$0xff]  ;;  %v235_v34 = vld [vmem:[%s7279_s2 + $0x5e0] sm:$0xff] }
  0x8f   :  { %3794 = vmatprep.subr.bf16.mxu1 %v3793_v19  ;;  %v3801_v45 = vpack.c.bf16 %v188_v36, %v182_v35  ;;  %v242_v35 = vld [vmem:[%s7279_s2 + $0x618] sm:$0xff]  ;;  %v248_v36 = vld [vmem:[%s7279_s2 + $0x648] sm:$0xff] }
  0x90   :  { %v5605_v7 = vld [vmem:[%s7281_s0 + $0x18] sm:$0x3f] }
  0x91   :  { %3612 = vmatpush1.bf16.msra.mxu0 %v3611_v47  ;;  %v187_v47 = vld [vmem:[%s7279_s2 + $0x460] sm:$0xff]  ;;  %v54_v9 = vld [vmem:[%s7279_s2 + $0x38] sm:$0xff] }
  0x92   :  { %3614 = vmatprep.subr.bf16.mxu0 %v3613_v48  ;;  %3796 = vmatpush1.bf16.msra.mxu1 %v3795_v30  ;;  %v194_v48 = vld [vmem:[%s7279_s2 + $0x498] sm:$0xff]  ;;  %v3803_v58 = vpack.c.bf16 %v187_v47, %v181_v46  ;;  %v3815_v30 = vpack.c.bf16 %v223_v21, %v217_v20  ;;  %v241_v46 = vld [vmem:[%s7279_s2 + $0x610] sm:$0xff]  ;;  %v247_v47 = vld [vmem:[%s7279_s2 + $0x640] sm:$0xff] }
  0x93   :  { %3798 = vmatprep.subr.bf16.mxu1 %v3797_v32  ;;  %v3805_v60 = vpack.c.bf16 %v200_v49, %v194_v48  ;;  %v3817_v32 = vpack.c.bf16 %v236_v23, %v230_v22  ;;  %v254_v48 = vld [vmem:[%s7279_s2 + $0x678] sm:$0xff]  ;;  %v260_v49 = vld [vmem:[%s7279_s2 + $0x6a8] sm:$0xff]  ;;  %v3823_v59 = vpack.c.bf16 %v247_v47, %v241_v46  ;;  %v277_v23 = vld [vmem:[%s7279_s2 + $0x730] sm:$0xff] }
  0x94   :  { %v66_v21 = vld [vmem:[%s7279_s2 + $0x98] sm:$0xff] }
  0x95   :  { %3616 = vmatpush1.bf16.msra.mxu0 %v3615_v62  ;;  %v199_v62 = vld [vmem:[%s7279_s2 + $0x4c0] sm:$0xff]  ;;  %v90_v46 = vld [vmem:[%s7279_s2 + $0x158] sm:$0xff] }
  0x96   :  { %3618 = vmatprep.subr.bf16.mxu0 %v3617_v57  ;;  %3800 = vmatpush1.bf16.msra.mxu1 %v3799_v43  ;;  %v206_v57 = vld [vmem:[%s7279_s2 + $0x4f8] sm:$0xff]  ;;  %v3807_v5 = vpack.c.bf16 %v199_v62, %v193_v61  ;;  %v3819_v43 = vpack.c.bf16 %v235_v34, %v229_v33  ;;  %v3825_v61 = vpack.c.bf16 %v260_v49, %v254_v48  ;;  %v253_v62 = vld [vmem:[%s7279_s2 + $0x670] sm:$0xff]  ;;  %v307_v49 = vld [vmem:[%s7279_s2 + $0x820] sm:$0xff] }
  0x97   :  { %3802 = vmatprep.subr.bf16.mxu1 %v3801_v45  ;;  %v3809_v6 = vpack.c.bf16 %v212_v63, %v206_v57  ;;  %v3821_v45 = vpack.c.bf16 %v248_v36, %v242_v35  ;;  %v259_v57 = vld [vmem:[%s7279_s2 + $0x6a0] sm:$0xff]  ;;  %v266_v63 = vld [vmem:[%s7279_s2 + $0x6d8] sm:$0xff]  ;;  %v289_v36 = vld [vmem:[%s7279_s2 + $0x790] sm:$0xff] }
  0x98   :  { %v78_v34 = vld [vmem:[%s7279_s2 + $0xf8] sm:$0xff]  ;;  %v301_v48 = vld [vmem:[%s7279_s2 + $0x7f0] sm:$0xff] }
  0x99   :  { %3620 = vmatpush1.bf16.msra.mxu0 %v3619_v11  ;;  %v224_v11 = vld [vmem:[%s7279_s2 + $0x588] sm:$0xff] }
  0x9a   :  { %3622 = vmatprep.subr.bf16.mxu0 %v3621_v12  ;;  %3804 = vmatpush1.bf16.msra.mxu1 %v3803_v58  ;;  %v3813_v19 = vpack.c.bf16 %v224_v11, %v218_v10  ;;  %v5570_v58 = vld [vmem:[%s7281_s0] sm:$0xff]  ;;  %v265_v11 = vld [vmem:[%s7279_s2 + $0x6d0] sm:$0xff] }
  0x9b   :  { %3806 = vmatprep.subr.bf16.mxu1 %v3805_v60  ;;  %v628_v60 = vld [vmem:[%s7279_s2 + $0x11f8] sm:$0xff] }
  0x9d   :  { %3624 = vmatpush1.bf16.msra.mxu0 %v3623_v24 }
  0x9e   :  { %3626 = vmatprep.subr.bf16.mxu0 %v3625_v25  ;;  %3808 = vmatpush1.bf16.msra.mxu1 %v3807_v5  ;;  %v3645_v25 = vpack.c.bf16 %v592_v18, %v586_v16  ;;  %v627_v5 = vld [vmem:[%s7279_s2 + $0x11f0] sm:$0xff] }
  0x9f   :  { %3810 = vmatprep.subr.bf16.mxu1 %v3809_v6  ;;  %v3827_v6 = vpack.c.bf16 %v259_v57, %v253_v62  ;;  %v53_v18 = vld [vmem:[%s7279_s2 + $0x30] sm:$0xff]  ;;  %v319_v57 = vld [vmem:[%s7279_s2 + $0x880] sm:$0xff] }
  0xa0   :  { %v313_v62 = vld [vmem:[%s7279_s2 + $0x850] sm:$0xff] }
  0xa1   :  { %3628 = vmatpush1.bf16.msra.mxu0 %v3627_v37  ;;  %v3647_v37 = vpack.c.bf16 %v591_v27, %v585_v26  ;;  %v296_v26 = vld [vmem:[%s7279_s2 + $0x7c8] sm:$0xff] }
  0xa2   :  { %3630 = vmatprep.subr.bf16.mxu0 %v3629_v38  ;;  %3812 = vmatpush1.bf16.msra.mxu1 %v3811_v17  ;;  %v3649_v38 = vpack.c.bf16 %v604_v31, %v598_v29  ;;  %v47_v17 = vld [vmem:[%s7279_s2] sm:$0xff]  ;;  %v65_v31 = vld [vmem:[%s7279_s2 + $0x90] sm:$0xff] }
  0xa3   :  { %3814 = vmatprep.subr.bf16.mxu1 %v3813_v19  ;;  %v60_v19 = vld [vmem:[%s7279_s2 + $0x68] sm:$0xff]  ;;  %v3663_v27 = vpack.c.bf16 %v53_v18, %v47_v17 }
  0xa4   :  { %1002 = vmatmul.mubr.f32.vlgmr.msra.gmra.mrb[4].mxu0 %v4815_v50  ;;  %v567_v50 = vld [vmem:[%s7279_s2 + $0x1010] sm:$0xff]  ;;  %v3665_v29 = vpack.c.bf16 %v66_v21, %v60_v19  ;;  %v120_v18 = vld [vmem:[%s7279_s2 + $0x248] sm:$0xff]  ;;  %v126_v19 = vld [vmem:[%s7279_s2 + $0x278] sm:$0xff] }
  0xa5   :  { %3632 = vmatpush1.bf16.msra.mxu0 %v3631_v51  ;;  %1007 = vmatprep.mubr.f32.mxu0 %v4829_v56  ;;  %v580_v56 = vld [vmem:[%s7279_s2 + $0x1078] sm:$0xff]  ;;  %v3639_v12 = vpack.c.bf16 %v567_v50, %v561_v3  ;;  %v3651_v51 = vpack.c.bf16 %v603_v40, %v597_v39  ;;  %v621_v50 = vld [vmem:[%s7279_s2 + $0x11c0] sm:$0xff]  ;;  %v308_v39 = vld [vmem:[%s7279_s2 + $0x828] sm:$0xff]  ;;  %v3685_v21 = vpack.c.bf16 %v126_v19, %v120_v18 }
  0xa6   :  { %3634 = vmatprep.subr.bf16.mxu0 %v3633_v52  ;;  %v3641_v13 = vpack.c.bf16 %v580_v56, %v574_v4  ;;  %3816 = vmatpush1.bf16.msra.mxu1 %v3815_v30  ;;  %v609_v52 = vld [vmem:[%s7279_s2 + $0x1160] sm:$0xff]  ;;  %v3657_v4 = vpack.c.bf16 %v628_v60, %v622_v55  ;;  %v48_v56 = vld [vmem:[%s7279_s2 + $0x8] sm:$0xff]  ;;  %v233_v19 = vld [vmem:[%s7279_s2 + $0x5d0] sm:$0xff] }
  0xa7   :  { %3818 = vmatprep.subr.bf16.mxu1 %v3817_v32  ;;  %v3655_v3 = vpack.c.bf16 %v615_v54, %v609_v52  ;;  %v3661_v16 = vpack.c.bf16 %v54_v9, %v48_v56  ;;  %v59_v30 = vld [vmem:[%s7279_s2 + $0x60] sm:$0xff]  ;;  %v72_v32 = vld [vmem:[%s7279_s2 + $0xc8] sm:$0xff]  ;;  %v3673_v54 = vpack.c.bf16 %v90_v46, %v84_v44  ;;  %v114_v9 = vld [vmem:[%s7279_s2 + $0x218] sm:$0xff] }
  0xa8   :  { %1008 = vmatmul.mubr.f32.gmra.mrb[6].mxu0 %v4851_v2  ;;  %v579_v2 = vld [vmem:[%s7279_s2 + $0x1070] sm:$0xff]  ;;  %v3667_v40 = vpack.c.bf16 %v65_v31, %v59_v30  ;;  %v3669_v41 = vpack.c.bf16 %v78_v34, %v72_v32  ;;  %v320_v52 = vld [vmem:[%s7279_s2 + $0x888] sm:$0xff]  ;;  %v83_v55 = vld [vmem:[%s7279_s2 + $0x120] sm:$0xff] }
  0xa9   :  { %3636 = vmatpush1.bf16.msra.mxu0 %v3635_v0  ;;  %1078 = vmatprep.mubr.f32.mxu0 %v4375_v15  ;;  %v3643_v24 = vpack.c.bf16 %v579_v2, %v573_v14  ;;  %v272_v0 = vld [vmem:[%s7279_s2 + $0x708] sm:$0xff]  ;;  %v3659_v2 = vpack.c.bf16 %v627_v5, %v621_v50  ;;  %v101_v5 = vld [vmem:[%s7279_s2 + $0x1b0] sm:$0xff]  ;;  %v131_v30 = vld [vmem:[%s7279_s2 + $0x2a0] sm:$0xff] }
  0xaa   :  { %3638 = vmatprep.subr.bf16.mxu0 %v3637_v1  ;;  %3820 = vmatpush1.bf16.msra.mxu1 %v3819_v43  ;;  %v5590_v1 = vld [vmem:[%s7281_s0 + $0x20] sm:$0x3f]  ;;  %v3829_v10 = vpack.c.bf16 %v272_v0, %v266_v63  ;;  %v284_v14 = vld [vmem:[%s7279_s2 + $0x768] sm:$0xff]  ;;  %v326_v63 = vld [vmem:[%s7279_s2 + $0x8b8] sm:$0xff] }
  0xab   :  { %3822 = vmatprep.subr.bf16.mxu1 %v3821_v45  ;;  %v71_v43 = vld [vmem:[%s7279_s2 + $0xc0] sm:$0xff]  ;;  %v96_v60 = vld [vmem:[%s7279_s2 + $0x188] sm:$0xff]  ;;  %v137_v31 = vld [vmem:[%s7279_s2 + $0x2d0] sm:$0xff] }
  0xac   :  { %v332_v0 = vld [vmem:[%s7279_s2 + $0x8e8] sm:$0xff]  ;;  %v150_v34 = vld [vmem:[%s7279_s2 + $0x338] sm:$0xff]  ;;  %v161_v44 = vld [vmem:[%s7279_s2 + $0x390] sm:$0xff] }
  0xad   :  { %3640 = vmatpush1.bf16.msra.mxu0 %v3639_v12  ;;  %1310 = vmatmul.mubr.f32.vlgmr.msra.gmra.mrb[0].mxu1 %v5570_v58  ;;  %v271_v12 = vld [vmem:[%s7279_s2 + $0x700] sm:$0xff]  ;;  %v108_v56 = vld [vmem:[%s7279_s2 + $0x1e8] sm:$0xff]  ;;  %v174_v46 = vld [vmem:[%s7279_s2 + $0x3f8] sm:$0xff] }
  0xae   :  { %3642 = vmatprep.subr.bf16.mxu0 %v3641_v13  ;;  %3824 = vmatpush1.bf16.msra.mxu1 %v3823_v59  ;;  %v278_v13 = vld [vmem:[%s7279_s2 + $0x738] sm:$0xff]  ;;  %v3831_v20 = vpack.c.bf16 %v271_v12, %v265_v11  ;;  %v89_v59 = vld [vmem:[%s7279_s2 + $0x150] sm:$0xff]  ;;  %v331_v12 = vld [vmem:[%s7279_s2 + $0x8e0] sm:$0xff] }
  0xaf   :  { %3826 = vmatprep.subr.bf16.mxu1 %v3825_v61  ;;  %1315 = vmatprep.mubr.f32.mxu1 %v5590_v1  ;;  %v3833_v22 = vpack.c.bf16 %v284_v14, %v278_v13  ;;  %v325_v11 = vld [vmem:[%s7279_s2 + $0x8b0] sm:$0xff]  ;;  %v3681_v14 = vpack.c.bf16 %v114_v9, %v108_v56  ;;  %v5783_v32 = vld [vmem:[%s7281_s0 + $0x28] sm:$0x3f]  ;;  %v222_v9 = vld [vmem:[%s7279_s2 + $0x578] sm:$0xff] }
  0xb0   :  { %v3851_v17 = vpack.c.bf16 %v331_v12, %v325_v11  ;;  %v209_v56 = vld [vmem:[%s7279_s2 + $0x510] sm:$0xff]  ;;  %v215_v12 = vld [vmem:[%s7279_s2 + $0x540] sm:$0xff] }
  0xb1   :  { %3644 = vmatpush1.bf16.msra.mxu0 %v3643_v24  ;;  %1316 = vmatmul.mubr.f32.gmra.mrb[2].mxu1 %v5605_v7  ;;  %v283_v24 = vld [vmem:[%s7279_s2 + $0x760] sm:$0xff] }
  0xb2   :  { %3646 = vmatprep.subr.bf16.mxu0 %v3645_v25  ;;  %3828 = vmatpush1.bf16.msra.mxu1 %v3827_v6  ;;  %v290_v25 = vld [vmem:[%s7279_s2 + $0x798] sm:$0xff]  ;;  %v3835_v33 = vpack.c.bf16 %v283_v24, %v277_v23  ;;  %v3847_v6 = vpack.c.bf16 %v319_v57, %v313_v62  ;;  %v125_v23 = vld [vmem:[%s7279_s2 + $0x270] sm:$0xff]  ;;  %v191_v57 = vld [vmem:[%s7279_s2 + $0x480] sm:$0xff] }
  0xb3   :  { %3830 = vmatprep.subr.bf16.mxu1 %v3829_v10  ;;  %1386 = vmatprep.mubr.f32.mxu1 %v4375_v15  ;;  %v3837_v35 = vpack.c.bf16 %v296_v26, %v290_v25  ;;  %v3849_v10 = vpack.c.bf16 %v332_v0, %v326_v63  ;;  %v5764_v24 = vld [vmem:[%s7281_s0 + $0x10] sm:$0xff]  ;;  %v132_v25 = vld [vmem:[%s7279_s2 + $0x2a8] sm:$0xff]  ;;  %v138_v26 = vld [vmem:[%s7279_s2 + $0x2d8] sm:$0xff] }
  0xb4   :  { %v197_v63 = vld [vmem:[%s7279_s2 + $0x4b0] sm:$0xff]  ;;  %v204_v0 = vld [vmem:[%s7279_s2 + $0x4e8] sm:$0xff]  ;;  %v227_v18 = vld [vmem:[%s7279_s2 + $0x5a0] sm:$0xff] }
  0xb5   :  { %3648 = vmatpush1.bf16.msra.mxu0 %v3647_v37  ;;  %v295_v37 = vld [vmem:[%s7279_s2 + $0x7c0] sm:$0xff] }
  0xb6   :  { %3650 = vmatprep.subr.bf16.mxu0 %v3649_v38  ;;  %3832 = vmatpush1.bf16.msra.mxu1 %v3831_v20  ;;  %v302_v38 = vld [vmem:[%s7279_s2 + $0x7f8] sm:$0xff]  ;;  %v3839_v45 = vpack.c.bf16 %v295_v37, %v289_v36  ;;  %v143_v37 = vld [vmem:[%s7279_s2 + $0x300] sm:$0xff] }
  0xb7   :  { %3834 = vmatprep.subr.bf16.mxu1 %v3833_v22  ;;  %v3841_v47 = vpack.c.bf16 %v308_v39, %v302_v38  ;;  %v119_v22 = vld [vmem:[%s7279_s2 + $0x240] sm:$0xff]  ;;  %v149_v38 = vld [vmem:[%s7279_s2 + $0x330] sm:$0xff]  ;;  %v156_v39 = vld [vmem:[%s7279_s2 + $0x368] sm:$0xff] }
  0xb9   :  { %3652 = vmatpush1.bf16.msra.mxu0 %v3651_v51  ;;  %v314_v51 = vld [vmem:[%s7279_s2 + $0x858] sm:$0xff] }
  0xba   :  { %3654 = vmatprep.subr.bf16.mxu0 %v3653_v53  ;;  %3836 = vmatpush1.bf16.msra.mxu1 %v3835_v33  ;;  %v3845_v61 = vpack.c.bf16 %v320_v52, %v314_v51  ;;  %v144_v33 = vld [vmem:[%s7279_s2 + $0x308] sm:$0xff]  ;;  %v173_v51 = vld [vmem:[%s7279_s2 + $0x3f0] sm:$0xff] }
  0xbb   :  { %3838 = vmatprep.subr.bf16.mxu1 %v3837_v35  ;;  %v3691_v35 = vpack.c.bf16 %v137_v31, %v131_v30  ;;  %v3693_v36 = vpack.c.bf16 %v150_v34, %v144_v33  ;;  %v180_v52 = vld [vmem:[%s7279_s2 + $0x428] sm:$0xff]  ;;  %v251_v33 = vld [vmem:[%s7279_s2 + $0x660] sm:$0xff]  ;;  %v257_v34 = vld [vmem:[%s7279_s2 + $0x690] sm:$0xff] }
  0xbd   :  { %3656 = vmatpush1.bf16.msra.mxu0 %v3655_v3  ;;  %v3675_v3 = vpack.c.bf16 %v89_v59, %v83_v55  ;;  %v179_v59 = vld [vmem:[%s7279_s2 + $0x420] sm:$0xff] }
  0xbe   :  { %3658 = vmatprep.subr.bf16.mxu0 %v3657_v4  ;;  %3840 = vmatpush1.bf16.msra.mxu1 %v3839_v45  ;;  %v95_v4 = vld [vmem:[%s7279_s2 + $0x180] sm:$0xff]  ;;  %v168_v45 = vld [vmem:[%s7279_s2 + $0x3c8] sm:$0xff] }
  0xbf   :  { %3842 = vmatprep.subr.bf16.mxu1 %v3841_v47  ;;  %v3679_v13 = vpack.c.bf16 %v101_v5, %v95_v4  ;;  %v203_v5 = vld [vmem:[%s7279_s2 + $0x4e0] sm:$0xff] }
  0xc1   :  { %3660 = vmatpush1.bf16.msra.mxu0 %v3659_v2  ;;  %v107_v2 = vld [vmem:[%s7279_s2 + $0x1e0] sm:$0xff] }
  0xc2   :  { %3662 = vmatprep.subr.bf16.mxu0 %v3661_v16  ;;  %v113_v16 = vld [vmem:[%s7279_s2 + $0x210] sm:$0xff] }
  0xc3   :  { %v3683_v20 = vpack.c.bf16 %v113_v16, %v107_v2  ;;  %v234_v2 = vld [vmem:[%s7279_s2 + $0x5d8] sm:$0xff] }
  0xc4   :  { %1079 = vmatmul.mubr.f32.vlgmr.msra.gmra.mrb[4].mxu0 %v5030_v28  ;;  %v77_v28 = vld [vmem:[%s7279_s2 + $0xf0] sm:$0xff] }
  0xc5   :  { %3664 = vmatpush1.bf16.msra.mxu0 %v3663_v27  ;;  %1084 = vmatprep.mubr.f32.mxu0 %v4375_v15  ;;  %v3671_v53 = vpack.c.bf16 %v77_v28, %v71_v43  ;;  %v3687_v27 = vpack.c.bf16 %v125_v23, %v119_v22  ;;  %v155_v28 = vld [vmem:[%s7279_s2 + $0x360] sm:$0xff]  ;;  %v3723_v22 = vpack.c.bf16 %v233_v19, %v227_v18 }
  0xc6   :  { %3666 = vmatprep.subr.bf16.mxu0 %v3665_v29  ;;  %v3689_v29 = vpack.c.bf16 %v138_v26, %v132_v25  ;;  %v3699_v47 = vpack.c.bf16 %v161_v44, %v155_v28  ;;  %v239_v25 = vld [vmem:[%s7279_s2 + $0x600] sm:$0xff]  ;;  %v245_v26 = vld [vmem:[%s7279_s2 + $0x630] sm:$0xff] }
  0xc7   :  { %v3727_v30 = vpack.c.bf16 %v245_v26, %v239_v25 }
  0xc8   :  { %1085 = vmatmul.mubr.f32.gmra.mrb[6].mxu0 %v5061_v42  ;;  %v3843_v42 = vpack.c.bf16 %v307_v49, %v301_v48  ;;  %v3701_v48 = vpack.c.bf16 %v174_v46, %v168_v45  ;;  %v167_v49 = vld [vmem:[%s7279_s2 + $0x3c0] sm:$0xff]  ;;  %v281_v46 = vld [vmem:[%s7279_s2 + $0x750] sm:$0xff] }
  0xc9   :  { %3668 = vmatpush1.bf16.msra.mxu0 %v3667_v40  ;;  %1155 = vmatprep.mubr.f32.mxu0 %v5239_v8  ;;  %v102_v8 = vld [vmem:[%s7279_s2 + $0x1b8] sm:$0xff]  ;;  %v275_v45 = vld [vmem:[%s7279_s2 + $0x720] sm:$0xff] }
  0xca   :  { %3670 = vmatprep.subr.bf16.mxu0 %v3669_v41  ;;  %v3677_v50 = vpack.c.bf16 %v102_v8, %v96_v60  ;;  %3844 = vmatpush1.bf16.msra.mxu1 %v3843_v42  ;;  %v162_v40 = vld [vmem:[%s7279_s2 + $0x398] sm:$0xff]  ;;  %v3695_v41 = vpack.c.bf16 %v149_v38, %v143_v37  ;;  %v185_v60 = vld [vmem:[%s7279_s2 + $0x450] sm:$0xff]  ;;  %v192_v42 = vld [vmem:[%s7279_s2 + $0x488] sm:$0xff]  ;;  %v3731_v37 = vpack.c.bf16 %v257_v34, %v251_v33 }
  0xcb   :  { %3846 = vmatprep.subr.bf16.mxu1 %v3845_v61  ;;  %v3697_v43 = vpack.c.bf16 %v162_v40, %v156_v39  ;;  %v198_v8 = vld [vmem:[%s7279_s2 + $0x4b8] sm:$0xff]  ;;  %v3707_v61 = vpack.c.bf16 %v185_v60, %v179_v59  ;;  %v263_v39 = vld [vmem:[%s7279_s2 + $0x6c0] sm:$0xff]  ;;  %v269_v40 = vld [vmem:[%s7279_s2 + $0x6f0] sm:$0xff] }
  0xcc   :  { %v3709_v62 = vpack.c.bf16 %v198_v8, %v192_v42  ;;  %v3735_v28 = vpack.c.bf16 %v269_v40, %v263_v39  ;;  %v299_v42 = vld [vmem:[%s7279_s2 + $0x7e0] sm:$0xff]  ;;  %v305_v8 = vld [vmem:[%s7279_s2 + $0x810] sm:$0xff]  ;;  %v4374_v34 = vld [vmem:[%s7281_s0 + $0x8] sm:$0xff]  ;;  %s4377_s0 = smov 88  }
  0xcd   :  { %3672 = vmatpush1.bf16.msra.mxu0 %v3671_v53  ;;  %v186_v53 = vld [vmem:[%s7279_s2 + $0x458] sm:$0xff] }
  0xce   :  { %3674 = vmatprep.subr.bf16.mxu0 %v3673_v54  ;;  %3848 = vmatpush1.bf16.msra.mxu1 %v3847_v6  ;;  %v3703_v54 = vpack.c.bf16 %v173_v51, %v167_v49  ;;  %v3705_v55 = vpack.c.bf16 %v186_v53, %v180_v52  ;;  %v216_v6 = vld [vmem:[%s7279_s2 + $0x548] sm:$0xff]  ;;  %v3739_v49 = vpack.c.bf16 %v281_v46, %v275_v45  ;;  %v287_v52 = vld [vmem:[%s7279_s2 + $0x780] sm:$0xff]  ;;  %v293_v53 = vld [vmem:[%s7279_s2 + $0x7b0] sm:$0xff] }
  0xcf   :  { %3850 = vmatprep.subr.bf16.mxu1 %v3849_v10  ;;  %v3715_v10 = vpack.c.bf16 %v209_v56, %v203_v5  ;;  %v3717_v11 = vpack.c.bf16 %v222_v9, %v216_v6  ;;  %v3743_v59 = vpack.c.bf16 %v293_v53, %v287_v52  ;;  %v323_v6 = vld [vmem:[%s7279_s2 + $0x8a0] sm:$0xff]  ;;  %v329_v9 = vld [vmem:[%s7279_s2 + $0x8d0] sm:$0xff]  ;;  %v106_v39 = vld [vmem:[%s7279_s2 + $0x1d8] sm:$0xff] }
  0xd0   :  { %v118_v45 = vld [vmem:[%s7279_s2 + $0x238] sm:$0xff] }
  0xd1   :  { %3676 = vmatpush1.bf16.msra.mxu0 %v3675_v3  ;;  %v210_v3 = vld [vmem:[%s7279_s2 + $0x518] sm:$0xff] }
  0xd2   :  { %3678 = vmatprep.subr.bf16.mxu0 %v3677_v50  ;;  %3852 = vmatpush1.bf16.msra.mxu1 %v3851_v17  ;;  %v3711_v50 = vpack.c.bf16 %v197_v63, %v191_v57  ;;  %v3713_v4 = vpack.c.bf16 %v210_v3, %v204_v0  ;;  %v3747_v57 = vpack.c.bf16 %v305_v8, %v299_v42  ;;  %v311_v0 = vld [vmem:[%s7279_s2 + $0x840] sm:$0xff]  ;;  %v317_v3 = vld [vmem:[%s7279_s2 + $0x870] sm:$0xff]  ;;  %v130_v52 = vld [vmem:[%s7279_s2 + $0x298] sm:$0xff] }
  0xd3   :  { %v3751_v5 = vpack.c.bf16 %v317_v3, %v311_v0  ;;  %v142_v42 = vld [vmem:[%s7279_s2 + $0x2f8] sm:$0xff] }
  0xd4   :  { %v154_v0 = vld [vmem:[%s7279_s2 + $0x358] sm:$0xff] }
  0xd5   :  { %3680 = vmatpush1.bf16.msra.mxu0 %v3679_v13  ;;  %1387 = vmatmul.mubr.f32.vlgmr.msra.gmra.mrb[0].mxu1 %v5764_v24  ;;  %v221_v13 = vld [vmem:[%s7279_s2 + $0x570] sm:$0xff] }
  0xd6   :  { %3682 = vmatprep.subr.bf16.mxu0 %v3681_v14  ;;  %1392 = vmatprep.mubr.f32.mxu1 %v4375_v15  ;;  %v228_v14 = vld [vmem:[%s7279_s2 + $0x5a8] sm:$0xff]  ;;  %v3719_v16 = vpack.c.bf16 %v221_v13, %v215_v12  ;;  %v3755_v12 = vpack.c.bf16 %v329_v9, %v323_v6  ;;  %v166_v6 = vld [vmem:[%s7279_s2 + $0x3b8] sm:$0xff] }
  0xd7   :  { %v3721_v17 = vpack.c.bf16 %v234_v2, %v228_v14  ;;  %v51_v14 = vld [vmem:[%s7279_s2 + $0x20] sm:$0xff]  ;;  %v57_v2 = vld [vmem:[%s7279_s2 + $0x50] sm:$0xff] }
  0xd8   :  { %v3855_v18 = vpack.c.bf16 %v57_v2, %v51_v14  ;;  %v178_v14 = vld [vmem:[%s7279_s2 + $0x418] sm:$0xff] }
  0xd9   :  { %3684 = vmatpush1.bf16.msra.mxu0 %v3683_v20  ;;  %1393 = vmatmul.mubr.f32.gmra.mrb[2].mxu1 %v5783_v32  ;;  %v240_v20 = vld [vmem:[%s7279_s2 + $0x608] sm:$0xff] }
  0xda   :  { %3686 = vmatprep.subr.bf16.mxu0 %v3685_v21  ;;  %v246_v21 = vld [vmem:[%s7279_s2 + $0x638] sm:$0xff] }
  0xdb   :  { %v3725_v23 = vpack.c.bf16 %v246_v21, %v240_v20  ;;  %v63_v20 = vld [vmem:[%s7279_s2 + $0x80] sm:$0xff]  ;;  %v69_v21 = vld [vmem:[%s7279_s2 + $0xb0] sm:$0xff] }
  0xdc   :  { %v3859_v25 = vpack.c.bf16 %v69_v21, %v63_v20  ;;  %v190_v20 = vld [vmem:[%s7279_s2 + $0x478] sm:$0xff] }
  0xdd   :  { %3688 = vmatpush1.bf16.msra.mxu0 %v3687_v27  ;;  %v252_v27 = vld [vmem:[%s7279_s2 + $0x668] sm:$0xff] }
  0xde   :  { %3690 = vmatprep.subr.bf16.mxu0 %v3689_v29  ;;  %v258_v29 = vld [vmem:[%s7279_s2 + $0x698] sm:$0xff] }
  0xdf   :  { %v3729_v31 = vpack.c.bf16 %v258_v29, %v252_v27  ;;  %v75_v27 = vld [vmem:[%s7279_s2 + $0xe0] sm:$0xff]  ;;  %v81_v29 = vld [vmem:[%s7279_s2 + $0x110] sm:$0xff] }
  0xe0   :  { %v3863_v33 = vpack.c.bf16 %v81_v29, %v75_v27  ;;  %v202_v27 = vld [vmem:[%s7279_s2 + $0x4d8] sm:$0xff] }
  0xe1   :  { %3692 = vmatpush1.bf16.msra.mxu0 %v3691_v35  ;;  %v264_v35 = vld [vmem:[%s7279_s2 + $0x6c8] sm:$0xff] }
  0xe2   :  { %3694 = vmatprep.subr.bf16.mxu0 %v3693_v36  ;;  %v270_v36 = vld [vmem:[%s7279_s2 + $0x6f8] sm:$0xff] }
  0xe3   :  { %v3733_v38 = vpack.c.bf16 %v270_v36, %v264_v35  ;;  %v87_v36 = vld [vmem:[%s7279_s2 + $0x140] sm:$0xff] }
  0xe5   :  { %3696 = vmatpush1.bf16.msra.mxu0 %v3695_v41  ;;  %v276_v41 = vld [vmem:[%s7279_s2 + $0x728] sm:$0xff] }
  0xe6   :  { %3698 = vmatprep.subr.bf16.mxu0 %v3697_v43  ;;  %v282_v43 = vld [vmem:[%s7279_s2 + $0x758] sm:$0xff] }
  0xe7   :  { %v3737_v44 = vpack.c.bf16 %v282_v43, %v276_v41  ;;  %v99_v43 = vld [vmem:[%s7279_s2 + $0x1a0] sm:$0xff] }
  0xe9   :  { %3700 = vmatpush1.bf16.msra.mxu0 %v3699_v47  ;;  %v288_v47 = vld [vmem:[%s7279_s2 + $0x788] sm:$0xff] }
  0xea   :  { %3702 = vmatprep.subr.bf16.mxu0 %v3701_v48  ;;  %v294_v48 = vld [vmem:[%s7279_s2 + $0x7b8] sm:$0xff] }
  0xeb   :  { %v3741_v51 = vpack.c.bf16 %v294_v48, %v288_v47  ;;  %v111_v48 = vld [vmem:[%s7279_s2 + $0x200] sm:$0xff] }
  0xed   :  { %3704 = vmatpush1.bf16.msra.mxu0 %v3703_v54  ;;  %v300_v54 = vld [vmem:[%s7279_s2 + $0x7e8] sm:$0xff] }
  0xee   :  { %3706 = vmatprep.subr.bf16.mxu0 %v3705_v55  ;;  %v306_v55 = vld [vmem:[%s7279_s2 + $0x818] sm:$0xff] }
  0xef   :  { %v3745_v60 = vpack.c.bf16 %v306_v55, %v300_v54  ;;  %v123_v55 = vld [vmem:[%s7279_s2 + $0x260] sm:$0xff] }
  0xf1   :  { %3708 = vmatpush1.bf16.msra.mxu0 %v3707_v61  ;;  %v312_v61 = vld [vmem:[%s7279_s2 + $0x848] sm:$0xff] }
  0xf2   :  { %3710 = vmatprep.subr.bf16.mxu0 %v3709_v62  ;;  %v318_v62 = vld [vmem:[%s7279_s2 + $0x878] sm:$0xff] }
  0xf3   :  { %v3749_v63 = vpack.c.bf16 %v318_v62, %v312_v61  ;;  %v135_v62 = vld [vmem:[%s7279_s2 + $0x2c0] sm:$0xff] }
  0xf5   :  { %3712 = vmatpush1.bf16.msra.mxu0 %v3711_v50  ;;  %v324_v50 = vld [vmem:[%s7279_s2 + $0x8a8] sm:$0xff] }
  0xf6   :  { %3714 = vmatprep.subr.bf16.mxu0 %v3713_v4  ;;  %v330_v4 = vld [vmem:[%s7279_s2 + $0x8d8] sm:$0xff] }
  0xf7   :  { %v3753_v56 = vpack.c.bf16 %v330_v4, %v324_v50  ;;  %v147_v4 = vld [vmem:[%s7279_s2 + $0x320] sm:$0xff] }
  0xf9   :  { %3716 = vmatpush1.bf16.msra.mxu0 %v3715_v10  ;;  %v52_v10 = vld [vmem:[%s7279_s2 + $0x28] sm:$0xff] }
  0xfa   :  { %3718 = vmatprep.subr.bf16.mxu0 %v3717_v11  ;;  %v58_v11 = vld [vmem:[%s7279_s2 + $0x58] sm:$0xff] }
  0xfb   :  { %v3853_v13 = vpack.c.bf16 %v58_v11, %v52_v10  ;;  %v159_v11 = vld [vmem:[%s7279_s2 + $0x380] sm:$0xff] }
  0xfd   :  { %3720 = vmatpush1.bf16.msra.mxu0 %v3719_v16  ;;  %v64_v16 = vld [vmem:[%s7279_s2 + $0x88] sm:$0xff] }
  0xfe   :  { %3722 = vmatprep.subr.bf16.mxu0 %v3721_v17  ;;  %v70_v17 = vld [vmem:[%s7279_s2 + $0xb8] sm:$0xff] }
  0xff   :  { %v3857_v19 = vpack.c.bf16 %v70_v17, %v64_v16  ;;  %v171_v17 = vld [vmem:[%s7279_s2 + $0x3e0] sm:$0xff] }
 0x101   :  { %3724 = vmatpush1.bf16.msra.mxu0 %v3723_v22  ;;  %v76_v22 = vld [vmem:[%s7279_s2 + $0xe8] sm:$0xff] }
 0x102   :  { %3726 = vmatprep.subr.bf16.mxu0 %v3725_v23  ;;  %v82_v23 = vld [vmem:[%s7279_s2 + $0x118] sm:$0xff] }
 0x103   :  { %v3861_v26 = vpack.c.bf16 %v82_v23, %v76_v22  ;;  %v183_v23 = vld [vmem:[%s7279_s2 + $0x440] sm:$0xff] }
 0x104   :  { %1156 = vmatmul.mubr.f32.vlgmr.msra.gmra.mrb[0].mxu0 %v5570_v58 }
 0x105   :  { %3728 = vmatpush1.bf16.msra.mxu0 %v3727_v30  ;;  %1161 = vmatprep.mubr.f32.mxu0 %v5590_v1  ;;  %v88_v30 = vld [vmem:[%s7279_s2 + $0x148] sm:$0xff] }
 0x106   :  { %3730 = vmatprep.subr.bf16.mxu0 %v3729_v31  ;;  %v94_v31 = vld [vmem:[%s7279_s2 + $0x178] sm:$0xff] }
 0x107   :  { %v3865_v35 = vpack.c.bf16 %v94_v31, %v88_v30  ;;  %v195_v31 = vld [vmem:[%s7279_s2 + $0x4a0] sm:$0xff] }
 0x108   :  { %1162 = vmatmul.mubr.f32.gmra.mrb[2].mxu0 %v5605_v7 }
 0x109   :  { %3732 = vmatpush1.bf16.msra.mxu0 %v3731_v37  ;;  %1232 = vmatprep.mubr.f32.mxu0 %v4375_v15  ;;  %v93_v37 = vld [vmem:[%s7279_s2 + $0x170] sm:$0xff] }
 0x10a   :  { %3734 = vmatprep.subr.bf16.mxu0 %v3733_v38  ;;  %v100_v38 = vld [vmem:[%s7279_s2 + $0x1a8] sm:$0xff]  ;;  %v3867_v40 = vpack.c.bf16 %v93_v37, %v87_v36 }
 0x10b   :  { %v3869_v41 = vpack.c.bf16 %v106_v39, %v100_v38  ;;  %v207_v38 = vld [vmem:[%s7279_s2 + $0x500] sm:$0xff]  ;;  %v213_v39 = vld [vmem:[%s7279_s2 + $0x530] sm:$0xff] }
 0x10d   :  { %3736 = vmatpush1.bf16.msra.mxu0 %v3735_v28  ;;  %v105_v28 = vld [vmem:[%s7279_s2 + $0x1d0] sm:$0xff] }
 0x10e   :  { %3738 = vmatprep.subr.bf16.mxu0 %v3737_v44  ;;  %v112_v44 = vld [vmem:[%s7279_s2 + $0x208] sm:$0xff]  ;;  %v3871_v46 = vpack.c.bf16 %v105_v28, %v99_v43  ;;  %v3907_v43 = vpack.c.bf16 %v213_v39, %v207_v38  ;;  %v333_v38 = vld [vmem:[%s7279_s2 + $0x8f0] sm:$0xff] }
 0x10f   :  { %v3873_v47 = vpack.c.bf16 %v118_v45, %v112_v44  ;;  %v219_v44 = vld [vmem:[%s7279_s2 + $0x560] sm:$0xff]  ;;  %v225_v45 = vld [vmem:[%s7279_s2 + $0x590] sm:$0xff] }
 0x111   :  { %3740 = vmatpush1.bf16.msra.mxu0 %v3739_v49  ;;  %v117_v49 = vld [vmem:[%s7279_s2 + $0x230] sm:$0xff] }
 0x112   :  { %3742 = vmatprep.subr.bf16.mxu0 %v3741_v51  ;;  %v124_v51 = vld [vmem:[%s7279_s2 + $0x268] sm:$0xff]  ;;  %v3875_v53 = vpack.c.bf16 %v117_v49, %v111_v48  ;;  %v3911_v48 = vpack.c.bf16 %v225_v45, %v219_v44 }
 0x113   :  { %v3877_v54 = vpack.c.bf16 %v130_v52, %v124_v51  ;;  %v231_v51 = vld [vmem:[%s7279_s2 + $0x5c0] sm:$0xff]  ;;  %v237_v52 = vld [vmem:[%s7279_s2 + $0x5f0] sm:$0xff] }
 0x115   :  { %3744 = vmatpush1.bf16.msra.mxu0 %v3743_v59  ;;  %v129_v59 = vld [vmem:[%s7279_s2 + $0x290] sm:$0xff] }
 0x116   :  { %3746 = vmatprep.subr.bf16.mxu0 %v3745_v60  ;;  %v136_v60 = vld [vmem:[%s7279_s2 + $0x2c8] sm:$0xff]  ;;  %v3879_v8 = vpack.c.bf16 %v129_v59, %v123_v55  ;;  %v3915_v55 = vpack.c.bf16 %v237_v52, %v231_v51  ;;  %v1705_v52 = vld [vmem:[%s7282_s4 + $0x210] sm:$0xff] }
 0x117   :  { %v3881_v61 = vpack.c.bf16 %v142_v42, %v136_v60  ;;  %v243_v60 = vld [vmem:[%s7279_s2 + $0x620] sm:$0xff]  ;;  %v249_v42 = vld [vmem:[%s7279_s2 + $0x650] sm:$0xff] }
 0x119   :  { %3748 = vmatpush1.bf16.msra.mxu0 %v3747_v57  ;;  %v141_v57 = vld [vmem:[%s7279_s2 + $0x2f0] sm:$0xff] }
 0x11a   :  { %3750 = vmatprep.subr.bf16.mxu0 %v3749_v63  ;;  %v148_v63 = vld [vmem:[%s7279_s2 + $0x328] sm:$0xff]  ;;  %v3883_v3 = vpack.c.bf16 %v141_v57, %v135_v62  ;;  %v3919_v62 = vpack.c.bf16 %v249_v42, %v243_v60 }
 0x11b   :  { %v3885_v50 = vpack.c.bf16 %v154_v0, %v148_v63  ;;  %v255_v63 = vld [vmem:[%s7279_s2 + $0x680] sm:$0xff]  ;;  %v261_v0 = vld [vmem:[%s7279_s2 + $0x6b0] sm:$0xff]  ;;  %v1708_v42 = vld [vmem:[%s7282_s4 + $0x228] sm:$0xff] }
 0x11d   :  { %3752 = vmatpush1.bf16.msra.mxu0 %v3751_v5  ;;  %v153_v5 = vld [vmem:[%s7279_s2 + $0x350] sm:$0xff] }
 0x11e   :  { %3754 = vmatprep.subr.bf16.mxu0 %v3753_v56  ;;  %v160_v56 = vld [vmem:[%s7279_s2 + $0x388] sm:$0xff]  ;;  %v3887_v9 = vpack.c.bf16 %v153_v5, %v147_v4  ;;  %v3923_v4 = vpack.c.bf16 %v261_v0, %v255_v63 }
 0x11f   :  { %v3889_v10 = vpack.c.bf16 %v166_v6, %v160_v56  ;;  %v267_v56 = vld [vmem:[%s7279_s2 + $0x6e0] sm:$0xff]  ;;  %v273_v6 = vld [vmem:[%s7279_s2 + $0x710] sm:$0xff] }
 0x121   :  { %3756 = vmatpush1.bf16.msra.mxu0 %v3755_v12  ;;  %v165_v12 = vld [vmem:[%s7279_s2 + $0x3b0] sm:$0xff] }
 0x122   :  { %3854 = vmatprep.subr.bf16.mxu0 %v3853_v13  ;;  %v172_v13 = vld [vmem:[%s7279_s2 + $0x3e8] sm:$0xff]  ;;  %v3891_v2 = vpack.c.bf16 %v165_v12, %v159_v11  ;;  %v279_v11 = vld [vmem:[%s7279_s2 + $0x740] sm:$0xff]  ;;  %v285_v12 = vld [vmem:[%s7279_s2 + $0x770] sm:$0xff] }
 0x123   :  { %v3893_v16 = vpack.c.bf16 %v178_v14, %v172_v13  ;;  %v292_v13 = vld [vmem:[%s7279_s2 + $0x7a8] sm:$0xff]  ;;  %v3931_v14 = vpack.c.bf16 %v285_v12, %v279_v11  ;;  %v1730_v11 = vld [vmem:[%s7282_s4 + $0x2d8] sm:$0xff] }
 0x124   :  { %1233 = vmatmul.mubr.f32.vlgmr.msra.gmra.mrb[0].mxu0 %v5764_v24 }
 0x125   :  { %3856 = vmatpush1.bf16.msra.mxu0 %v3855_v18  ;;  %1238 = vmatprep.mubr.f32.mxu0 %v4375_v15  ;;  %v177_v18 = vld [vmem:[%s7279_s2 + $0x410] sm:$0xff] }
 0x126   :  { %3858 = vmatprep.subr.bf16.mxu0 %v3857_v19  ;;  %v184_v19 = vld [vmem:[%s7279_s2 + $0x448] sm:$0xff]  ;;  %v3895_v21 = vpack.c.bf16 %v177_v18, %v171_v17  ;;  %v297_v17 = vld [vmem:[%s7279_s2 + $0x7d0] sm:$0xff] }
 0x127   :  { %v3897_v22 = vpack.c.bf16 %v190_v20, %v184_v19  ;;  %v304_v18 = vld [vmem:[%s7279_s2 + $0x808] sm:$0xff]  ;;  %v310_v19 = vld [vmem:[%s7279_s2 + $0x838] sm:$0xff] }
 0x128   :  { %1239 = vmatmul.mubr.f32.gmra.mrb[2].mxu0 %v5783_v32 }
 0x129   :  { %3860 = vmatpush1.bf16.msra.mxu0 %v3859_v25  ;;  %1463 = vmatprep.mubr.f32.mxu0 %v4374_v34  ;;  %v189_v25 = vld [vmem:[%s7279_s2 + $0x470] sm:$0xff]  ;;  %v208_v34 = vld [vmem:[%s7279_s2 + $0x508] sm:$0xff] }
 0x12a   :  { %3862 = vmatprep.subr.bf16.mxu0 %v3861_v26  ;;  %v196_v26 = vld [vmem:[%s7279_s2 + $0x4a8] sm:$0xff]  ;;  %v3899_v29 = vpack.c.bf16 %v189_v25, %v183_v23  ;;  %v309_v23 = vld [vmem:[%s7279_s2 + $0x830] sm:$0xff] }
 0x12b   :  { %v3901_v30 = vpack.c.bf16 %v202_v27, %v196_v26  ;;  %v316_v25 = vld [vmem:[%s7279_s2 + $0x868] sm:$0xff]  ;;  %v322_v26 = vld [vmem:[%s7279_s2 + $0x898] sm:$0xff] }
 0x12d   :  { %3864 = vmatpush1.bf16.msra.mxu0 %v3863_v33  ;;  %v201_v33 = vld [vmem:[%s7279_s2 + $0x4d0] sm:$0xff] }
 0x12e   :  { %3866 = vmatprep.subr.bf16.mxu0 %v3865_v35  ;;  %v214_v35 = vld [vmem:[%s7279_s2 + $0x538] sm:$0xff]  ;;  %v3903_v36 = vpack.c.bf16 %v201_v33, %v195_v31  ;;  %v321_v31 = vld [vmem:[%s7279_s2 + $0x890] sm:$0xff]  ;;  %v328_v33 = vld [vmem:[%s7279_s2 + $0x8c8] sm:$0xff] }
 0x12f   :  { %v3905_v37 = vpack.c.bf16 %v214_v35, %v208_v34  ;;  %v334_v34 = vld [vmem:[%s7279_s2 + $0x8f8] sm:$0xff] }
 0x131   :  { %3868 = vmatpush1.bf16.msra.mxu0 %v3867_v40  ;;  %v220_v40 = vld [vmem:[%s7279_s2 + $0x568] sm:$0xff] }
 0x132   :  { %3870 = vmatprep.subr.bf16.mxu0 %v3869_v41  ;;  %v226_v41 = vld [vmem:[%s7279_s2 + $0x598] sm:$0xff] }
 0x133   :  { %v3909_v28 = vpack.c.bf16 %v226_v41, %v220_v40 }
 0x135   :  { %3872 = vmatpush1.bf16.msra.mxu0 %v3871_v46  ;;  %v232_v46 = vld [vmem:[%s7279_s2 + $0x5c8] sm:$0xff] }
 0x136   :  { %3874 = vmatprep.subr.bf16.mxu0 %v3873_v47  ;;  %v238_v47 = vld [vmem:[%s7279_s2 + $0x5f8] sm:$0xff] }
 0x137   :  { %v3913_v49 = vpack.c.bf16 %v238_v47, %v232_v46  ;;  %v1706_v47 = vld [vmem:[%s7282_s4 + $0x218] sm:$0xff] }
 0x139   :  { %3876 = vmatpush1.bf16.msra.mxu0 %v3875_v53  ;;  %v244_v53 = vld [vmem:[%s7279_s2 + $0x628] sm:$0xff] }
 0x13a   :  { %3878 = vmatprep.subr.bf16.mxu0 %v3877_v54  ;;  %v250_v54 = vld [vmem:[%s7279_s2 + $0x658] sm:$0xff] }
 0x13b   :  { %v3917_v59 = vpack.c.bf16 %v250_v54, %v244_v53  ;;  %v1709_v53 = vld [vmem:[%s7282_s4 + $0x230] sm:$0xff]  ;;  %v1712_v54 = vld [vmem:[%s7282_s4 + $0x248] sm:$0xff] }
 0x13c   :  { %v3953_v60 = vpack.c.bf16 %v1712_v54, %v1709_v53  ;;  %v1756_v53 = vld [vmem:[%s7282_s4 + $0x3a8] sm:$0xff]  ;;  %v1759_v54 = vld [vmem:[%s7282_s4 + $0x3c0] sm:$0xff] }
 0x13d   :  { %3880 = vmatpush1.bf16.msra.mxu0 %v3879_v8  ;;  %v256_v8 = vld [vmem:[%s7279_s2 + $0x688] sm:$0xff] }
 0x13e   :  { %3882 = vmatprep.subr.bf16.mxu0 %v3881_v61  ;;  %v262_v61 = vld [vmem:[%s7279_s2 + $0x6b8] sm:$0xff] }
 0x13f   :  { %v3921_v57 = vpack.c.bf16 %v262_v61, %v256_v8  ;;  %v1711_v8 = vld [vmem:[%s7282_s4 + $0x240] sm:$0xff] }
 0x140   :  { %v1715_v61 = vld [vmem:[%s7282_s4 + $0x260] sm:$0xff] }
 0x141   :  { %3884 = vmatpush1.bf16.msra.mxu0 %v3883_v3  ;;  %v268_v3 = vld [vmem:[%s7279_s2 + $0x6e8] sm:$0xff] }
 0x142   :  { %3886 = vmatprep.subr.bf16.mxu0 %v3885_v50  ;;  %v274_v50 = vld [vmem:[%s7279_s2 + $0x718] sm:$0xff] }
 0x143   :  { %v3925_v5 = vpack.c.bf16 %v274_v50, %v268_v3  ;;  %v1714_v3 = vld [vmem:[%s7282_s4 + $0x258] sm:$0xff]  ;;  %v1717_v50 = vld [vmem:[%s7282_s4 + $0x270] sm:$0xff] }
 0x145   :  { %3888 = vmatpush1.bf16.msra.mxu0 %v3887_v9  ;;  %v280_v9 = vld [vmem:[%s7279_s2 + $0x748] sm:$0xff] }
 0x146   :  { %3890 = vmatprep.subr.bf16.mxu0 %v3889_v10 }
 0x149   :  { %3892 = vmatpush1.bf16.msra.mxu0 %v3891_v2 }
 0x14a   :  { %3894 = vmatprep.subr.bf16.mxu0 %v3893_v16  ;;  %v291_v16 = vld [vmem:[%s7279_s2 + $0x7a0] sm:$0xff] }
 0x14b   :  { %v3935_v20 = vpack.c.bf16 %v297_v17, %v291_v16  ;;  %v1736_v16 = vld [vmem:[%s7282_s4 + $0x308] sm:$0xff] }
 0x14d   :  { %3896 = vmatpush1.bf16.msra.mxu0 %v3895_v21  ;;  %v3937_v21 = vpack.c.bf16 %v310_v19, %v304_v18  ;;  %v1732_v19 = vld [vmem:[%s7282_s4 + $0x2e8] sm:$0xff] }
 0x14e   :  { %3898 = vmatprep.subr.bf16.mxu0 %v3897_v22  ;;  %v303_v22 = vld [vmem:[%s7279_s2 + $0x800] sm:$0xff] }
 0x14f   :  { %v3939_v27 = vpack.c.bf16 %v309_v23, %v303_v22  ;;  %v1742_v22 = vld [vmem:[%s7282_s4 + $0x338] sm:$0xff] }
 0x151   :  { %3900 = vmatpush1.bf16.msra.mxu0 %v3899_v29  ;;  %v3941_v29 = vpack.c.bf16 %v322_v26, %v316_v25  ;;  %v1738_v26 = vld [vmem:[%s7282_s4 + $0x318] sm:$0xff] }
 0x152   :  { %3902 = vmatprep.subr.bf16.mxu0 %v3901_v30  ;;  %v315_v30 = vld [vmem:[%s7279_s2 + $0x860] sm:$0xff] }
 0x153   :  { %v3943_v35 = vpack.c.bf16 %v321_v31, %v315_v30  ;;  %v1745_v30 = vld [vmem:[%s7282_s4 + $0x350] sm:$0xff]  ;;  %v1748_v31 = vld [vmem:[%s7282_s4 + $0x368] sm:$0xff] }
 0x155   :  { %3904 = vmatpush1.bf16.msra.mxu0 %v3903_v36  ;;  %v3945_v36 = vpack.c.bf16 %v334_v34, %v328_v33  ;;  %v3977_v33 = vpack.c.bf16 %v1748_v31, %v1745_v30  ;;  %v1744_v34 = vld [vmem:[%s7282_s4 + $0x348] sm:$0xff] }
 0x156   :  { %3906 = vmatprep.subr.bf16.mxu0 %v3905_v37  ;;  %v327_v37 = vld [vmem:[%s7279_s2 + $0x8c0] sm:$0xff] }
 0x157   :  { %v3947_v39 = vpack.c.bf16 %v333_v38, %v327_v37  ;;  %v1751_v37 = vld [vmem:[%s7282_s4 + $0x380] sm:$0xff]  ;;  %v1754_v38 = vld [vmem:[%s7282_s4 + $0x398] sm:$0xff] }
 0x159   :  { %3908 = vmatpush1.bf16.msra.mxu0 %v3907_v43 }
 0x15a   :  { %3910 = vmatprep.subr.bf16.mxu0 %v3909_v28 }
 0x15d   :  { %3912 = vmatpush1.bf16.msra.mxu0 %v3911_v48  ;;  %v1702_v48 = vld [vmem:[%s7282_s4 + $0x1f8] sm:$0xff] }
 0x15e   :  { %3914 = vmatprep.subr.bf16.mxu0 %v3913_v49 }
 0x161   :  { %3916 = vmatpush1.bf16.msra.mxu0 %v3915_v55 }
 0x162   :  { %3918 = vmatprep.subr.bf16.mxu0 %v3917_v59  ;;  %v3951_v59 = vpack.c.bf16 %v1705_v52, %v1702_v48  ;;  %v1757_v48 = vld [vmem:[%s7282_s4 + $0x3b0] sm:$0xff] }
 0x164   :  { %1464 = vmatmul.mubr.f32.vlgmr.msra.gmra.mrb[4].mxu0 %v5570_v58  ;;  %v286_v58 = vld [vmem:[%s7279_s2 + $0x778] sm:$0xff] }
 0x165   :  { %3920 = vmatpush1.bf16.msra.mxu0 %v3919_v62  ;;  %1469 = vmatprep.mubr.f32.mxu0 %v5590_v1  ;;  %v3927_v1 = vpack.c.bf16 %v273_v6, %v267_v56  ;;  %v3929_v10 = vpack.c.bf16 %v286_v58, %v280_v9  ;;  %v1718_v62 = vld [vmem:[%s7282_s4 + $0x278] sm:$0xff]  ;;  %v1724_v56 = vld [vmem:[%s7282_s4 + $0x2a8] sm:$0xff]  ;;  %v3959_v6 = vpack.c.bf16 %v1717_v50, %v1714_v3 }
 0x166   :  { %3922 = vmatprep.subr.bf16.mxu0 %v3921_v57  ;;  %v3955_v57 = vpack.c.bf16 %v1711_v8, %v1708_v42  ;;  %v3957_v0 = vpack.c.bf16 %v1718_v62, %v1715_v61  ;;  %v1720_v58 = vld [vmem:[%s7282_s4 + $0x288] sm:$0xff]  ;;  %v1763_v8 = vld [vmem:[%s7282_s4 + $0x3e0] sm:$0xff]  ;;  %v1762_v61 = vld [vmem:[%s7282_s4 + $0x3d8] sm:$0xff] }
 0x168   :  { %1470 = vmatmul.mubr.f32.gmra.mrb[6].mxu0 %v5605_v7  ;;  %v298_v7 = vld [vmem:[%s7279_s2 + $0x7d8] sm:$0xff] }
 0x169   :  { %3924 = vmatpush1.bf16.msra.mxu0 %v3923_v4  ;;  %1540 = vmatprep.mubr.f32.mxu0 %v4375_v15  ;;  %v3933_v2 = vpack.c.bf16 %v298_v7, %v292_v13  ;;  %v1726_v7 = vld [vmem:[%s7282_s4 + $0x2b8] sm:$0xff] }
 0x16a   :  { %3926 = vmatprep.subr.bf16.mxu0 %v3925_v5  ;;  %v1721_v5 = vld [vmem:[%s7282_s4 + $0x290] sm:$0xff] }
 0x16b   :  { %v3961_v9 = vpack.c.bf16 %v1724_v56, %v1721_v5 }
 0x16d   :  { %3928 = vmatpush1.bf16.msra.mxu0 %v3927_v1  ;;  %v1723_v1 = vld [vmem:[%s7282_s4 + $0x2a0] sm:$0xff] }
 0x16e   :  { %3930 = vmatprep.subr.bf16.mxu0 %v3929_v10  ;;  %v1727_v10 = vld [vmem:[%s7282_s4 + $0x2c0] sm:$0xff]  ;;  %v3963_v12 = vpack.c.bf16 %v1723_v1, %v1720_v58 }
 0x16f   :  { %v3965_v13 = vpack.c.bf16 %v1730_v11, %v1727_v10  ;;  %v1621_v11 = vlaneseq }
 0x171   :  { %3932 = vmatpush1.bf16.msra.mxu0 %v3931_v14  ;;  %v1729_v14 = vld [vmem:[%s7282_s4 + $0x2d0] sm:$0xff] }
 0x172   :  { %3934 = vmatprep.subr.bf16.mxu0 %v3933_v2  ;;  %v1733_v2 = vld [vmem:[%s7282_s4 + $0x2f0] sm:$0xff]  ;;  %v3967_v17 = vpack.c.bf16 %v1729_v14, %v1726_v7 }
 0x173   :  { %v3969_v18 = vpack.c.bf16 %v1736_v16, %v1733_v2 }
 0x175   :  { %3936 = vmatpush1.bf16.msra.mxu0 %v3935_v20  ;;  %v1735_v20 = vld [vmem:[%s7282_s4 + $0x300] sm:$0xff] }
 0x176   :  { %3938 = vmatprep.subr.bf16.mxu0 %v3937_v21  ;;  %v1739_v21 = vld [vmem:[%s7282_s4 + $0x320] sm:$0xff]  ;;  %v3971_v23 = vpack.c.bf16 %v1735_v20, %v1732_v19 }
 0x177   :  { %v3973_v25 = vpack.c.bf16 %v1742_v22, %v1739_v21 }
 0x179   :  { %3940 = vmatpush1.bf16.msra.mxu0 %v3939_v27  ;;  %v1741_v27 = vld [vmem:[%s7282_s4 + $0x330] sm:$0xff] }
 0x17a   :  { %3942 = vmatprep.subr.bf16.mxu0 %v3941_v29  ;;  %v3975_v29 = vpack.c.bf16 %v1741_v27, %v1738_v26 }
 0x17d   :  { %3944 = vmatpush1.bf16.msra.mxu0 %v3943_v35  ;;  %v1747_v35 = vld [vmem:[%s7282_s4 + $0x360] sm:$0xff] }
 0x17e   :  { %3946 = vmatprep.subr.bf16.mxu0 %v3945_v36  ;;  %v3979_v36 = vpack.c.bf16 %v1747_v35, %v1744_v34  ;;  %v1707_v34 = vld [vmem:[%s7282_s4 + $0x220] sm:$0xff] }
 0x181   :  { %3948 = vmatpush1.bf16.msra.mxu0 %v3947_v39  ;;  %v3981_v39 = vpack.c.bf16 %v1754_v38, %v1751_v37 }
 0x184   :  { %1541 = vmatmul.mubr.f32.vlgmr.msra.gmra.mrb[4].mxu0 %v5764_v24 }
 0x185   :  { %1546 = vmatprep.mubr.f32.mxu0 %v4375_v15 }
 0x188   :  { %1547 = vmatmul.mubr.f32.gmra.mrb[6].mxu0 %v5783_v32  ;;  %v1703_v32 = vld [vmem:[%s7282_s4 + $0x200] sm:$0xff] }
 0x189   :  { %v3949_v51 = vpack.c.bf16 %v1706_v47, %v1703_v32 }
 0x18b   :  { %3950 = vmatprep.subr.bf16.mxu1 %v3949_v51 }
 0x18c   :  { %3952 = vmatpush1.bf16.msra.mxu1 %v3951_v59 }
 0x18d   :  { %3954 = vmatprep.subr.bf16.mxu1 %v3953_v60 }
 0x190   :  { %3956 = vmatpush1.bf16.msra.mxu1 %v3955_v57 }
 0x191   :  { %3958 = vmatprep.subr.bf16.mxu1 %v3957_v0 }
 0x194   :  { %3960 = vmatpush1.bf16.msra.mxu1 %v3959_v6 }
 0x195   :  { %3962 = vmatprep.subr.bf16.mxu1 %v3961_v9 }
 0x198   :  { %3964 = vmatpush1.bf16.msra.mxu1 %v3963_v12  ;;  %v1622_v12 = vshrl.u32 %v1621_v11, 7  ;;  %v1643_v11 = vld [vmem:[%s7282_s4 + $0x20] sm:$0xff] }
 0x199   :  { %3966 = vmatprep.subr.bf16.mxu1 %v3965_v13 }
 0x19a   :  { %v1627_v13 = vsub.s32 1, %v1622_v12 }
 0x19c   :  { %3968 = vmatpush1.bf16.msra.mxu1 %v3967_v17 }
 0x19d   :  { %3970 = vmatprep.subr.bf16.mxu1 %v3969_v18 }
 0x1a0   :  { %3972 = vmatpush1.bf16.msra.mxu1 %v3971_v23 }
 0x1a1   :  { %3974 = vmatprep.subr.bf16.mxu1 %v3973_v25 }
 0x1a4   :  { %3976 = vmatpush1.bf16.msra.mxu1 %v3975_v29 }
 0x1a5   :  { %3978 = vmatprep.subr.bf16.mxu1 %v3977_v33  ;;  %v1704_v33 = vld [vmem:[%s7282_s4 + $0x208] sm:$0xff] }
 0x1a8   :  { %v6283_v40 = vpop.f32.mrb[0].mxu1  ;;  %3980 = vmatpush1.bf16.msra.mxu1 %v3979_v36 }
 0x1a9   :  { %v1390_v41 = vpop.f32.mrb[1].mxu1  ;;  %3982 = vmatprep.subr.bf16.mxu1 %v3981_v39 }
 0x1aa   :  { %1563 = vrot.lane.b32.xlu0 %v1390_v41, %s4376_s16  ;;  %v1750_v41 = vld [vmem:[%s7282_s4 + $0x378] sm:$0xff] }
 0x1ac   :  { %v6286_v43 = vpop.f32.mrb[2].mxu1 }
 0x1ad   :  { %v1396_v28 = vpop.f32.mrb[3].mxu1 }
 0x1ae   :  { %1571 = vrot.lane.b32.xlu1 %v1396_v28, %s4376_s16  ;;  %v1753_v28 = vld [vmem:[%s7282_s4 + $0x390] sm:$0xff] }
 0x1af   :  { %v3983_v32 = vpack.c.bf16 %v1753_v28, %v1750_v41  ;;  %v3990_v41 = vpack.c.bf16 %v1707_v34, %v1704_v33  ;;  %v1657_v33 = vld [vmem:[%s7282_s4 + $0x90] sm:$0xff]  ;;  %v1660_v34 = vld [vmem:[%s7282_s4 + $0xa8] sm:$0xff] }
 0x1b1   :  { %3984 = vmatpush1.bf16.msra.mxu1 %v3983_v32  ;;  %v1710_v32 = vld [vmem:[%s7282_s4 + $0x238] sm:$0xff] }
 0x1f7   :  { %v6289_v44 = vpop.f32.mrb[0].mxu0 }
 0x1f8   :  { %v6291_v45 = vpop.f32.mrb[1].mxu0 }
 0x1fb   :  { %v6293_v24 = vpop.f32.mrb[2].mxu0 }
 0x1fc   :  { %v6295_v46 = vpop.f32.mrb[3].mxu0 }
 0x21c   :  { %v1564_v47 = vpop.permute.xlu0 %1563 }
 0x220   :  { %v1572_v51 = vpop.permute.xlu1 %1571 }
 0x257   :  { %v1542_v49 = vpop.f32.mrb[4].mxu0 }
 0x258   :  { %1565 = vrot.lane.b32.xlu0 %v1542_v49, %s4376_s16  ;;  %v1544_v55 = vpop.f32.mrb[5].mxu0  ;;  %v1760_v49 = vld [vmem:[%s7282_s4 + $0x3c8] sm:$0xff] }
 0x259   :  { %1567 = vrot.lane.b32.xlu1 %v1544_v55, %s4376_s16  ;;  %v3985_v52 = vpack.c.bf16 %v1760_v49, %v1757_v48  ;;  %v3987_v55 = vpack.c.bf16 %v1759_v54, %v1756_v53  ;;  %v1722_v54 = vld [vmem:[%s7282_s4 + $0x298] sm:$0xff] }
 0x25b   :  { %v1548_v63 = vpop.f32.mrb[6].mxu0  ;;  %3986 = vmatprep.subr.bf16.mxu1 %v3985_v52  ;;  %v1719_v52 = vld [vmem:[%s7282_s4 + $0x280] sm:$0xff] }
 0x25c   :  { %1573 = vrot.lane.b32.xlu0 %v1548_v63, %s4376_s16  ;;  %v1550_v4 = vpop.f32.mrb[7].mxu0  ;;  %3988 = vmatpush1.bf16.msra.mxu1 %v3987_v55  ;;  %v1725_v55 = vld [vmem:[%s7282_s4 + $0x2b0] sm:$0xff] }
 0x25d   :  { %1575 = vrot.lane.b32.xlu1 %v1550_v4, %s4376_s16  ;;  %1823 = vmatprep.subr.mxu1 %v1763_v8  ;;  %v4378_v4 = vmov 0.0|0.0  }
 0x260   :  { %1561 = vrot.lane.b32.xlu0 %v6283_v40, %s4376_s16  ;;  %1824 = vmatpush1.msra.mxu1 %v1762_v61  ;;  %v1734_v61 = vld [vmem:[%s7282_s4 + $0x2f8] sm:$0xff] }
 0x261   :  { %1569 = vrot.lane.b32.xlu1 %v6286_v43, %s4376_s16  ;;  %3989 = vmatprep.subr.bf16.mxu1 %v4378_v4 }
 0x2ca   :  { %v1566_v59 = vpop.permute.xlu0 %1565 }
 0x2cb   :  { %v1579_v60 = vsel %vm1577_vm0, %v1564_v47, %v1566_v59  ;;  %v1568_v42 = vpop.permute.xlu1 %1567 }
 0x2cc   :  { %v1591_v62 = vmax.f32 %v6291_v45, %v1579_v60  ;;  %v1580_v57 = vsel %vm1577_vm0, %v1566_v59, %v1568_v42  ;;  %v3999_v59 = vpack.c.bf16 %v1725_v55, %v1722_v54  ;;  %v1728_v60 = vld [vmem:[%s7282_s4 + $0x2c8] sm:$0xff]  ;;  %v1731_v42 = vld [vmem:[%s7282_s4 + $0x2e0] sm:$0xff] }
 0x2cd   :  { %v1592_v63 = vmax.f32 %v6283_v40, %v1580_v57  ;;  %v4002_v8 = vpack.c.bf16 %v1731_v42, %v1728_v60  ;;  %v1679_v54 = vld [vmem:[%s7282_s4 + $0x140] sm:$0xff]  ;;  %v1678_v42 = vld [vmem:[%s7282_s4 + $0x138] sm:$0xff] }
 0x2ce   :  { %1600 = vrot.lane.b32.xlu0 %v1591_v62, %s4377_s0  ;;  %v1574_v0 = vpop.permute.xlu0 %1573  ;;  %v1675_v60 = vld [vmem:[%s7282_s4 + $0x120] sm:$0xff] }
 0x2cf   :  { %v1582_v3 = vsel %vm1577_vm0, %v1572_v51, %v1574_v0  ;;  %1602 = vrot.lane.b32.xlu1 %v1592_v63, %s4377_s0  ;;  %v1576_v50 = vpop.permute.xlu1 %1575  ;;  %v1740_v63 = vld [vmem:[%s7282_s4 + $0x328] sm:$0xff] }
 0x2d0   :  { %v1594_v5 = vmax.f32 %v6295_v46, %v1582_v3  ;;  %v1583_v45 = vsel %vm1577_vm0, %v1574_v0, %v1576_v50  ;;  %v1619_v46 = vld [vmem:[%s7283_s3] sm:$0x3]  ;;  %v1746_v50 = vld [vmem:[%s7282_s4 + $0x358] sm:$0xff]  ;;  %s4379_s3 = smov 96  }
 0x2d1   :  { %v1595_v56 = vmax.f32 %v6286_v43, %v1583_v45  ;;  %v1623_v43 = vsub.s32 0, %v1622_v12  ;;  %v1628_v14 = vrot.slane %v1619_v46, %v1627_v13  ;;  %v1743_v0 = vld [vmem:[%s7282_s4 + $0x340] sm:$0xff]  ;;  %v1642_v13 = vld [vmem:[%s7282_s4 + $0x18] sm:$0xff] }
 0x2d2   :  { %1604 = vrot.lane.b32.xlu0 %v1594_v5, %s4377_s0  ;;  %v1562_v6 = vpop.permute.xlu0 %1561  ;;  %v4008_v3 = vpack.c.bf16 %v1743_v0, %v1740_v63  ;;  %v1639_v12 = vld [vmem:[%s7282_s4] sm:$0xff]  ;;  %v1681_v63 = vld [vmem:[%s7282_s4 + $0x150] sm:$0xff]  ;;  %v1684_v0 = vld [vmem:[%s7282_s4 + $0x168] sm:$0xff] }
 0x2d3   :  { %v1578_v40 = vsel %vm1577_vm0, %v1562_v6, %v1564_v47  ;;  %1606 = vrot.lane.b32.xlu1 %v1595_v56, %s4377_s0  ;;  %v1570_v9 = vpop.permute.xlu1 %1569  ;;  %v1624_v2 = vrot.slane %v1619_v46, %v1623_v43  ;;  %v1713_v47 = vld [vmem:[%s7282_s4 + $0x250] sm:$0xff]  ;;  %v1752_v56 = vld [vmem:[%s7282_s4 + $0x388] sm:$0xff]  ;;  %v1755_v6 = vld [vmem:[%s7282_s4 + $0x3a0] sm:$0xff] }
 0x2d4   :  { %v1590_v58 = vmax.f32 %v6289_v44, %v1578_v40  ;;  %v1581_v1 = vsel %vm1577_vm0, %v1570_v9, %v1572_v51  ;;  %v3993_v49 = vpack.c.bf16 %v1713_v47, %v1710_v32  ;;  %v1716_v51 = vld [vmem:[%s7282_s4 + $0x268] sm:$0xff]  ;;  %v4014_v40 = vpack.c.bf16 %v1755_v6, %v1752_v56  ;;  %v1758_v9 = vld [vmem:[%s7282_s4 + $0x3b8] sm:$0xff]  ;;  %v1649_v43 = vld [vmem:[%s7282_s4 + $0x50] sm:$0xff] }
 0x2d5   :  { %v1593_v10 = vmax.f32 %v6293_v24, %v1581_v1  ;;  %v3996_v53 = vpack.c.bf16 %v1719_v52, %v1716_v51  ;;  %v1646_v46 = vld [vmem:[%s7282_s4 + $0x38] sm:$0xff]  ;;  %v1673_v47 = vld [vmem:[%s7282_s4 + $0x110] sm:$0xff]  ;;  %v1672_v52 = vld [vmem:[%s7282_s4 + $0x108] sm:$0xff] }
 0x2d6   :  { %v1670_v32 = vld [vmem:[%s7282_s4 + $0xf8] sm:$0xff]  ;;  %v1669_v51 = vld [vmem:[%s7282_s4 + $0xf0] sm:$0xff]  ;;  %v1687_v56 = vld [vmem:[%s7282_s4 + $0x180] sm:$0xff] }
 0x2d7   :  { %v4041_v55 = vpack.c.bf16 %v1672_v52, %v1669_v51  ;;  %v1690_v6 = vld [vmem:[%s7282_s4 + $0x198] sm:$0xff] }
 0x2d8   :  { %v2092_v52 = vld [vmem:[%s7282_s4 + $0x3f8] sm:$0xff] }
 0x340   :  { %v1601_v7 = vpop.permute.xlu0 %1600 }
 0x341   :  { %v1603_v16 = vpop.permute.xlu1 %1602 }
 0x342   :  { %v1609_v17 = vsel %vm1608_vm1, %v1601_v7, %v1603_v16  ;;  %v1616_v18 = vmax.f32 %v1591_v62, %v1603_v16  ;;  %v1737_v62 = vld [vmem:[%s7282_s4 + $0x310] sm:$0xff]  ;;  %v1764_v7 = vld [vmem:[%s7282_s4 + $0x3e8] sm:$0xff]  ;;  %v4023_v16 = vpack.c.bf16 %v1649_v43, %v1646_v46 }
 0x343   :  { %v1615_v44 = vmax.f32 %v1590_v58, %v1609_v17  ;;  %v4005_v57 = vpack.c.bf16 %v1737_v62, %v1734_v61  ;;  %v1761_v58 = vld [vmem:[%s7282_s4 + $0x3d0] sm:$0xff]  ;;  %v4045_v62 = vpack.c.bf16 %v1678_v42, %v1675_v60  ;;  %v1644_v43 = vld [vmem:[%s7282_s4 + $0x28] sm:$0xff]  ;;  %v2101_v60 = vld [vmem:[%s7282_s4 + $0x440] sm:$0xff] }
 0x344   :  { %v1632_v19 = vadd.f32 %v1628_v14, %v1616_v18  ;;  %v1605_v20 = vpop.permute.xlu0 %1604  ;;  %v4017_v1 = vpack.c.bf16 %v1761_v58, %v1758_v9  ;;  %v1645_v17 = vld [vmem:[%s7282_s4 + $0x30] sm:$0xff]  ;;  %v1648_v18 = vld [vmem:[%s7282_s4 + $0x48] sm:$0xff]  ;;  %v4053_v58 = vpack.c.bf16 %v1690_v6, %v1687_v56 }
 0x345   :  { %v1631_v21 = vadd.f32 %v1624_v2, %v1615_v44  ;;  %v1607_v24 = vpop.permute.xlu1 %1606  ;;  %v1652_v44 = vld [vmem:[%s7282_s4 + $0x68] sm:$0xff]  ;;  %v1685_v61 = vld [vmem:[%s7282_s4 + $0x170] sm:$0xff] }
 0x346   :  { %v1610_v22 = vsel %vm1608_vm1, %v1605_v20, %v1607_v24  ;;  %v1618_v23 = vmax.f32 %v1594_v5, %v1607_v24  ;;  %v6447_v26 = vmax.f32 %v1632_v19, 0.0  ;;  %v1749_v5 = vld [vmem:[%s7282_s4 + $0x370] sm:$0xff]  ;;  %v1655_v19 = vld [vmem:[%s7282_s4 + $0x80] sm:$0xff]  ;;  %v4025_v20 = vpack.c.bf16 %v1648_v18, %v1645_v17 }
 0x347   :  { %v1617_v25 = vmax.f32 %v1593_v10, %v1610_v22  ;;  %v6449_v29 = vmax.f32 %v1631_v21, 0.0  ;;  %v4011_v45 = vpack.c.bf16 %v1749_v5, %v1746_v50  ;;  %v1640_v10 = vld [vmem:[%s7282_s4 + $0x8] sm:$0xff]  ;;  %v4027_v21 = vpack.c.bf16 %v1655_v19, %v1652_v44  ;;  %v1651_v24 = vld [vmem:[%s7282_s4 + $0x60] sm:$0xff]  ;;  %v1654_v22 = vld [vmem:[%s7282_s4 + $0x78] sm:$0xff] }
 0x348   :  { %v1634_v27 = vadd.f32 %v1628_v14, %v1618_v23  ;;  %v1773_v36 = vrot.slane %v6447_v26, 1  ;;  %v4019_v14 = vpack.c.bf16 %v1643_v11, %v1640_v10  ;;  %v1658_v23 = vld [vmem:[%s7282_s4 + $0x98] sm:$0xff]  ;;  %v1691_v50 = vld [vmem:[%s7282_s4 + $0x1a0] sm:$0xff]  ;;  %v4049_v5 = vpack.c.bf16 %v1684_v0, %v1681_v63  ;;  %v1697_v9 = vld [vmem:[%s7282_s4 + $0x1d0] sm:$0xff] }
 0x349   :  { %v1633_v30 = vadd.f32 %v1624_v2, %v1617_v25  ;;  %v1770_v38 = vrot.slane %v6449_v29, 1  ;;  %v4021_v2 = vpack.c.bf16 %v1642_v13, %v1639_v12  ;;  %v1661_v25 = vld [vmem:[%s7282_s4 + $0xb0] sm:$0xff]  ;;  %v1696_v11 = vld [vmem:[%s7282_s4 + $0x1c8] sm:$0xff]  ;;  %v2100_v63 = vld [vmem:[%s7282_s4 + $0x438] sm:$0xff] }
 0x34a   :  { %v6451_v31 = vmax.f32 %v1634_v27, 0.0  ;;  %v4029_v27 = vpack.c.bf16 %v1654_v22, %v1651_v24  ;;  %v1693_v10 = vld [vmem:[%s7282_s4 + $0x1b0] sm:$0xff]  ;;  %v1700_v13 = vld [vmem:[%s7282_s4 + $0x1e8] sm:$0xff]  ;;  %v2104_v0 = vld [vmem:[%s7282_s4 + $0x458] sm:$0xff] }
 0x34b   :  { %v6459_v35 = vmax.f32 %v1633_v30, 0.0  ;;  %v4031_v30 = vpack.c.bf16 %v1661_v25, %v1658_v23  ;;  %v4057_v12 = vpack.c.bf16 %v1696_v11, %v1693_v10  ;;  %v1641_v46 = vld [vmem:[%s7282_s4 + $0x10] sm:$0xff]  ;;  %v1656_v44 = vld [vmem:[%s7282_s4 + $0x88] sm:$0xff]  ;;  %v2109_v10 = vld [vmem:[%s7282_s4 + $0x480] sm:$0xff] }
 0x34c   :  { %v6463_v37 = vrot.slane %v6451_v31, 1  ;;  %v1653_v18 = vld [vmem:[%s7282_s4 + $0x70] sm:$0xff]  ;;  %v1668_v23 = vld [vmem:[%s7282_s4 + $0xe8] sm:$0xff]  ;;  %v2112_v11 = vld [vmem:[%s7282_s4 + $0x498] sm:$0xff] }
 0x34d   :  { %v6467_v39 = vrot.slane %v6459_v35, 1  ;;  %v4066_v19 = vpack.c.bf16 %v1656_v44, %v1653_v18  ;;  %v1665_v22 = vld [vmem:[%s7282_s4 + $0xd0] sm:$0xff]  ;;  %v2121_v44 = vld [vmem:[%s7282_s4 + $0x4e0] sm:$0xff] }
 0x34e   :  { %v1775_v28 = vsel %vm1769_vm2, %v1773_v36, %v6463_v37  ;;  %v1664_v36 = vld [vmem:[%s7282_s4 + $0xc8] sm:$0xff]  ;;  %v4072_v25 = vpack.c.bf16 %v1668_v23, %v1665_v22  ;;  %v1701_v42 = vld [vmem:[%s7282_s4 + $0x1f0] sm:$0xff] }
 0x34f   :  { %3079 = vmatprep.mubr.msk.f32.mxu1 %vm1778_vm3, %v1775_v28  ;;  %v6480_v48 = vsel %vm1769_vm2, %v1770_v38, %v6467_v39  ;;  %v4033_v38 = vpack.c.bf16 %v1660_v34, %v1657_v33  ;;  %v1677_v34 = vld [vmem:[%s7282_s4 + $0x130] sm:$0xff] }
 0x350   :  { %1848 = vmatmul.mubr.f32.vlgmr.msra.gmra.mrb[4].mxu1 %v6480_v48  ;;  %v2103_v6 = vld [vmem:[%s7282_s4 + $0x450] sm:$0xff] }
 0x351   :  { %3991 = vmatpush1.bf16.msra.mxu1 %v3990_v41  ;;  %3080 = vmatprep.mubr.msk.f32.mxu1 %vm1778_vm3, %v6463_v37  ;;  %v1663_v41 = vld [vmem:[%s7282_s4 + $0xc0] sm:$0xff]  ;;  %v2127_v23 = vld [vmem:[%s7282_s4 + $0x510] sm:$0xff] }
 0x352   :  { %3992 = vmatprep.subr.bf16.mxu1 %v4378_v4 }
 0x354   :  { %1854 = vmatmul.mubr.f32.gmra.mrb[6].mxu1 %v6467_v39 }
 0x355   :  { %3994 = vmatpush1.bf16.msra.mxu1 %v3993_v49  ;;  %3081 = vmatprep.mubr.msk.f32.mxu1 %vm1778_vm3, %v1775_v28  ;;  %v1666_v28 = vld [vmem:[%s7282_s4 + $0xd8] sm:$0xff]  ;;  %v4039_v49 = vpack.c.bf16 %v1673_v47, %v1670_v32  ;;  %v1692_v32 = vld [vmem:[%s7282_s4 + $0x1a8] sm:$0xff] }
 0x356   :  { %3995 = vmatprep.subr.bf16.mxu1 %v4378_v4 }
 0x359   :  { %3997 = vmatpush1.bf16.msra.mxu1 %v3996_v53  ;;  %v1676_v53 = vld [vmem:[%s7282_s4 + $0x128] sm:$0xff] }
 0x35a   :  { %3998 = vmatprep.subr.bf16.mxu1 %v4378_v4 }
 0x35d   :  { %4000 = vmatpush1.bf16.msra.mxu1 %v3999_v59  ;;  %v4043_v59 = vpack.c.bf16 %v1679_v54, %v1676_v53  ;;  %v2095_v53 = vld [vmem:[%s7282_s4 + $0x410] sm:$0xff] }
 0x35e   :  { %4001 = vmatprep.subr.bf16.mxu1 %v4378_v4  ;;  %v2091_v54 = vld [vmem:[%s7282_s4 + $0x3f0] sm:$0xff] }
 0x361   :  { %4003 = vmatpush1.bf16.msra.mxu1 %v4002_v8  ;;  %v1682_v8 = vld [vmem:[%s7282_s4 + $0x158] sm:$0xff] }
 0x362   :  { %4004 = vmatprep.subr.bf16.mxu1 %v4378_v4 }
 0x365   :  { %4006 = vmatpush1.bf16.msra.mxu1 %v4005_v57  ;;  %v4047_v57 = vpack.c.bf16 %v1685_v61, %v1682_v8  ;;  %v4089_v8 = vpack.c.bf16 %v2095_v53, %v2092_v52  ;;  %v2145_v53 = vld [vmem:[%s7282_s4 + $0x5a0] sm:$0xff] }
 0x366   :  { %4007 = vmatprep.subr.bf16.mxu1 %v4378_v4 }
 0x369   :  { %4009 = vmatpush1.bf16.msra.mxu1 %v4008_v3  ;;  %v1688_v3 = vld [vmem:[%s7282_s4 + $0x188] sm:$0xff] }
 0x36a   :  { %4010 = vmatprep.subr.bf16.mxu1 %v4378_v4 }
 0x36d   :  { %4012 = vmatpush1.bf16.msra.mxu1 %v4011_v45  ;;  %v4051_v45 = vpack.c.bf16 %v1691_v50, %v1688_v3  ;;  %v2107_v3 = vld [vmem:[%s7282_s4 + $0x470] sm:$0xff]  ;;  %v6792_v50 = vrot.slane %v6451_v31, 2 }
 0x36e   :  { %4013 = vmatprep.subr.bf16.mxu1 %v4378_v4  ;;  %v4097_v56 = vpack.c.bf16 %v2107_v3, %v2104_v0  ;;  %v2102_v0 = vld [vmem:[%s7282_s4 + $0x448] sm:$0xff]  ;;  %v2105_v3 = vld [vmem:[%s7282_s4 + $0x460] sm:$0xff] }
 0x371   :  { %4015 = vmatpush1.bf16.msra.mxu1 %v4014_v40  ;;  %v1694_v40 = vld [vmem:[%s7282_s4 + $0x1b8] sm:$0xff] }
 0x372   :  { %4016 = vmatprep.subr.bf16.mxu1 %v4378_v4 }
 0x375   :  { %4018 = vmatpush1.bf16.msra.mxu1 %v4017_v1  ;;  %v4055_v1 = vpack.c.bf16 %v1697_v9, %v1694_v40  ;;  %v2106_v40 = vld [vmem:[%s7282_s4 + $0x468] sm:$0xff] }
 0x376   :  { %1900 = vmatprep.subr.mxu1 %v4375_v15  ;;  %v2110_v9 = vld [vmem:[%s7282_s4 + $0x488] sm:$0xff] }
 0x379   :  { %1901 = vmatpush1.msra.mxu1 %v1764_v7  ;;  %v1699_v7 = vld [vmem:[%s7282_s4 + $0x1e0] sm:$0xff] }
 0x37a   :  { %1925 = vmatmul.mubr.f32.vlgmr.msra.gmra.mrb[8].mxu1 %v6480_v48  ;;  %4020 = vmatprep.subr.bf16.mxu1 %v4019_v14  ;;  %v4037_v48 = vpack.c.bf16 %v1666_v28, %v1663_v41  ;;  %v4060_v14 = vpack.c.bf16 %v1644_v43, %v1641_v46  ;;  %v1689_v28 = vld [vmem:[%s7282_s4 + $0x190] sm:$0xff]  ;;  %v4103_v46 = vpack.c.bf16 %v2112_v11, %v2109_v10  ;;  %v2129_v11 = vld [vmem:[%s7282_s4 + $0x520] sm:$0xff] }
 0x37b   :  { %3082 = vmatprep.mubr.msk.f32.mxu1 %vm1778_vm3, %v6463_v37  ;;  %4022 = vmatpush1.bf16.msra.mxu1 %v4021_v2  ;;  %v1667_v37 = vld [vmem:[%s7282_s4 + $0xe0] sm:$0xff]  ;;  %v4084_v47 = vpack.c.bf16 %v1692_v32, %v1689_v28  ;;  %v2139_v32 = vld [vmem:[%s7282_s4 + $0x570] sm:$0xff] }
 0x37c   :  { %4024 = vmatprep.subr.bf16.mxu1 %v4023_v16  ;;  %v1647_v2 = vld [vmem:[%s7282_s4 + $0x40] sm:$0xff]  ;;  %v1650_v16 = vld [vmem:[%s7282_s4 + $0x58] sm:$0xff] }
 0x37d   :  { %v4063_v17 = vpack.c.bf16 %v1650_v16, %v1647_v2  ;;  %v2122_v2 = vld [vmem:[%s7282_s4 + $0x4e8] sm:$0xff]  ;;  %v2125_v16 = vld [vmem:[%s7282_s4 + $0x500] sm:$0xff] }
 0x37e   :  { %1930 = vmatmul.mubr.f32.gmra.mrb[10].mxu1 %v6467_v39  ;;  %v4035_v39 = vpack.c.bf16 %v1667_v37, %v1664_v36  ;;  %v1680_v36 = vld [vmem:[%s7282_s4 + $0x148] sm:$0xff]  ;;  %v4109_v18 = vpack.c.bf16 %v2125_v16, %v2122_v2  ;;  %v2144_v2 = vld [vmem:[%s7282_s4 + $0x598] sm:$0xff] }
 0x37f   :  { %4026 = vmatpush1.bf16.msra.mxu1 %v4025_v20  ;;  %3083 = vmatprep.mubr.msk.f32.mxu1 %vm1778_vm3, %v6447_v26  ;;  %v1659_v20 = vld [vmem:[%s7282_s4 + $0xa0] sm:$0xff]  ;;  %v4078_v37 = vpack.c.bf16 %v1680_v36, %v1677_v34 }
 0x380   :  { %4028 = vmatprep.subr.bf16.mxu1 %v4027_v21  ;;  %v1662_v21 = vld [vmem:[%s7282_s4 + $0xb8] sm:$0xff]  ;;  %v2133_v36 = vld [vmem:[%s7282_s4 + $0x540] sm:$0xff] }
 0x381   :  { %v4069_v24 = vpack.c.bf16 %v1662_v21, %v1659_v20  ;;  %v2128_v20 = vld [vmem:[%s7282_s4 + $0x518] sm:$0xff]  ;;  %v2131_v21 = vld [vmem:[%s7282_s4 + $0x530] sm:$0xff] }
 0x382   :  { %v4113_v22 = vpack.c.bf16 %v2131_v21, %v2128_v20 }
 0x383   :  { %4030 = vmatpush1.bf16.msra.mxu1 %v4029_v27  ;;  %v1671_v27 = vld [vmem:[%s7282_s4 + $0x100] sm:$0xff] }
 0x384   :  { %4032 = vmatprep.subr.bf16.mxu1 %v4031_v30  ;;  %v1674_v30 = vld [vmem:[%s7282_s4 + $0x118] sm:$0xff] }
 0x385   :  { %v4075_v33 = vpack.c.bf16 %v1674_v30, %v1671_v27  ;;  %v2134_v27 = vld [vmem:[%s7282_s4 + $0x548] sm:$0xff]  ;;  %v2137_v30 = vld [vmem:[%s7282_s4 + $0x560] sm:$0xff] }
 0x386   :  { %v4117_v34 = vpack.c.bf16 %v2137_v30, %v2134_v27  ;;  %v2383_v27 = vld [vmem:[%s7284_s6 + $0x18] sm:$0xff] }
 0x387   :  { %4034 = vmatpush1.bf16.msra.mxu1 %v4033_v38  ;;  %v1683_v38 = vld [vmem:[%s7282_s4 + $0x160] sm:$0xff] }
 0x388   :  { %4036 = vmatprep.subr.bf16.mxu1 %v4035_v39  ;;  %v1686_v39 = vld [vmem:[%s7282_s4 + $0x178] sm:$0xff] }
 0x389   :  { %v4081_v41 = vpack.c.bf16 %v1686_v39, %v1683_v38  ;;  %v2140_v38 = vld [vmem:[%s7282_s4 + $0x578] sm:$0xff]  ;;  %v2143_v39 = vld [vmem:[%s7282_s4 + $0x590] sm:$0xff] }
 0x38a   :  { %v4121_v28 = vpack.c.bf16 %v2143_v39, %v2140_v38  ;;  %v2384_v38 = vld [vmem:[%s7284_s6 + $0x20] sm:$0xff]  ;;  %v2385_v39 = vld [vmem:[%s7284_s6 + $0x28] sm:$0xff] }
 0x38b   :  { %4038 = vmatpush1.bf16.msra.mxu1 %v4037_v48  ;;  %v1695_v48 = vld [vmem:[%s7282_s4 + $0x1c0] sm:$0xff] }
 0x38c   :  { %4040 = vmatprep.subr.bf16.mxu1 %v4039_v49  ;;  %v1698_v49 = vld [vmem:[%s7282_s4 + $0x1d8] sm:$0xff] }
 0x38d   :  { %v4087_v51 = vpack.c.bf16 %v1698_v49, %v1695_v48  ;;  %v2146_v48 = vld [vmem:[%s7282_s4 + $0x5a8] sm:$0xff]  ;;  %v2149_v49 = vld [vmem:[%s7282_s4 + $0x5c0] sm:$0xff] }
 0x38e   :  { %v4125_v52 = vpack.c.bf16 %v2149_v49, %v2146_v48  ;;  %v2388_v48 = vld [vmem:[%s7284_s6 + $0x40] sm:$0xff]  ;;  %v2389_v49 = vld [vmem:[%s7284_s6 + $0x48] sm:$0xff] }
 0x38f   :  { %4042 = vmatpush1.bf16.msra.mxu1 %v4041_v55  ;;  %v2094_v55 = vld [vmem:[%s7282_s4 + $0x408] sm:$0xff] }
 0x390   :  { %4044 = vmatprep.subr.bf16.mxu1 %v4043_v59  ;;  %v2098_v59 = vld [vmem:[%s7282_s4 + $0x428] sm:$0xff]  ;;  %v4091_v61 = vpack.c.bf16 %v2094_v55, %v2091_v54  ;;  %v2148_v54 = vld [vmem:[%s7282_s4 + $0x5b8] sm:$0xff] }
 0x391   :  { %v4127_v55 = vpack.c.bf16 %v2148_v54, %v2145_v53  ;;  %v2480_v53 = vld [vmem:[%s7284_s6 + $0x50] sm:$0xff]  ;;  %v2481_v54 = vld [vmem:[%s7284_s6 + $0x58] sm:$0xff] }
 0x393   :  { %4046 = vmatpush1.bf16.msra.mxu1 %v4045_v62  ;;  %v4093_v62 = vpack.c.bf16 %v2101_v60, %v2098_v59  ;;  %v2152_v59 = vld [vmem:[%s7282_s4 + $0x5d8] sm:$0xff]  ;;  %v2093_v60 = vld [vmem:[%s7282_s4 + $0x400] sm:$0xff] }
 0x394   :  { %4048 = vmatprep.subr.bf16.mxu1 %v4047_v57  ;;  %v2097_v57 = vld [vmem:[%s7282_s4 + $0x420] sm:$0xff] }
 0x397   :  { %4050 = vmatpush1.bf16.msra.mxu1 %v4049_v5  ;;  %v4095_v5 = vpack.c.bf16 %v2100_v63, %v2097_v57  ;;  %v2099_v63 = vld [vmem:[%s7282_s4 + $0x430] sm:$0xff] }
 0x398   :  { %4052 = vmatprep.subr.bf16.mxu1 %v4051_v45  ;;  %v2158_v45 = vrot.slane %v6447_v26, 2 }
 0x39b   :  { %4054 = vmatpush1.bf16.msra.mxu1 %v4053_v58  ;;  %v4099_v58 = vpack.c.bf16 %v2106_v40, %v2103_v6  ;;  %v2114_v6 = vld [vmem:[%s7282_s4 + $0x4a8] sm:$0xff] }
 0x39c   :  { %4056 = vmatprep.subr.bf16.mxu1 %v4055_v1 }
 0x39f   :  { %4058 = vmatpush1.bf16.msra.mxu1 %v4057_v12  ;;  %v2116_v12 = vld [vmem:[%s7282_s4 + $0x4b8] sm:$0xff] }
 0x3a0   :  { %1979 = vmatprep.subr.mxu1 %v1700_v13  ;;  %v2119_v13 = vld [vmem:[%s7282_s4 + $0x4d0] sm:$0xff] }
 0x3a1   :  { %v4105_v43 = vpack.c.bf16 %v2119_v13, %v2116_v12  ;;  %v2132_v12 = vld [vmem:[%s7282_s4 + $0x538] sm:$0xff] }
 0x3a2   :  { %v4148_v13 = vpack.c.bf16 %v2132_v12, %v2129_v11  ;;  %v2874_v12 = vld [vmem:[%s7285_s8 + $0x50] sm:$0xff] }
 0x3a3   :  { %1980 = vmatpush1.msra.mxu1 %v1699_v7  ;;  %v2115_v7 = vld [vmem:[%s7282_s4 + $0x4b0] sm:$0xff] }
 0x3a4   :  { %2004 = vmatmul.mubr.f32.vlgmr.msra.gmra.mrb[4].mxu1 %v6449_v29  ;;  %4059 = vmatprep.subr.bf16.mxu1 %v4378_v4 }
 0x3a5   :  { %3084 = vmatprep.mubr.msk.f32.mxu1 %vm1778_vm3, %v6451_v31  ;;  %4061 = vmatpush1.bf16.msra.mxu1 %v4060_v14  ;;  %v2118_v14 = vld [vmem:[%s7282_s4 + $0x4c8] sm:$0xff] }
 0x3a6   :  { %4062 = vmatprep.subr.bf16.mxu1 %v4378_v4 }
 0x3a8   :  { %2010 = vmatmul.mubr.f32.gmra.mrb[6].mxu1 %v6459_v35 }
 0x3a9   :  { %4064 = vmatpush1.bf16.msra.mxu1 %v4063_v17  ;;  %3085 = vmatprep.mubr.msk.f32.mxu1 %vm1778_vm3, %v6447_v26  ;;  %v6812_v26 = vsel %vm2154_vm4, %v2158_v45, %v6792_v50  ;;  %v4107_v17 = vpack.c.bf16 %v2118_v14, %v2115_v7  ;;  %v2141_v14 = vld [vmem:[%s7282_s4 + $0x580] sm:$0xff] }
 0x3aa   :  { %4065 = vmatprep.subr.bf16.mxu1 %v4378_v4  ;;  %v4154_v16 = vpack.c.bf16 %v2144_v2, %v2141_v14  ;;  %v3091_v14 = vld [vmem:[%s7286_s5] ss:$0 sm:$0xff] }
 0x3ad   :  { %4067 = vmatpush1.bf16.msra.mxu1 %v4066_v19  ;;  %v2124_v19 = vld [vmem:[%s7282_s4 + $0x4f8] sm:$0xff] }
 0x3ae   :  { %4068 = vmatprep.subr.bf16.mxu1 %v4378_v4 }
 0x3b1   :  { %4070 = vmatpush1.bf16.msra.mxu1 %v4069_v24  ;;  %v4111_v24 = vpack.c.bf16 %v2124_v19, %v2121_v44  ;;  %v2153_v19 = vld [vmem:[%s7282_s4 + $0x5e0] sm:$0xff] }
 0x3b2   :  { %4071 = vmatprep.subr.bf16.mxu1 %v4378_v4 }
 0x3b5   :  { %4073 = vmatpush1.bf16.msra.mxu1 %v4072_v25  ;;  %v2130_v25 = vld [vmem:[%s7282_s4 + $0x528] sm:$0xff] }
 0x3b6   :  { %4074 = vmatprep.subr.bf16.mxu1 %v4378_v4 }
 0x3b9   :  { %4076 = vmatpush1.bf16.msra.mxu1 %v4075_v33  ;;  %v4115_v33 = vpack.c.bf16 %v2130_v25, %v2127_v23  ;;  %v2381_v23 = vld [vmem:[%s7284_s6 + $0x8] sm:$0xff] }
 0x3ba   :  { %4077 = vmatprep.subr.bf16.mxu1 %v4378_v4 }
 0x3bd   :  { %4079 = vmatpush1.bf16.msra.mxu1 %v4078_v37  ;;  %v2136_v37 = vld [vmem:[%s7282_s4 + $0x558] sm:$0xff] }
 0x3be   :  { %4080 = vmatprep.subr.bf16.mxu1 %v4378_v4 }
 0x3c1   :  { %4082 = vmatpush1.bf16.msra.mxu1 %v4081_v41  ;;  %v4119_v41 = vpack.c.bf16 %v2136_v37, %v2133_v36 }
 0x3c2   :  { %4083 = vmatprep.subr.bf16.mxu1 %v4378_v4 }
 0x3c5   :  { %4085 = vmatpush1.bf16.msra.mxu1 %v4084_v47  ;;  %v2142_v47 = vld [vmem:[%s7282_s4 + $0x588] sm:$0xff] }
 0x3c6   :  { %4086 = vmatprep.subr.bf16.mxu1 %v4378_v4 }
 0x3c9   :  { %4088 = vmatpush1.bf16.msra.mxu1 %v4087_v51  ;;  %v4123_v51 = vpack.c.bf16 %v2142_v47, %v2139_v32  ;;  %v2387_v32 = vld [vmem:[%s7284_s6 + $0x38] sm:$0xff] }
 0x3ca   :  { %2056 = vmatprep.subr.mxu1 %v4375_v15 }
 0x3cd   :  { %2057 = vmatpush1.msra.mxu1 %v1701_v42  ;;  %v2096_v42 = vld [vmem:[%s7282_s4 + $0x418] sm:$0xff] }
 0x3ce   :  { %2081 = vmatmul.mubr.f32.vlgmr.msra.gmra.mrb[8].mxu1 %v6449_v29  ;;  %4090 = vmatprep.subr.bf16.mxu1 %v4089_v8  ;;  %v6904_v8 = vrot.slane %v6459_v35, 2  ;;  %v4130_v57 = vpack.c.bf16 %v2096_v42, %v2093_v60 }
 0x3cf   :  { %3086 = vmatprep.mubr.msk.f32.mxu1 %vm1778_vm3, %v6451_v31  ;;  %4092 = vmatpush1.bf16.msra.mxu1 %v4091_v61  ;;  %v2113_v31 = vld [vmem:[%s7282_s4 + $0x4a0] sm:$0xff]  ;;  %v2151_v61 = vld [vmem:[%s7282_s4 + $0x5d0] sm:$0xff] }
 0x3d0   :  { %4094 = vmatprep.subr.bf16.mxu1 %v4093_v62  ;;  %v4101_v1 = vpack.c.bf16 %v2113_v31, %v2110_v9  ;;  %v2155_v62 = vrot.slane %v6449_v29, 2  ;;  %v4133_v29 = vpack.c.bf16 %v2102_v0, %v2099_v63  ;;  %v2117_v9 = vld [vmem:[%s7282_s4 + $0x4c0] sm:$0xff]  ;;  %v2120_v31 = vld [vmem:[%s7282_s4 + $0x4d8] sm:$0xff] }
 0x3d2   :  { %2086 = vmatmul.mubr.f32.gmra.mrb[10].mxu1 %v6459_v35  ;;  %v2157_v35 = vsel %vm2154_vm4, %v2155_v62, %v6904_v8 }
 0x3d3   :  { %4096 = vmatpush1.bf16.msra.mxu1 %v4095_v5  ;;  %3087 = vmatprep.mubr.msk.f32.mxu1 %vm1778_vm3, %v6812_v26  ;;  %v2108_v5 = vld [vmem:[%s7282_s4 + $0x478] sm:$0xff] }
 0x3d4   :  { %4098 = vmatprep.subr.bf16.mxu1 %v4097_v56  ;;  %v4136_v45 = vpack.c.bf16 %v2108_v5, %v2105_v3  ;;  %v2111_v56 = vld [vmem:[%s7282_s4 + $0x490] sm:$0xff] }
 0x3d5   :  { %v4139_v40 = vpack.c.bf16 %v2114_v6, %v2111_v56  ;;  %v2866_v3 = vld [vmem:[%s7285_s8 + $0x10] sm:$0xff]  ;;  %v2868_v6 = vld [vmem:[%s7285_s8 + $0x20] sm:$0xff] }
 0x3d7   :  { %4100 = vmatpush1.bf16.msra.mxu1 %v4099_v58  ;;  %v2123_v58 = vld [vmem:[%s7282_s4 + $0x4f0] sm:$0xff] }
 0x3d8   :  { %4102 = vmatprep.subr.bf16.mxu1 %v4101_v1  ;;  %v2126_v1 = vld [vmem:[%s7282_s4 + $0x508] sm:$0xff] }
 0x3d9   :  { %v4145_v10 = vpack.c.bf16 %v2126_v1, %v2123_v58  ;;  %v2872_v1 = vld [vmem:[%s7285_s8 + $0x40] sm:$0xff] }
 0x3db   :  { %4104 = vmatpush1.bf16.msra.mxu1 %v4103_v46  ;;  %v2135_v46 = vld [vmem:[%s7282_s4 + $0x550] sm:$0xff] }
 0x3dc   :  { %4106 = vmatprep.subr.bf16.mxu1 %v4105_v43  ;;  %v2138_v43 = vld [vmem:[%s7282_s4 + $0x568] sm:$0xff] }
 0x3dd   :  { %v4151_v7 = vpack.c.bf16 %v2138_v43, %v2135_v46 }
 0x3df   :  { %4108 = vmatpush1.bf16.msra.mxu1 %v4107_v17  ;;  %v2147_v17 = vld [vmem:[%s7282_s4 + $0x5b0] sm:$0xff] }
 0x3e0   :  { %4110 = vmatprep.subr.bf16.mxu1 %v4109_v18  ;;  %v2150_v18 = vld [vmem:[%s7282_s4 + $0x5c8] sm:$0xff] }
 0x3e1   :  { %v4157_v44 = vpack.c.bf16 %v2150_v18, %v2147_v17 }
 0x3e3   :  { %4112 = vmatpush1.bf16.msra.mxu1 %v4111_v24 }
 0x3e4   :  { %4114 = vmatprep.subr.bf16.mxu1 %v4113_v22  ;;  %v2380_v22 = vld [vmem:[%s7284_s6] sm:$0xff] }
 0x3e5   :  { %v4159_v25 = vpack.c.bf16 %v2381_v23, %v2380_v22  ;;  %v2483_v22 = vld [vmem:[%s7284_s6 + $0x68] sm:$0xff] }
 0x3e7   :  { %4116 = vmatpush1.bf16.msra.mxu1 %v4115_v33  ;;  %4160 = vmatprep.subr.bf16.mxu0 %v4159_v25 }
 0x3e8   :  { %4118 = vmatprep.subr.bf16.mxu1 %v4117_v34  ;;  %4162 = vmatpush3.bf16.msra.mxu0 %v4159_v25 }
 0x3eb   :  { %4120 = vmatpush1.bf16.msra.mxu1 %v4119_v41  ;;  %v4167_v41 = vpack.c.bf16 %v2385_v39, %v2384_v38  ;;  %v2486_v38 = vld [vmem:[%s7284_s6 + $0x80] sm:$0xff]  ;;  %v2487_v39 = vld [vmem:[%s7284_s6 + $0x88] sm:$0xff] }
 0x3ec   :  { %4122 = vmatprep.subr.bf16.mxu1 %v4121_v28  ;;  %v2386_v28 = vld [vmem:[%s7284_s6 + $0x30] sm:$0xff] }
 0x3ed   :  { %v4171_v47 = vpack.c.bf16 %v2387_v32, %v2386_v28  ;;  %v2488_v28 = vld [vmem:[%s7284_s6 + $0x90] sm:$0xff]  ;;  %v2489_v32 = vld [vmem:[%s7284_s6 + $0x98] sm:$0xff] }
 0x3ef   :  { %4124 = vmatpush1.bf16.msra.mxu1 %v4123_v51  ;;  %v4175_v51 = vpack.c.bf16 %v2389_v49, %v2388_v48  ;;  %v2574_v48 = vld [vmem:[%s7284_s6 + $0xa0] sm:$0xff]  ;;  %v2575_v49 = vld [vmem:[%s7284_s6 + $0xa8] sm:$0xff] }
 0x3f0   :  { %4126 = vmatprep.subr.bf16.mxu1 %v4125_v52 }
 0x3f3   :  { %4128 = vmatpush1.bf16.msra.mxu1 %v4127_v55 }
 0x3f4   :  { %2207 = vmatprep.subr.mxu1 %v2152_v59  ;;  %v7024_v59 = vpack.c.bf16 %v2481_v54, %v2480_v53  ;;  %v2577_v53 = vld [vmem:[%s7284_s6 + $0xb8] sm:$0xff] }
 0x3f7   :  { %2208 = vmatpush1.msra.mxu1 %v2151_v61 }
 0x3f8   :  { %2232 = vmatmul.mubr.f32.vlgmr.msra.gmra.mrb[4].mxu1 %v2157_v35  ;;  %4129 = vmatprep.subr.bf16.mxu1 %v4378_v4 }
 0x3f9   :  { %3088 = vmatprep.mubr.msk.f32.mxu1 %vm1778_vm3, %v6792_v50  ;;  %4131 = vmatpush1.bf16.msra.mxu1 %v4130_v57 }
 0x3fa   :  { %4132 = vmatprep.subr.bf16.mxu1 %v4378_v4 }
 0x3fc   :  { %2238 = vmatmul.mubr.f32.gmra.mrb[6].mxu1 %v6904_v8 }
 0x3fd   :  { %4134 = vmatpush1.bf16.msra.mxu1 %v4133_v29  ;;  %3089 = vmatprep.mubr.msk.f32.mxu1 %vm1778_vm3, %v6812_v26  ;;  %v4142_v26 = vpack.c.bf16 %v2120_v31, %v2117_v9  ;;  %v2865_v29 = vld [vmem:[%s7285_s8 + $0x8] sm:$0xff]  ;;  %v2870_v31 = vld [vmem:[%s7285_s8 + $0x30] sm:$0xff] }
 0x3fe   :  { %4135 = vmatprep.subr.bf16.mxu1 %v4378_v4 }
 0x401   :  { %4137 = vmatpush1.bf16.msra.mxu1 %v4136_v45  ;;  %v2867_v45 = vld [vmem:[%s7285_s8 + $0x18] sm:$0xff] }
 0x402   :  { %4138 = vmatprep.subr.bf16.mxu1 %v4378_v4  ;;  %v4263_v56 = vpack.c.bf16 %v2867_v45, %v2866_v3  ;;  %v2668_v3 = vld [vmem:[%s7284_s6 + $0xf0] sm:$0xff] }
 0x405   :  { %4140 = vmatpush1.bf16.msra.mxu1 %v4139_v40  ;;  %v2869_v40 = vld [vmem:[%s7285_s8 + $0x28] sm:$0xff] }
 0x406   :  { %4141 = vmatprep.subr.bf16.mxu1 %v4378_v4  ;;  %v4267_v9 = vpack.c.bf16 %v2869_v40, %v2868_v6  ;;  %v2671_v6 = vld [vmem:[%s7284_s6 + $0x108] sm:$0xff] }
 0x409   :  { %4143 = vmatpush1.bf16.msra.mxu1 %v4142_v26  ;;  %v2871_v26 = vld [vmem:[%s7285_s8 + $0x38] sm:$0xff] }
 0x40a   :  { %4144 = vmatprep.subr.bf16.mxu1 %v4378_v4  ;;  %v4271_v58 = vpack.c.bf16 %v2871_v26, %v2870_v31  ;;  %v2672_v26 = vld [vmem:[%s7284_s6 + $0x110] sm:$0xff] }
 0x40d   :  { %4146 = vmatpush1.bf16.msra.mxu1 %v4145_v10  ;;  %v2873_v10 = vld [vmem:[%s7285_s8 + $0x48] sm:$0xff] }
 0x40e   :  { %4147 = vmatprep.subr.bf16.mxu1 %v4378_v4  ;;  %v4275_v11 = vpack.c.bf16 %v2873_v10, %v2872_v1 }
 0x411   :  { %4149 = vmatpush1.bf16.msra.mxu1 %v4148_v13  ;;  %v2875_v13 = vld [vmem:[%s7285_s8 + $0x58] sm:$0xff] }
 0x412   :  { %4150 = vmatprep.subr.bf16.mxu1 %v4378_v4  ;;  %v4279_v46 = vpack.c.bf16 %v2875_v13, %v2874_v12  ;;  %v2675_v12 = vld [vmem:[%s7284_s6 + $0x128] sm:$0xff] }
 0x415   :  { %4152 = vmatpush1.bf16.msra.mxu1 %v4151_v7 }
 0x416   :  { %4153 = vmatprep.subr.bf16.mxu1 %v4378_v4 }
 0x419   :  { %4155 = vmatpush1.bf16.msra.mxu1 %v4154_v16 }
 0x41a   :  { %4156 = vmatprep.subr.bf16.mxu1 %v4378_v4 }
 0x41d   :  { %4158 = vmatpush1.bf16.msra.mxu1 %v4157_v44 }
 0x41e   :  { %2284 = vmatprep.subr.mxu1 %v4375_v15 }
 0x421   :  { %2285 = vmatpush1.msra.mxu1 %v2153_v19 }
 0x422   :  { %2309 = vmatmul.mubr.f32.vlgmr.msra.gmra.mrb[8].mxu1 %v2157_v35  ;;  %v2864_v35 = vld [vmem:[%s7285_s8] sm:$0xff] }
 0x423   :  { %3090 = vmatprep.mubr.msk.f32.mxu1 %vm1778_vm3, %v6792_v50  ;;  %v2382_v50 = vld [vmem:[%s7284_s6 + $0x10] sm:$0xff]  ;;  %v4259_v5 = vpack.c.bf16 %v2865_v29, %v2864_v35  ;;  %v2583_v35 = vld [vmem:[%s7284_s6 + $0xe8] sm:$0xff] }
 0x424   :  { %v4163_v30 = vpack.c.bf16 %v2383_v27, %v2382_v50  ;;  %v2484_v27 = vld [vmem:[%s7284_s6 + $0x70] sm:$0xff] }
 0x425   :  { %4260 = vmatprep.subr.bf16.mxu1 %v4259_v5 }
 0x426   :  { %2314 = vmatmul.mubr.f32.gmra.mrb[10].mxu1 %v6904_v8  ;;  %4164 = vmatprep.subr.bf16.mxu0 %v4163_v30 }
 0x427   :  { %4166 = vmatpush3.bf16.msra.mxu0 %v4163_v30  ;;  %4262 = vmatpush3.bf16.msra.mxu1 %v4259_v5  ;;  %v2485_v30 = vld [vmem:[%s7284_s6 + $0x78] sm:$0xff] }
 0x428   :  { %4168 = vmatprep.subr.bf16.mxu0 %v4167_v41  ;;  %4264 = vmatprep.subr.bf16.mxu1 %v4263_v56  ;;  %v2669_v5 = vld [vmem:[%s7284_s6 + $0xf8] sm:$0xff] }
 0x429   :  { %v4219_v45 = vpack.c.bf16 %v2669_v5, %v2668_v3  ;;  %v2979_v3 = vld [vmem:[%s7287_s10 + $0x48] sm:$0xff] }
 0x42b   :  { %4170 = vmatpush3.bf16.msra.mxu0 %v4167_v41  ;;  %4266 = vmatpush3.bf16.msra.mxu1 %v4263_v56  ;;  %v4191_v41 = vpack.c.bf16 %v2487_v39, %v2486_v38  ;;  %v2670_v56 = vld [vmem:[%s7284_s6 + $0x100] sm:$0xff] }
 0x42c   :  { %4172 = vmatprep.subr.bf16.mxu0 %v4171_v47  ;;  %4268 = vmatprep.subr.bf16.mxu1 %v4267_v9  ;;  %v4223_v31 = vpack.c.bf16 %v2671_v6, %v2670_v56  ;;  %v2876_v39 = vld [vmem:[%s7285_s8 + $0x60] sm:$0xff] }
 0x42d   :  { %v3103_v56 = vld [vmem:[%s7289_s9] ss:$0 sm:$0xff] }
 0x42f   :  { %4174 = vmatpush3.bf16.msra.mxu0 %v4171_v47  ;;  %4270 = vmatpush3.bf16.msra.mxu1 %v4267_v9  ;;  %v4195_v47 = vpack.c.bf16 %v2489_v32, %v2488_v28  ;;  %v2970_v32 = vld [vmem:[%s7287_s10] sm:$0xff] }
 0x430   :  { %4176 = vmatprep.subr.bf16.mxu0 %v4175_v51  ;;  %4272 = vmatprep.subr.bf16.mxu1 %v4271_v58 }
 0x433   :  { %4178 = vmatpush3.bf16.msra.mxu0 %v4175_v51  ;;  %4274 = vmatpush3.bf16.msra.mxu1 %v4271_v58  ;;  %v4199_v51 = vpack.c.bf16 %v2575_v49, %v2574_v48  ;;  %v2673_v58 = vld [vmem:[%s7284_s6 + $0x118] sm:$0xff]  ;;  %v3094_v49 = vld [vmem:[%s7288_s7] ss:$0 sm:$0xff] }
 0x434   :  { %4180 = vmatprep.subr.bf16.mxu0 %v7024_v59  ;;  %4276 = vmatprep.subr.bf16.mxu1 %v4275_v11  ;;  %v4227_v10 = vpack.c.bf16 %v2673_v58, %v2672_v26 }
 0x437   :  { %4278 = vmatpush3.bf16.msra.mxu1 %v4275_v11  ;;  %v2674_v11 = vld [vmem:[%s7284_s6 + $0x120] sm:$0xff] }
 0x438   :  { %4280 = vmatprep.subr.bf16.mxu1 %v4279_v46  ;;  %v4231_v13 = vpack.c.bf16 %v2675_v12, %v2674_v11 }
 0x43b   :  { %4282 = vmatpush3.bf16.msra.mxu1 %v4279_v46  ;;  %v2676_v46 = vld [vmem:[%s7284_s6 + $0x130] sm:$0xff] }
 0x4cb   :  { %v2233_v20 = vpop.f32.mrb[4].mxu1 }
 0x4cc   :  { %v2235_v21 = vpop.f32.mrb[5].mxu1 }
 0x4cd   :  { %2329 = vrot.lane.b32.xlu0 %v2235_v21, %s4379_s3 }
 0x4cf   :  { %v2239_v24 = vpop.f32.mrb[6].mxu1 }
 0x4d0   :  { %v2241_v4 = vpop.f32.mrb[7].mxu1 }
 0x4d1   :  { %2333 = vrot.lane.b32.xlu0 %v2241_v4, %s4379_s3 }
 0x4f5   :  { %v2310_v33 = vpop.f32.mrb[8].mxu1 }
 0x4f6   :  { %2331 = vrot.lane.b32.xlu1 %v2310_v33, %s4379_s3  ;;  %v2312_v34 = vpop.f32.mrb[9].mxu1 }
 0x4f9   :  { %v2315_v36 = vpop.f32.mrb[10].mxu1 }
 0x4fa   :  { %2335 = vrot.lane.b32.xlu1 %v2315_v36, %s4379_s3  ;;  %v2317_v37 = vpop.f32.mrb[11].mxu1 }
 0x4fb   :  { %v4187_v37 = vpack.c.bf16 %v2485_v30, %v2484_v27  ;;  %v2773_v27 = vld [vmem:[%s7284_s6 + $0x178] sm:$0xff] }
 0x53f   :  { %v2330_v52 = vpop.permute.xlu0 %2329 }
 0x543   :  { %v2334_v61 = vpop.permute.xlu0 %2333 }
 0x568   :  { %v2332_v55 = vpop.permute.xlu1 %2331 }
 0x569   :  { %v2338_v60 = vsel %vm2337_vm5, %v2330_v52, %v2332_v55  ;;  %v2345_v42 = vmax.f32 %v2235_v21, %v2332_v55  ;;  %v2576_v52 = vld [vmem:[%s7284_s6 + $0xb0] sm:$0xff] }
 0x56a   :  { %v2344_v8 = vmax.f32 %v2233_v20, %v2338_v60  ;;  %v2578_v60 = vld [vmem:[%s7284_s6 + $0xc0] sm:$0xff] }
 0x56b   :  { %2354 = vrot.lane.b32.xlu1 %v2345_v42, %s4376_s16  ;;  %v2579_v42 = vld [vmem:[%s7284_s6 + $0xc8] sm:$0xff] }
 0x56c   :  { %2352 = vrot.lane.b32.xlu0 %v2344_v8, %s4376_s16  ;;  %v2336_v62 = vpop.permute.xlu1 %2335 }
 0x56d   :  { %v2339_v57 = vsel %vm2337_vm5, %v2334_v61, %v2336_v62  ;;  %v2347_v63 = vmax.f32 %v2241_v4, %v2336_v62  ;;  %v2482_v4 = vld [vmem:[%s7284_s6 + $0x60] sm:$0xff]  ;;  %v4207_v61 = vpack.c.bf16 %v2579_v42, %v2578_v60  ;;  %v2580_v62 = vld [vmem:[%s7284_s6 + $0xd0] sm:$0xff] }
 0x56e   :  { %v2346_v0 = vmax.f32 %v2239_v24, %v2339_v57  ;;  %v4183_v50 = vpack.c.bf16 %v2483_v22, %v2482_v4  ;;  %v2581_v57 = vld [vmem:[%s7284_s6 + $0xd8] sm:$0xff]  ;;  %v2770_v22 = vld [vmem:[%s7284_s6 + $0x160] sm:$0xff] }
 0x56f   :  { %2358 = vrot.lane.b32.xlu1 %v2347_v63, %s4376_s16  ;;  %v4211_v63 = vpack.c.bf16 %v2581_v57, %v2580_v62  ;;  %v2975_v62 = vld [vmem:[%s7287_s10 + $0x28] sm:$0xff] }
 0x570   :  { %2356 = vrot.lane.b32.xlu0 %v2346_v0, %s4376_s16 }
 0x5dd   :  { %v2355_v43 = vpop.permute.xlu1 %2354 }
 0x5de   :  { %v2353_v7 = vpop.permute.xlu0 %2352 }
 0x5df   :  { %v2360_v2 = vsel %vm1577_vm0, %v2353_v7, %v2355_v43  ;;  %v2677_v43 = vld [vmem:[%s7284_s6 + $0x138] sm:$0xff] }
 0x5e0   :  { %v2364_v16 = vmax.f32 %v2344_v8, %v2360_v2  ;;  %v4235_v7 = vpack.c.bf16 %v2677_v43, %v2676_v46  ;;  %v2767_v2 = vld [vmem:[%s7284_s6 + $0x148] sm:$0xff] }
 0x5e1   :  { %v2359_v17 = vpop.permute.xlu1 %2358 }
 0x5e2   :  { %v2373_v18 = vadd.f32 %v3091_v14, %v2364_v16  ;;  %v2357_v44 = vpop.permute.xlu0 %2356 }
 0x5e3   :  { %v2361_v19 = vsel %vm1577_vm0, %v2357_v44, %v2359_v17  ;;  %v2683_v17 = vrot.slane %v4375_v15, 3  ;;  %v2769_v44 = vld [vmem:[%s7284_s6 + $0x158] sm:$0xff] }
 0x5e4   :  { %v7072_v20 = vmax.f32 %v2373_v18, 0.0  ;;  %v2365_v21 = vmax.f32 %v2346_v0, %v2361_v19  ;;  %v2582_v0 = vld [vmem:[%s7284_s6 + $0xe0] sm:$0xff]  ;;  %v2768_v18 = vld [vmem:[%s7284_s6 + $0x150] sm:$0xff] }
 0x5e5   :  { %v4215_v29 = vpack.c.bf16 %v2583_v35, %v2582_v0  ;;  %v2977_v0 = vld [vmem:[%s7287_s10 + $0x38] sm:$0xff] }
 0x5e6   :  { %v2374_v24 = vadd.f32 %v3091_v14, %v2365_v21  ;;  %3220 = vmatprep.mubr.msk.f32.mxu0 %vm2390_vm6, %v7072_v20  ;;  %v2490_v33 = vrot.slane %v7072_v20, 1  ;;  %v2584_v55 = vrot.slane %v7072_v20, 2  ;;  %v2680_v9 = vrot.slane %v7072_v20, 3  ;;  %v2766_v14 = vld [vmem:[%s7284_s6 + $0x140] sm:$0xff] }
 0x5e7   :  { %v4239_v16 = vpack.c.bf16 %v2767_v2, %v2766_v14  ;;  %v2776_v21 = vrot.slane %v7072_v20, 4 }
 0x5e8   :  { %v2376_v23 = vmax.f32 %v2374_v24, 0.0  ;;  %v4243_v24 = vpack.c.bf16 %v2769_v44, %v2768_v18 }
 0x5ea   :  { %v7083_v25 = vsel %vm2377_vm7, %v2376_v23, 0.0  ;;  %v2771_v23 = vld [vmem:[%s7284_s6 + $0x168] sm:$0xff] }
 0x5eb   :  { %3221 = vmatmul.mubr.msk.f32.vlgmr.msra.gmra.mrb[8].mxu0 %vm2390_vm6, %v7083_v25  ;;  %v2491_v34 = vrot.slane %v7083_v25, 1  ;;  %v2585_v54 = vrot.slane %v7083_v25, 2  ;;  %v2681_v40 = vrot.slane %v7083_v25, 3  ;;  %v2777_v19 = vrot.slane %v7083_v25, 4  ;;  %v2772_v25 = vld [vmem:[%s7284_s6 + $0x170] sm:$0xff] }
 0x5ec   :  { %4182 = vmatpush3.bf16.msra.mxu0 %v7024_v59  ;;  %v4203_v59 = vpack.c.bf16 %v2577_v53, %v2576_v52  ;;  %v4247_v20 = vpack.c.bf16 %v2771_v23, %v2770_v22  ;;  %v4251_v30 = vpack.c.bf16 %v2773_v27, %v2772_v25 }
 0x5ed   :  { %4184 = vmatprep.subr.bf16.mxu0 %v4183_v50  ;;  %v2492_v36 = vsel %vm1769_vm2, %v2490_v33, %v2491_v34  ;;  %v2586_v8 = vsel %vm2154_vm4, %v2584_v55, %v2585_v54  ;;  %v2682_v1 = vsel %vm2679_vm8, %v2680_v9, %v2681_v40  ;;  %v2684_v4 = vsel %vm2679_vm8, %v2681_v40, %v2683_v17  ;;  %v2774_v33 = vld [vmem:[%s7284_s6 + $0x180] sm:$0xff]  ;;  %v2972_v55 = vld [vmem:[%s7287_s10 + $0x10] sm:$0xff] }
 0x5ee   :  { %3243 = vmatprep.mubr.msk.f32.mxu0 %vm2390_vm6, %v2492_v36 }
 0x5f0   :  { %4186 = vmatpush3.bf16.msra.mxu0 %v4183_v50  ;;  %v2778_v50 = vsel %vm2377_vm7, %v2776_v21, %v2777_v19 }
 0x5f1   :  { %4188 = vmatprep.subr.bf16.mxu0 %v4187_v37 }
 0x5f4   :  { %4190 = vmatpush3.bf16.msra.mxu0 %v4187_v37  ;;  %v2779_v37 = vrot.slane %v4375_v15, 4  ;;  %v2878_v15 = vld [vmem:[%s7285_s8 + $0x70] sm:$0xff] }
 0x5f5   :  { %4192 = vmatprep.subr.bf16.mxu0 %v4191_v41 }
 0x5f6   :  { %v2780_v38 = vsel %vm2377_vm7, %v2777_v19, %v2779_v37 }
 0x5f8   :  { %4194 = vmatpush3.bf16.msra.mxu0 %v4191_v41  ;;  %v2877_v41 = vld [vmem:[%s7285_s8 + $0x68] sm:$0xff] }
 0x5f9   :  { %4196 = vmatprep.subr.bf16.mxu0 %v4195_v47  ;;  %v4283_v28 = vpack.c.bf16 %v2877_v41, %v2876_v39 }
 0x5fb   :  { %4284 = vmatprep.subr.bf16.mxu1 %v4283_v28 }
 0x5fc   :  { %4198 = vmatpush3.bf16.msra.mxu0 %v4195_v47  ;;  %4286 = vmatpush3.bf16.msra.mxu1 %v4283_v28  ;;  %v2971_v47 = vld [vmem:[%s7287_s10 + $0x8] sm:$0xff] }
 0x5fd   :  { %4200 = vmatprep.subr.bf16.mxu0 %v4199_v51  ;;  %3343 = vmatprep.subr.mxu1 %v2878_v15  ;;  %v4287_v48 = vpack.c.bf16 %v2971_v47, %v2970_v32 }
 0x5ff   :  { %3244 = vmatmul.mubr.msk.f32.vlgmr.msra.gmra.mrb[8].mxu0 %vm2390_vm6, %v2491_v34  ;;  %v2775_v34 = vld [vmem:[%s7284_s6 + $0x188] sm:$0xff] }
 0x600   :  { %4202 = vmatpush3.bf16.msra.mxu0 %v4199_v51  ;;  %3266 = vmatprep.mubr.msk.f32.mxu0 %vm2390_vm6, %v2586_v8  ;;  %v4255_v36 = vpack.c.bf16 %v2775_v34, %v2774_v33 }
 0x601   :  { %4204 = vmatprep.subr.bf16.mxu0 %v4203_v59  ;;  %3344 = vmatpush3.msra.mxu1 %v2878_v15 }
 0x602   :  { %4288 = vmatprep.subr.bf16.mxu1 %v4287_v48 }
 0x604   :  { %4206 = vmatpush3.bf16.msra.mxu0 %v4203_v59  ;;  %v2973_v59 = vld [vmem:[%s7287_s10 + $0x18] sm:$0xff] }
 0x605   :  { %4208 = vmatprep.subr.bf16.mxu0 %v4207_v61  ;;  %v4291_v8 = vpack.c.bf16 %v2973_v59, %v2972_v55 }
 0x608   :  { %4210 = vmatpush3.bf16.msra.mxu0 %v4207_v61  ;;  %v2974_v61 = vld [vmem:[%s7287_s10 + $0x20] sm:$0xff] }
 0x609   :  { %4212 = vmatprep.subr.bf16.mxu0 %v4211_v63  ;;  %v4295_v57 = vpack.c.bf16 %v2975_v62, %v2974_v61 }
 0x60c   :  { %4214 = vmatpush3.bf16.msra.mxu0 %v4211_v63  ;;  %v2976_v63 = vld [vmem:[%s7287_s10 + $0x30] sm:$0xff] }
 0x60d   :  { %4216 = vmatprep.subr.bf16.mxu0 %v4215_v29  ;;  %v4299_v35 = vpack.c.bf16 %v2977_v0, %v2976_v63 }
 0x610   :  { %4218 = vmatpush3.bf16.msra.mxu0 %v4215_v29  ;;  %v2978_v29 = vld [vmem:[%s7287_s10 + $0x40] sm:$0xff] }
 0x611   :  { %4220 = vmatprep.subr.bf16.mxu0 %v4219_v45  ;;  %v4303_v5 = vpack.c.bf16 %v2979_v3, %v2978_v29 }
 0x613   :  { %3267 = vmatmul.mubr.msk.f32.vlgmr.msra.gmra.mrb[8].mxu0 %vm2390_vm6, %v2585_v54 }
 0x614   :  { %4222 = vmatpush3.bf16.msra.mxu0 %v4219_v45  ;;  %3289 = vmatprep.mubr.msk.f32.mxu0 %vm2390_vm6, %v2682_v1  ;;  %v2980_v45 = vld [vmem:[%s7287_s10 + $0x50] sm:$0xf]  ;;  %v3106_v1 = vld [vmem:[%s7290_s11] ss:$0 sm:$0xff] }
 0x615   :  { %4224 = vmatprep.subr.bf16.mxu0 %v4223_v31 }
 0x618   :  { %4226 = vmatpush3.bf16.msra.mxu0 %v4223_v31 }
 0x619   :  { %4228 = vmatprep.subr.bf16.mxu0 %v4227_v10 }
 0x61c   :  { %4230 = vmatpush3.bf16.msra.mxu0 %v4227_v10 }
 0x61d   :  { %4232 = vmatprep.subr.bf16.mxu0 %v4231_v13 }
 0x620   :  { %4234 = vmatpush3.bf16.msra.mxu0 %v4231_v13 }
 0x621   :  { %4236 = vmatprep.subr.bf16.mxu0 %v4235_v7 }
 0x624   :  { %4238 = vmatpush3.bf16.msra.mxu0 %v4235_v7 }
 0x625   :  { %4240 = vmatprep.subr.bf16.mxu0 %v4239_v16 }
 0x627   :  { %3290 = vmatmul.mubr.msk.f32.vlgmr.msra.gmra.mrb[8].mxu0 %vm2390_vm6, %v2684_v4 }
 0x628   :  { %4242 = vmatpush3.bf16.msra.mxu0 %v4239_v16  ;;  %3312 = vmatprep.mubr.msk.f32.mxu0 %vm2390_vm6, %v2778_v50 }
 0x629   :  { %4244 = vmatprep.subr.bf16.mxu0 %v4243_v24 }
 0x62c   :  { %4246 = vmatpush3.bf16.msra.mxu0 %v4243_v24 }
 0x62d   :  { %4248 = vmatprep.subr.bf16.mxu0 %v4247_v20 }
 0x630   :  { %4250 = vmatpush3.bf16.msra.mxu0 %v4247_v20 }
 0x631   :  { %4252 = vmatprep.subr.bf16.mxu0 %v4251_v30 }
 0x634   :  { %4254 = vmatpush3.bf16.msra.mxu0 %v4251_v30 }
 0x635   :  { %4256 = vmatprep.subr.bf16.mxu0 %v4255_v36 }
 0x638   :  { %4258 = vmatpush3.bf16.msra.mxu0 %v4255_v36 }
 0x63b   :  { %3313 = vmatmul.mubr.msk.f32.vlgmr.msra.gmra.mrb[8].mxu0 %vm2390_vm6, %v2780_v38 }
 0x70e   :  { %v3314_v51 = vpop.f32.mrb[8].mxu0 }
 0x70f   :  { %v4307_v52 = vadd.f32 %v3314_v51, %v3094_v49  ;;  %v2851_v53 = vpop.f32.mrb[9].mxu0 }
 0x710   :  { %v4308_v54 = vadd.f32 %v3094_v49, %v2851_v53 }
 0x711   :  { %v2863_v42 = vmax.f32 %v4307_v52, 0.0 }
 0x712   :  { %v2862_v60 = vmax.f32 %v4308_v54, 0.0 }
 0x714   :  { %3345 = vmatprep.mubr.msk.f32.mxu1 %vm2886_vm9, %v2862_v60 }
 0x715   :  { %3346 = vmatmul.mubr.msk.f32.vlgmr.msra.gmra.mrb[12].mxu1 %vm2886_vm9, %v2863_v42 }
 0x716   :  { %4290 = vmatpush3.bf16.msra.mxu1 %v4287_v48 }
 0x717   :  { %4292 = vmatprep.subr.bf16.mxu1 %v4291_v8 }
 0x71a   :  { %4294 = vmatpush3.bf16.msra.mxu1 %v4291_v8 }
 0x71b   :  { %4296 = vmatprep.subr.bf16.mxu1 %v4295_v57 }
 0x71e   :  { %4298 = vmatpush3.bf16.msra.mxu1 %v4295_v57 }
 0x71f   :  { %4300 = vmatprep.subr.bf16.mxu1 %v4299_v35 }
 0x722   :  { %4302 = vmatpush3.bf16.msra.mxu1 %v4299_v35 }
 0x723   :  { %4304 = vmatprep.subr.bf16.mxu1 %v4303_v5 }
 0x726   :  { %4306 = vmatpush3.bf16.msra.mxu1 %v4303_v5 }
 0x727   :  { %3368 = vmatprep.subr.msk.mxu1 %vm2377_vm7, %v2980_v45 }
 0x72a   :  { %3369 = vmatpush3.msk.msra.mxu1 %vm2377_vm7, %v2980_v45 }
 0x7e8   :  { %v3347_v6 = vpop.f32.mrb[12].mxu1 }
 0x7e9   :  { %v2965_v40 = vadd.f32 %v3347_v6, %v3103_v56  ;;  %v2959_v9 = vpop.f32.mrb[13].mxu1 }
 0x7ea   :  { %v2960_v31 = vadd.f32 %v3103_v56, %v2959_v9 }
 0x7eb   :  { %v2969_v58 = vmax.f32 %v2965_v40, 0.0 }
 0x7ec   :  { %v2968_v26 = vmax.f32 %v2960_v31, 0.0 }
 0x7ee   :  { %3370 = vmatprep.mubr.msk.f32.mxu1 %vm2988_vm10, %v2968_v26 }
 0x7ef   :  { %3371 = vmatmul.mubr.msk.f32.vlgmr.msra.gmra.mrb[14].mxu1 %vm2988_vm10, %v2969_v58 }
 0x8c2   :  { %v3372_v10 = vpop.f32.mrb[14].mxu1 }
 0x8c3   :  { %v3070_v11 = vadd.f32 %v3372_v10, %v3106_v1  ;;  %v3064_v12 = vpop.f32.mrb[15].mxu1 }
 0x8c4   :  { %v3065_v13 = vadd.f32 %v3106_v1, %v3064_v12 }
 0x8c5   :  { %3074 = vst [vmem:[%s7291_s12 + $0x8] sm:$0x3f] %v3070_v11 }
 0x8c6   :  { %3073 = vst [vmem:[%s7291_s12] sm:$0xff] %v3065_v13 }

</bundles_post_ra>
